<compile_context>
chip_gen: v7x
topology: tpu7x:2x2x1
jax: 0.10.0
libtpu: 0.0.40
codegen_flags: <defaults>
</compile_context>

<pallas_src>
import jax
import jax.numpy as jnp
from jax import lax
from jax.experimental import pallas as pl
from jax.experimental.pallas import tpu as pltpu

_DEFAULT_VMEM_LIMIT = 48 * 1024 * 1024     # safe on every generation (v7x: 64 MiB phys)


def _vmem_limit_bytes():
    """Generation-aware scoped-VMEM limit: 75% of physical VMEM."""
    try:
        cap = getattr(pltpu.get_tpu_info(), "vmem_capacity_bytes", None)
        if cap:
            return int(cap) * 3 // 4
    except Exception:
        pass
    return _DEFAULT_VMEM_LIMIT


def _conv_params():
    return pltpu.CompilerParams(dimension_semantics=("parallel",),
                                vmem_limit_bytes=_vmem_limit_bytes())


# ----------------------------------------------------------------------------
# Kernels
# ----------------------------------------------------------------------------
def conv1_im2col_relu_pool_kernel(xcol_ref, w_ref, b_ref, out_ref):
    """Conv1d(Cin=1, k=3, p=1) + ReLU + MaxPool1d(2,2), time-major output.

    xcol_ref: (2*Lt, B, 3)   f32   xcol[t, b, k] = xpad[b, t0 + t + k]
    w_ref   : (3, Cout)      f32
    b_ref   : (1, Cout)      f32
    out_ref : (Lt, B, Cout)  bf16  pooled, time-major
    """
    Lt2, B, K = xcol_ref.shape
    Cout = w_ref.shape[1]
    x = xcol_ref[...].reshape(Lt2 * B, K)
    y = jnp.dot(x, w_ref[...], preferred_element_type=jnp.float32) + b_ref[...]
    y = y.reshape(Lt2 // 2, 2, B, Cout).max(axis=1)     # MaxPool1d(2, 2) over time
    y = jnp.maximum(y, 0.0)                             # ReLU (commutes with max)
    out_ref[...] = y.astype(out_ref.dtype)


def conv2_im2col_relu_pool_kernel(xcol_ref, w_ref, b_ref, out_ref):
    """Conv1d(Cin=64, k=3, p=1) + ReLU + MaxPool1d(2,2) as ONE K=192 matmul.

    xcol_ref: (2*Lt, B, 3*Cin)  bf16  taps concatenated on the lane axis
    w_ref   : (3*Cin, Cout)     bf16
    b_ref   : (1, Cout)         f32
    out_ref : (Lt, B, Cout)     bf16  pooled, time-major
    """
    Lt2, B, KC = xcol_ref.shape
    Cout = w_ref.shape[1]
    x = xcol_ref[...].reshape(Lt2 * B, KC)
    y = jnp.dot(x, w_ref[...], preferred_element_type=jnp.float32) + b_ref[...]
    y = y.reshape(Lt2 // 2, 2, B, Cout).max(axis=1)
    y = jnp.maximum(y, 0.0)
    out_ref[...] = y.astype(out_ref.dtype)


def make_lstm_stack_fc_kernel(num_layers, hidden_dim):
    """Full LSTM stack + final Linear in one kernel (gate order i, f, g, o)."""
    H = hidden_dim

    def kernel(*refs):
        x_ref = refs[0]                                   # (T, B, D0) bf16 time-major
        layer_refs = refs[1:1 + 3 * num_layers]           # (wih, whh, bias) per layer
        fcw_ref = refs[1 + 3 * num_layers]                # (H, C) f32
        fcb_ref = refs[2 + 3 * num_layers]                # (1, C) f32
        out_ref = refs[3 + 3 * num_layers]                # (B, C) f32
        seq_sc, xw_sc, h_sc, c_sc = refs[4 + 3 * num_layers:]

        T, B, _ = x_ref.shape

        for layer in range(num_layers):
            wih_ref = layer_refs[3 * layer]                # (D, 4H) bf16
            whh_ref = layer_refs[3 * layer + 1]            # (H, 4H) bf16
            b_ref = layer_refs[3 * layer + 2]              # (1, 4H) f32 (b_ih + b_hh)
            src = x_ref if layer == 0 else seq_sc
            D = src.shape[-1]

            # Hoisted input projection for ALL timesteps: one big MXU matmul.
            # Stored bf16 (halves the largest scratch); bias added per-step in f32.
            x_all = src[...].reshape(T * B, D).astype(jnp.bfloat16)
            xw = jnp.dot(x_all, wih_ref[...], preferred_element_type=jnp.float32)
            xw_sc[...] = xw.reshape(T, B, 4 * H).astype(xw_sc.dtype)

            h_sc[...] = jnp.zeros_like(h_sc)
            c_sc[...] = jnp.zeros_like(c_sc)
            emit_seq = layer < num_layers - 1

            def step(t, carry, whh_ref=whh_ref, b_ref=b_ref, emit_seq=emit_seq):
                # TODO(synk): hold W_hh resident in the MXU across the time loop
                # (pltpu.matmul_push_rhs / matmul_acc_lhs / matmul_pop) if the
                # Mosaic dump shows the loop-invariant RHS push is not hoisted.
                gates = (xw_sc[t].astype(jnp.float32) + b_ref[...]
                         + jnp.dot(h_sc[...].astype(jnp.bfloat16), whh_ref[...],
                                   preferred_element_type=jnp.float32))
                if H < 128:
                    # Small H: transcendentals on the lane-dense (B, 4H) slab,
                    # then slice -- better EUP/VPU lane utilization than four
                    # H-wide, lane-sparse slices.
                    sig = jax.nn.sigmoid(gates)
                    tan = jnp.tanh(gates)
                    i_g, f_g, o_g = sig[:, :H], sig[:, H:2 * H], sig[:, 3 * H:]
                    g_g = tan[:, 2 * H:3 * H]
                else:
                    i_g = jax.nn.sigmoid(gates[:, 0 * H:1 * H])
                    f_g = jax.nn.sigmoid(gates[:, 1 * H:2 * H])
                    g_g = jnp.tanh(gates[:, 2 * H:3 * H])
                    o_g = jax.nn.sigmoid(gates[:, 3 * H:4 * H])
                c_new = f_g * c_sc[...] + i_g * g_g
                h_new = o_g * jnp.tanh(c_new)
                c_sc[...] = c_new
                h_sc[...] = h_new
                if emit_seq:
                    seq_sc[t] = h_new.astype(seq_sc.dtype)
                return carry

            # Short fixed trip counts: unroll so the LLO scheduler sees the loop.
            lax.fori_loop(0, T, step, 0, unroll=True if T <= 64 else 8)

        # Fused final Linear on the last timestep's hidden state of the last layer.
        out_ref[...] = (jnp.dot(h_sc[...], fcw_ref[...],
                                preferred_element_type=jnp.float32) + fcb_ref[...])

    return kernel


# ----------------------------------------------------------------------------
# Wrappers (pallas_call plumbing)
# ----------------------------------------------------------------------------
def conv1_relu_pool(x, w, b, *, lt_max=256):
    """x: (B, L) f32 -> time-major (L//2, B, 64) bf16."""
    B, L = x.shape
    Cout = w.shape[1]
    Lout = L // 2                                          # MaxPool1d floor semantics
    xp_t = jnp.pad(x, ((0, 0), (1, 1))).T                  # (L+2, B) time-major
    # im2col built once in XLA: xcol[t, b, k] = xpad_t[t + k, b]
    xcol = jnp.stack([xp_t[0:L], xp_t[1:L + 1], xp_t[2:L + 2]], axis=-1)  # (L, B, 3)
    lt = min(Lout, lt_max)
    # TODO(synk): the (..., 3) minor dim still lane-pads to 128 in VMEM; for very
    # long L a taps-on-sublane layout (transposed-LHS matmul) would cut that.
    return pl.pallas_call(
        conv1_im2col_relu_pool_kernel,
        out_shape=jax.ShapeDtypeStruct((Lout, B, Cout), jnp.bfloat16),
        grid=(pl.cdiv(Lout, lt),),
        in_specs=[pl.BlockSpec((2 * lt, B, 3), lambda i: (i, 0, 0)),
                  pl.BlockSpec((3, Cout), lambda i: (0, 0)),
                  pl.BlockSpec((1, Cout), lambda i: (0, 0))],
        out_specs=pl.BlockSpec((lt, B, Cout), lambda i: (i, 0, 0)),
        compiler_params=_conv_params(),
    )(xcol, w, b)


def conv2_relu_pool(h, w, b, *, lt_max=256):
    """h: time-major (Lc, B, Cin) bf16 -> time-major (Lc//2, B, Cout) bf16."""
    Lc, B, Cin = h.shape
    Cout = w.shape[1]
    Lout = Lc // 2
    hp = jnp.pad(h, ((1, 1), (0, 0), (0, 0)))
    # Lane-aligned im2col with all 3 taps concatenated -> single K=3*Cin matmul.
    xcol = jnp.concatenate([hp[0:Lc], hp[1:Lc + 1], hp[2:Lc + 2]], axis=-1)  # (Lc,B,192)
    lt = min(Lout, lt_max)
    return pl.pallas_call(
        conv2_im2col_relu_pool_kernel,
        out_shape=jax.ShapeDtypeStruct((Lout, B, Cout), jnp.bfloat16),
        grid=(pl.cdiv(Lout, lt),),
        in_specs=[pl.BlockSpec((2 * lt, B, 3 * Cin), lambda i: (i, 0, 0)),
                  pl.BlockSpec((3 * Cin, Cout), lambda i: (0, 0)),
                  pl.BlockSpec((1, Cout), lambda i: (0, 0))],
        out_specs=pl.BlockSpec((lt, B, Cout), lambda i: (i, 0, 0)),
        compiler_params=_conv_params(),
    )(xcol, w, b)


def lstm_stack_fc(seq_tm, lstm_params, fc_w, fc_b):
    """seq_tm: time-major (T, B, D) bf16 -> (B, num_classes) f32 logits."""
    T, B, _ = seq_tm.shape
    H = lstm_params[0][1].shape[0]
    C = fc_w.shape[1]
    num_layers = len(lstm_params)
    flat_w = [w for layer in lstm_params for w in layer]
    n_in = 1 + len(flat_w) + 2
    vmem = pl.BlockSpec(memory_space=pltpu.MemorySpace.VMEM)
    # TODO(synk): for very large T*B*H, chunk the hoisted projection over T
    # (emit_pipeline) instead of one (T, B, 4H) scratch to stay in v7x's 64 MiB.
    return pl.pallas_call(
        make_lstm_stack_fc_kernel(num_layers, H),
        out_shape=jax.ShapeDtypeStruct((B, C), jnp.float32),
        in_specs=[vmem] * n_in,
        out_specs=vmem,
        scratch_shapes=[pltpu.VMEM((T, B, H), jnp.bfloat16),       # inter-layer sequence
                        pltpu.VMEM((T, B, 4 * H), jnp.bfloat16),   # hoisted x @ W_ih
                        pltpu.VMEM((B, H), jnp.float32),           # h
                        pltpu.VMEM((B, H), jnp.float32)],          # c
        compiler_params=pltpu.CompilerParams(vmem_limit_bytes=_vmem_limit_bytes()),
    )(seq_tm, *flat_w, fc_w, fc_b)


# ----------------------------------------------------------------------------
# Parameters & forward
# ----------------------------------------------------------------------------
def init_params(key, hidden_dim, num_layers, num_classes):
    ks = jax.random.split(key, 6 + 3 * num_layers)

    def rnd(k, shape, scale):
        return jax.random.normal(k, shape, jnp.float32) * scale

    params = {
        # conv1: PyTorch (64, 1, 3) repacked as (K, Cout) = (3, 64)
        "conv1_w": rnd(ks[0], (3, 64), 0.30),
        "conv1_b": rnd(ks[1], (1, 64), 0.10),
        # conv2: PyTorch (128, 64, 3) repacked as (K*Cin, Cout) = (192, 128) bf16;
        # row order matches the wrapper's tap-concat: row = tap * 64 + cin.
        "conv2_w": rnd(ks[2], (3 * 64, 128), 0.05).astype(jnp.bfloat16),
        "conv2_b": rnd(ks[3], (1, 128), 0.10),
    }
    lstm = []
    i = 4
    for layer in range(num_layers):
        d = 128 if layer == 0 else hidden_dim
        # PyTorch weight_ih_l (4H, D) -> (D, 4H), gate order (i, f, g, o); bf16 MXU operands
        wih = rnd(ks[i], (d, 4 * hidden_dim), 0.05).astype(jnp.bfloat16); i += 1
        whh = rnd(ks[i], (hidden_dim, 4 * hidden_dim), 0.05).astype(jnp.bfloat16); i += 1
        bg = rnd(ks[i], (1, 4 * hidden_dim), 0.05); i += 1     # b_ih + b_hh combined
        lstm.append((wih, whh, bg))
    params["lstm"] = lstm
    params["fc_w"] = rnd(ks[i], (hidden_dim, num_classes), 0.10); i += 1
    params["fc_b"] = rnd(ks[i], (1, num_classes), 0.10)
    return params


def cnn_lstm_forward(params, x):
    """x: (B, L) float32 — same as the PyTorch forward input before unsqueeze(1)."""
    h = conv1_relu_pool(x, params["conv1_w"], params["conv1_b"])     # (L/2, B, 64) bf16
    h = conv2_relu_pool(h, params["conv2_w"], params["conv2_b"])     # (L/4, B, 128) bf16
    return lstm_stack_fc(h, params["lstm"],
                         params["fc_w"], params["fc_b"])             # (B, num_classes) f32


# ----------------------------------------------------------------------------
# Pure-JAX reference with identical math (same bf16 cast points), for validation.
# ----------------------------------------------------------------------------
def reference_forward(params, x):
    f32 = jnp.float32
    B, L = x.shape

    # conv1 + relu + pool (f32 im2col matmul), then time-major bf16
    xp = jnp.pad(x, ((0, 0), (1, 1)))
    xcol = jnp.stack([xp[:, 0:L], xp[:, 1:L + 1], xp[:, 2:L + 2]], axis=-1)   # (B, L, 3)
    y = jnp.einsum("blk,kc->blc", xcol, params["conv1_w"]) + params["conv1_b"]
    Le = 2 * (L // 2)
    y = jnp.maximum(y[:, :Le].reshape(B, Le // 2, 2, -1).max(axis=2), 0.0)
    h1 = jnp.transpose(y, (1, 0, 2)).astype(jnp.bfloat16)                     # (Lc1, B, 64)

    # conv2 + relu + pool (bf16 operands, f32 accumulation, packed K=192)
    Lc1 = h1.shape[0]
    hp = jnp.pad(h1, ((1, 1), (0, 0), (0, 0)))
    xcol2 = jnp.concatenate([hp[0:Lc1], hp[1:Lc1 + 1], hp[2:Lc1 + 2]], axis=-1)
    y2 = lax.dot_general(xcol2, params["conv2_w"], (((2,), (0,)), ((), ())),
                         preferred_element_type=f32) + params["conv2_b"]
    Le2 = 2 * (Lc1 // 2)
    y2 = jnp.maximum(y2[:Le2].reshape(Le2 // 2, 2, B, -1).max(axis=1), 0.0)
    seq = y2.astype(jnp.bfloat16)                                             # (T, B, 128)

    T = seq.shape[0]
    H = params["lstm"][0][1].shape[0]
    hs = None
    for (wih, whh, bg) in params["lstm"]:
        D = seq.shape[-1]
        xw = jnp.dot(seq.reshape(T * B, D).astype(jnp.bfloat16), wih,
                     preferred_element_type=f32).reshape(T, B, 4 * H).astype(jnp.bfloat16)
        hs = jnp.zeros((B, H), f32)
        cs = jnp.zeros((B, H), f32)
        outs = []
        for t in range(T):
            g = (xw[t].astype(f32) + bg
                 + jnp.dot(hs.astype(jnp.bfloat16), whh, preferred_element_type=f32))
            i_g = jax.nn.sigmoid(g[:, :H])
            f_g = jax.nn.sigmoid(g[:, H:2 * H])
            g_g = jnp.tanh(g[:, 2 * H:3 * H])
            o_g = jax.nn.sigmoid(g[:, 3 * H:])
            cs = f_g * cs + i_g * g_g
            hs = o_g * jnp.tanh(cs)
            outs.append(hs.astype(jnp.bfloat16))
        seq = jnp.stack(outs, axis=0)                                          # (T, B, H)
    return jnp.dot(hs, params["fc_w"], preferred_element_type=f32) + params["fc_b"]


if __name__ == "__main__":
    B, L = 2, 32                    # seq len after 2 pools: T = 8
    hidden_dim, num_layers, num_classes = 32, 2, 4

    x = jax.random.normal(jax.random.PRNGKey(0), (B, L), jnp.float32)
    params = init_params(jax.random.PRNGKey(42), hidden_dim, num_layers, num_classes)

    out = jax.block_until_ready(jax.jit(cnn_lstm_forward)(params, x))
    ref = jax.block_until_ready(reference_forward(params, x))

    assert out.shape == (B, num_classes), out.shape
    assert jnp.allclose(out, ref, atol=1e-2, rtol=1e-2), (out, ref)
    print("KERNEL_OK")
</pallas_src>

<mosaic_0001>
module attributes {stable_mosaic.version = 11 : i64} {
  func.func @conv2_im2col_relu_pool_kernel(%arg0: i32, %arg1: memref<16x2x192xbf16, #tpu.memory_space<vmem>>, %arg2: memref<192x128xbf16, #tpu.memory_space<vmem>>, %arg3: memref<1x128xf32, #tpu.memory_space<vmem>>, %arg4: memref<8x2x128xbf16, #tpu.memory_space<vmem>>) attributes {dimension_semantics = [#tpu.dimension_semantics<parallel>], iteration_bounds = array<i64: 1>, scalar_prefetch = 0 : i64, scratch_operands = 0 : i64, tpu.core_type = #tpu.core_type<tc>, window_params = [{transform_indices = @transform_0, window_bounds = array<i64: 16, 2, 192>}, {pipeline_mode = #tpu.pipeline_mode<synchronous>, transform_indices = @transform_1, window_bounds = array<i64: 192, 128>}, {pipeline_mode = #tpu.pipeline_mode<synchronous>, transform_indices = @transform_2, window_bounds = array<i64: 1, 128>}, {transform_indices = @transform_3, window_bounds = array<i64: 8, 2, 128>}]} {
    %c0 = arith.constant 0 : index
    %c0_0 = arith.constant 0 : index
    %c0_1 = arith.constant 0 : index
    %0 = vector.load %arg1[%c0, %c0_0, %c0_1] : memref<16x2x192xbf16, #tpu.memory_space<vmem>>, vector<16x2x192xbf16>
    %1 = vector.shape_cast %0 : vector<16x2x192xbf16> to vector<32x192xbf16>
    %c0_2 = arith.constant 0 : index
    %c0_3 = arith.constant 0 : index
    %2 = vector.load %arg2[%c0_2, %c0_3] : memref<192x128xbf16, #tpu.memory_space<vmem>>, vector<192x128xbf16>
    %cst = arith.constant dense<0.000000e+00> : vector<32x128xf32>
    %3 = tpu.matmul %1, %2, %cst {dimension_numbers = #tpu.dot_dimension_numbers<[1], [0], [0], [1], [0, 0, 1, 1], [], []>} : vector<32x192xbf16>, vector<192x128xbf16>, vector<32x128xf32> -> vector<32x128xf32>
    %c0_4 = arith.constant 0 : index
    %c0_5 = arith.constant 0 : index
    %4 = vector.load %arg3[%c0_4, %c0_5] : memref<1x128xf32, #tpu.memory_space<vmem>>, vector<1x128xf32>
    %5 = vector.broadcast %4 : vector<1x128xf32> to vector<32x128xf32>
    %6 = arith.addf %3, %5 : vector<32x128xf32>
    %7 = vector.shape_cast %6 : vector<32x128xf32> to vector<8x2x2x128xf32>
    %cst_6 = arith.constant dense<0xFF800000> : vector<8x2x128xf32>
    %8 = vector.multi_reduction <maximumf>, %7, %cst_6 [1] : vector<8x2x2x128xf32> to vector<8x2x128xf32>
    %cst_7 = arith.constant 0.000000e+00 : f32
    %9 = vector.broadcast %cst_7 : f32 to vector<8x2x128xf32>
    %10 = arith.maximumf %8, %9 : vector<8x2x128xf32>
    %11 = arith.truncf %10 : vector<8x2x128xf32> to vector<8x2x128xbf16>
    %c0_8 = arith.constant 0 : index
    %c0_9 = arith.constant 0 : index
    %c0_10 = arith.constant 0 : index
    %12 = vector.load %arg4[%c0_8, %c0_9, %c0_10] : memref<8x2x128xbf16, #tpu.memory_space<vmem>>, vector<8x2x128xbf16>
    tpu.vector_store %arg4[%c0_8, %c0_9, %c0_10], %11 {strides = array<i32>} : memref<8x2x128xbf16, #tpu.memory_space<vmem>>, vector<8x2x128xbf16>,
    return
  }
  func.func @transform_0(%arg0: i32) -> (i32, i32, i32) {
    %c0_i32 = arith.constant 0 : i32
    %c0_i32_0 = arith.constant 0 : i32
    %c0_i32_1 = arith.constant 0 : i32
    return %arg0, %c0_i32, %c0_i32_0 : i32, i32, i32
  }
  func.func @transform_1(%arg0: i32) -> (i32, i32) {
    %c0_i32 = arith.constant 0 : i32
    %c0_i32_0 = arith.constant 0 : i32
    %c0_i32_1 = arith.constant 0 : i32
    return %c0_i32, %c0_i32_0 : i32, i32
  }
  func.func @transform_2(%arg0: i32) -> (i32, i32) {
    %c0_i32 = arith.constant 0 : i32
    %c0_i32_0 = arith.constant 0 : i32
    %c0_i32_1 = arith.constant 0 : i32
    return %c0_i32, %c0_i32_0 : i32, i32
  }
  func.func @transform_3(%arg0: i32) -> (i32, i32, i32) {
    %c0_i32 = arith.constant 0 : i32
    %c0_i32_0 = arith.constant 0 : i32
    %c0_i32_1 = arith.constant 0 : i32
    return %arg0, %c0_i32, %c0_i32_0 : i32, i32, i32
  }
}

module attributes {stable_mosaic.version = 11 : i64} {
  func.func @conv1_im2col_relu_pool_kernel(%arg0: i32, %arg1: memref<32x2x3xf32, #tpu.memory_space<vmem>>, %arg2: memref<3x64xf32, #tpu.memory_space<vmem>>, %arg3: memref<1x64xf32, #tpu.memory_space<vmem>>, %arg4: memref<16x2x64xbf16, #tpu.memory_space<vmem>>) attributes {dimension_semantics = [#tpu.dimension_semantics<parallel>], iteration_bounds = array<i64: 1>, scalar_prefetch = 0 : i64, scratch_operands = 0 : i64, tpu.core_type = #tpu.core_type<tc>, window_params = [{transform_indices = @transform_0, window_bounds = array<i64: 32, 2, 3>}, {pipeline_mode = #tpu.pipeline_mode<synchronous>, transform_indices = @transform_1, window_bounds = array<i64: 3, 64>}, {pipeline_mode = #tpu.pipeline_mode<synchronous>, transform_indices = @transform_2, window_bounds = array<i64: 1, 64>}, {transform_indices = @transform_3, window_bounds = array<i64: 16, 2, 64>}]} {
    %c0 = arith.constant 0 : index
    %c0_0 = arith.constant 0 : index
    %c0_1 = arith.constant 0 : index
    %0 = vector.load %arg1[%c0, %c0_0, %c0_1] : memref<32x2x3xf32, #tpu.memory_space<vmem>>, vector<32x2x3xf32>
    %1 = vector.shape_cast %0 : vector<32x2x3xf32> to vector<64x3xf32>
    %c0_2 = arith.constant 0 : index
    %c0_3 = arith.constant 0 : index
    %2 = vector.load %arg2[%c0_2, %c0_3] : memref<3x64xf32, #tpu.memory_space<vmem>>, vector<3x64xf32>
    %cst = arith.constant dense<0.000000e+00> : vector<64x64xf32>
    %3 = tpu.matmul %1, %2, %cst {dimension_numbers = #tpu.dot_dimension_numbers<[1], [0], [0], [1], [0, 0, 1, 1], [], []>} : vector<64x3xf32>, vector<3x64xf32>, vector<64x64xf32> -> vector<64x64xf32>
    %c0_4 = arith.constant 0 : index
    %c0_5 = arith.constant 0 : index
    %4 = vector.load %arg3[%c0_4, %c0_5] : memref<1x64xf32, #tpu.memory_space<vmem>>, vector<1x64xf32>
    %5 = vector.broadcast %4 : vector<1x64xf32> to vector<64x64xf32>
    %6 = arith.addf %3, %5 : vector<64x64xf32>
    %7 = vector.shape_cast %6 : vector<64x64xf32> to vector<16x2x2x64xf32>
    %cst_6 = arith.constant dense<0xFF800000> : vector<16x2x64xf32>
    %8 = vector.multi_reduction <maximumf>, %7, %cst_6 [1] : vector<16x2x2x64xf32> to vector<16x2x64xf32>
    %cst_7 = arith.constant 0.000000e+00 : f32
    %9 = vector.broadcast %cst_7 : f32 to vector<16x2x64xf32>
    %10 = arith.maximumf %8, %9 : vector<16x2x64xf32>
    %11 = arith.truncf %10 : vector<16x2x64xf32> to vector<16x2x64xbf16>
    %c0_8 = arith.constant 0 : index
    %c0_9 = arith.constant 0 : index
    %c0_10 = arith.constant 0 : index
    %12 = vector.load %arg4[%c0_8, %c0_9, %c0_10] : memref<16x2x64xbf16, #tpu.memory_space<vmem>>, vector<16x2x64xbf16>
    tpu.vector_store %arg4[%c0_8, %c0_9, %c0_10], %11 {strides = array<i32>} : memref<16x2x64xbf16, #tpu.memory_space<vmem>>, vector<16x2x64xbf16>,
    return
  }
  func.func @transform_0(%arg0: i32) -> (i32, i32, i32) {
    %c0_i32 = arith.constant 0 : i32
    %c0_i32_0 = arith.constant 0 : i32
    %c0_i32_1 = arith.constant 0 : i32
    return %arg0, %c0_i32, %c0_i32_0 : i32, i32, i32
  }
  func.func @transform_1(%arg0: i32) -> (i32, i32) {
    %c0_i32 = arith.constant 0 : i32
    %c0_i32_0 = arith.constant 0 : i32
    %c0_i32_1 = arith.constant 0 : i32
    return %c0_i32, %c0_i32_0 : i32, i32
  }
  func.func @transform_2(%arg0: i32) -> (i32, i32) {
    %c0_i32 = arith.constant 0 : i32
    %c0_i32_0 = arith.constant 0 : i32
    %c0_i32_1 = arith.constant 0 : i32
    return %c0_i32, %c0_i32_0 : i32, i32
  }
  func.func @transform_3(%arg0: i32) -> (i32, i32, i32) {
    %c0_i32 = arith.constant 0 : i32
    %c0_i32_0 = arith.constant 0 : i32
    %c0_i32_1 = arith.constant 0 : i32
    return %arg0, %c0_i32, %c0_i32_0 : i32, i32, i32
  }
}

module attributes {stable_mosaic.version = 11 : i64} {
  func.func @kernel(%arg0: memref<8x2x128xbf16, #tpu.memory_space<vmem>>, %arg1: memref<128x128xbf16, #tpu.memory_space<vmem>>, %arg2: memref<32x128xbf16, #tpu.memory_space<vmem>>, %arg3: memref<1x128xf32, #tpu.memory_space<vmem>>, %arg4: memref<32x128xbf16, #tpu.memory_space<vmem>>, %arg5: memref<32x128xbf16, #tpu.memory_space<vmem>>, %arg6: memref<1x128xf32, #tpu.memory_space<vmem>>, %arg7: memref<32x4xf32, #tpu.memory_space<vmem>>, %arg8: memref<1x4xf32, #tpu.memory_space<vmem>>, %arg9: memref<2x4xf32, #tpu.memory_space<vmem>>, %arg10: memref<8x2x32xbf16, #tpu.memory_space<vmem>>, %arg11: memref<8x2x128xbf16, #tpu.memory_space<vmem>>, %arg12: memref<2x32xf32, #tpu.memory_space<vmem>>, %arg13: memref<2x32xf32, #tpu.memory_space<vmem>>) attributes {dimension_semantics = [], scalar_prefetch = 0 : i64, scratch_operands = 4 : i64, tpu.core_type = #tpu.core_type<tc>} {
    %c0 = arith.constant 0 : index
    %c0_0 = arith.constant 0 : index
    %c0_1 = arith.constant 0 : index
    %0 = vector.load %arg0[%c0, %c0_0, %c0_1] : memref<8x2x128xbf16, #tpu.memory_space<vmem>>, vector<8x2x128xbf16>
    %1 = vector.shape_cast %0 : vector<8x2x128xbf16> to vector<16x128xbf16>
    %c0_2 = arith.constant 0 : index
    %c0_3 = arith.constant 0 : index
    %2 = vector.load %arg1[%c0_2, %c0_3] : memref<128x128xbf16, #tpu.memory_space<vmem>>, vector<128x128xbf16>
    %cst = arith.constant dense<0.000000e+00> : vector<16x128xf32>
    %3 = tpu.matmul %1, %2, %cst {dimension_numbers = #tpu.dot_dimension_numbers<[1], [0], [0], [1], [0, 0, 1, 1], [], []>} : vector<16x128xbf16>, vector<128x128xbf16>, vector<16x128xf32> -> vector<16x128xf32>
    %4 = vector.shape_cast %3 : vector<16x128xf32> to vector<8x2x128xf32>
    %5 = arith.truncf %4 : vector<8x2x128xf32> to vector<8x2x128xbf16>
    %c0_4 = arith.constant 0 : index
    %c0_5 = arith.constant 0 : index
    %c0_6 = arith.constant 0 : index
    %6 = vector.load %arg11[%c0_4, %c0_5, %c0_6] : memref<8x2x128xbf16, #tpu.memory_space<vmem>>, vector<8x2x128xbf16>
    tpu.vector_store %arg11[%c0_4, %c0_5, %c0_6], %5 {strides = array<i32>} : memref<8x2x128xbf16, #tpu.memory_space<vmem>>, vector<8x2x128xbf16>,
    %cst_7 = arith.constant 0.000000e+00 : f32
    %7 = vector.broadcast %cst_7 : f32 to vector<2x32xf32>
    %c0_8 = arith.constant 0 : index
    %c0_9 = arith.constant 0 : index
    %8 = vector.load %arg12[%c0_8, %c0_9] : memref<2x32xf32, #tpu.memory_space<vmem>>, vector<2x32xf32>
    tpu.vector_store %arg12[%c0_8, %c0_9], %7 {strides = array<i32>} : memref<2x32xf32, #tpu.memory_space<vmem>>, vector<2x32xf32>,
    %cst_10 = arith.constant 0.000000e+00 : f32
    %9 = vector.broadcast %cst_10 : f32 to vector<2x32xf32>
    %c0_11 = arith.constant 0 : index
    %c0_12 = arith.constant 0 : index
    %10 = vector.load %arg13[%c0_11, %c0_12] : memref<2x32xf32, #tpu.memory_space<vmem>>, vector<2x32xf32>
    tpu.vector_store %arg13[%c0_11, %c0_12], %9 {strides = array<i32>} : memref<2x32xf32, #tpu.memory_space<vmem>>, vector<2x32xf32>,
    %c0_i32 = arith.constant 0 : i32
    %11 = arith.index_cast %c0_i32 : i32 to index
    %c0_13 = arith.constant 0 : index
    %c0_14 = arith.constant 0 : index
    %12 = vector.load %arg11[%11, %c0_13, %c0_14] : memref<8x2x128xbf16, #tpu.memory_space<vmem>>, vector<1x2x128xbf16>
    %13 = vector.shape_cast %12 : vector<1x2x128xbf16> to vector<2x128xbf16>
    %14 = arith.extf %13 : vector<2x128xbf16> to vector<2x128xf32>
    %c0_15 = arith.constant 0 : index
    %c0_16 = arith.constant 0 : index
    %15 = vector.load %arg3[%c0_15, %c0_16] : memref<1x128xf32, #tpu.memory_space<vmem>>, vector<1x128xf32>
    %16 = vector.broadcast %15 : vector<1x128xf32> to vector<2x128xf32>
    %17 = arith.addf %14, %16 : vector<2x128xf32>
    %c0_17 = arith.constant 0 : index
    %c0_18 = arith.constant 0 : index
    %18 = vector.load %arg12[%c0_17, %c0_18] : memref<2x32xf32, #tpu.memory_space<vmem>>, vector<2x32xf32>
    %19 = arith.truncf %18 : vector<2x32xf32> to vector<2x32xbf16>
    %c0_19 = arith.constant 0 : index
    %c0_20 = arith.constant 0 : index
    %20 = vector.load %arg2[%c0_19, %c0_20] : memref<32x128xbf16, #tpu.memory_space<vmem>>, vector<32x128xbf16>
    %cst_21 = arith.constant dense<0.000000e+00> : vector<2x128xf32>
    %21 = tpu.matmul %19, %20, %cst_21 {dimension_numbers = #tpu.dot_dimension_numbers<[1], [0], [0], [1], [0, 0, 1, 1], [], []>} : vector<2x32xbf16>, vector<32x128xbf16>, vector<2x128xf32> -> vector<2x128xf32>
    %22 = arith.addf %17, %21 : vector<2x128xf32>
    %23 = arith.negf %22 : vector<2x128xf32>
    %24 = math.exp %23 : vector<2x128xf32>
    %cst_22 = arith.constant 1.000000e+00 : f32
    %25 = vector.broadcast %cst_22 : f32 to vector<2x128xf32>
    %26 = arith.addf %25, %24 : vector<2x128xf32>
    %27 = arith.divf %25, %26 : vector<2x128xf32>
    %28 = math.tanh %22 : vector<2x128xf32>
    %29 = vector.extract_strided_slice %27 {offsets = [0, 0], sizes = [2, 32], strides = [1, 1]} : vector<2x128xf32> to vector<2x32xf32>
    %30 = vector.extract_strided_slice %27 {offsets = [0, 32], sizes = [2, 32], strides = [1, 1]} : vector<2x128xf32> to vector<2x32xf32>
    %31 = vector.extract_strided_slice %27 {offsets = [0, 96], sizes = [2, 32], strides = [1, 1]} : vector<2x128xf32> to vector<2x32xf32>
    %32 = vector.extract_strided_slice %28 {offsets = [0, 64], sizes = [2, 32], strides = [1, 1]} : vector<2x128xf32> to vector<2x32xf32>
    %c0_23 = arith.constant 0 : index
    %c0_24 = arith.constant 0 : index
    %33 = vector.load %arg13[%c0_23, %c0_24] : memref<2x32xf32, #tpu.memory_space<vmem>>, vector<2x32xf32>
    %34 = arith.mulf %30, %33 : vector<2x32xf32>
    %35 = arith.mulf %29, %32 : vector<2x32xf32>
    %36 = arith.addf %34, %35 : vector<2x32xf32>
    %37 = math.tanh %36 : vector<2x32xf32>
    %38 = arith.mulf %31, %37 : vector<2x32xf32>
    %c0_25 = arith.constant 0 : index
    %c0_26 = arith.constant 0 : index
    %39 = vector.load %arg13[%c0_25, %c0_26] : memref<2x32xf32, #tpu.memory_space<vmem>>, vector<2x32xf32>
    tpu.vector_store %arg13[%c0_25, %c0_26], %36 {strides = array<i32>} : memref<2x32xf32, #tpu.memory_space<vmem>>, vector<2x32xf32>,
    %c0_27 = arith.constant 0 : index
    %c0_28 = arith.constant 0 : index
    %40 = vector.load %arg12[%c0_27, %c0_28] : memref<2x32xf32, #tpu.memory_space<vmem>>, vector<2x32xf32>
    tpu.vector_store %arg12[%c0_27, %c0_28], %38 {strides = array<i32>} : memref<2x32xf32, #tpu.memory_space<vmem>>, vector<2x32xf32>,
    %41 = arith.truncf %38 : vector<2x32xf32> to vector<2x32xbf16>
    %42 = arith.index_cast %c0_i32 : i32 to index
    %c0_29 = arith.constant 0 : index
    %c0_30 = arith.constant 0 : index
    %43 = vector.load %arg10[%42, %c0_29, %c0_30] : memref<8x2x32xbf16, #tpu.memory_space<vmem>>, vector<1x2x32xbf16>
    %44 = vector.shape_cast %43 : vector<1x2x32xbf16> to vector<2x32xbf16>
    %45 = vector.shape_cast %41 : vector<2x32xbf16> to vector<1x2x32xbf16>
    tpu.vector_store %arg10[%42, %c0_29, %c0_30], %45 {strides = array<i32>} : memref<8x2x32xbf16, #tpu.memory_space<vmem>>, vector<1x2x32xbf16>,
    %c1_i32 = arith.constant 1 : i32
    %46 = arith.index_cast %c1_i32 : i32 to index
    %c0_31 = arith.constant 0 : index
    %c0_32 = arith.constant 0 : index
    %47 = vector.load %arg11[%46, %c0_31, %c0_32] : memref<8x2x128xbf16, #tpu.memory_space<vmem>>, vector<1x2x128xbf16>
    %48 = vector.shape_cast %47 : vector<1x2x128xbf16> to vector<2x128xbf16>
    %49 = arith.extf %48 : vector<2x128xbf16> to vector<2x128xf32>
    %c0_33 = arith.constant 0 : index
    %c0_34 = arith.constant 0 : index
    %50 = vector.load %arg3[%c0_33, %c0_34] : memref<1x128xf32, #tpu.memory_space<vmem>>, vector<1x128xf32>
    %51 = vector.broadcast %50 : vector<1x128xf32> to vector<2x128xf32>
    %52 = arith.addf %49, %51 : vector<2x128xf32>
    %c0_35 = arith.constant 0 : index
    %c0_36 = arith.constant 0 : index
    %53 = vector.load %arg12[%c0_35, %c0_36] : memref<2x32xf32, #tpu.memory_space<vmem>>, vector<2x32xf32>
    %54 = arith.truncf %53 : vector<2x32xf32> to vector<2x32xbf16>
    %c0_37 = arith.constant 0 : index
    %c0_38 = arith.constant 0 : index
    %55 = vector.load %arg2[%c0_37, %c0_38] : memref<32x128xbf16, #tpu.memory_space<vmem>>, vector<32x128xbf16>
    %cst_39 = arith.constant dense<0.000000e+00> : vector<2x128xf32>
    %56 = tpu.matmul %54, %55, %cst_39 {dimension_numbers = #tpu.dot_dimension_numbers<[1], [0], [0], [1], [0, 0, 1, 1], [], []>} : vector<2x32xbf16>, vector<32x128xbf16>, vector<2x128xf32> -> vector<2x128xf32>
    %57 = arith.addf %52, %56 : vector<2x128xf32>
    %58 = arith.negf %57 : vector<2x128xf32>
    %59 = math.exp %58 : vector<2x128xf32>
    %cst_40 = arith.constant 1.000000e+00 : f32
    %60 = vector.broadcast %cst_40 : f32 to vector<2x128xf32>
    %61 = arith.addf %60, %59 : vector<2x128xf32>
    %62 = arith.divf %60, %61 : vector<2x128xf32>
    %63 = math.tanh %57 : vector<2x128xf32>
    %64 = vector.extract_strided_slice %62 {offsets = [0, 0], sizes = [2, 32], strides = [1, 1]} : vector<2x128xf32> to vector<2x32xf32>
    %65 = vector.extract_strided_slice %62 {offsets = [0, 32], sizes = [2, 32], strides = [1, 1]} : vector<2x128xf32> to vector<2x32xf32>
    %66 = vector.extract_strided_slice %62 {offsets = [0, 96], sizes = [2, 32], strides = [1, 1]} : vector<2x128xf32> to vector<2x32xf32>
    %67 = vector.extract_strided_slice %63 {offsets = [0, 64], sizes = [2, 32], strides = [1, 1]} : vector<2x128xf32> to vector<2x32xf32>
    %c0_41 = arith.constant 0 : index
    %c0_42 = arith.constant 0 : index
    %68 = vector.load %arg13[%c0_41, %c0_42] : memref<2x32xf32, #tpu.memory_space<vmem>>, vector<2x32xf32>
    %69 = arith.mulf %65, %68 : vector<2x32xf32>
    %70 = arith.mulf %64, %67 : vector<2x32xf32>
    %71 = arith.addf %69, %70 : vector<2x32xf32>
    %72 = math.tanh %71 : vector<2x32xf32>
    %73 = arith.mulf %66, %72 : vector<2x32xf32>
    %c0_43 = arith.constant 0 : index
    %c0_44 = arith.constant 0 : index
    %74 = vector.load %arg13[%c0_43, %c0_44] : memref<2x32xf32, #tpu.memory_space<vmem>>, vector<2x32xf32>
    tpu.vector_store %arg13[%c0_43, %c0_44], %71 {strides = array<i32>} : memref<2x32xf32, #tpu.memory_space<vmem>>, vector<2x32xf32>,
    %c0_45 = arith.constant 0 : index
    %c0_46 = arith.constant 0 : index
    %75 = vector.load %arg12[%c0_45, %c0_46] : memref<2x32xf32, #tpu.memory_space<vmem>>, vector<2x32xf32>
    tpu.vector_store %arg12[%c0_45, %c0_46], %73 {strides = array<i32>} : memref<2x32xf32, #tpu.memory_space<vmem>>, vector<2x32xf32>,
    %76 = arith.truncf %73 : vector<2x32xf32> to vector<2x32xbf16>
    %77 = arith.index_cast %c1_i32 : i32 to index
    %c0_47 = arith.constant 0 : index
    %c0_48 = arith.constant 0 : index
    %78 = vector.load %arg10[%77, %c0_47, %c0_48] : memref<8x2x32xbf16, #tpu.memory_space<vmem>>, vector<1x2x32xbf16>
    %79 = vector.shape_cast %78 : vector<1x2x32xbf16> to vector<2x32xbf16>
    %80 = vector.shape_cast %76 : vector<2x32xbf16> to vector<1x2x32xbf16>
    tpu.vector_store %arg10[%77, %c0_47, %c0_48], %80 {strides = array<i32>} : memref<8x2x32xbf16, #tpu.memory_space<vmem>>, vector<1x2x32xbf16>,
    %c2_i32 = arith.constant 2 : i32
    %81 = arith.index_cast %c2_i32 : i32 to index
    %c0_49 = arith.constant 0 : index
    %c0_50 = arith.constant 0 : index
    %82 = vector.load %arg11[%81, %c0_49, %c0_50] : memref<8x2x128xbf16, #tpu.memory_space<vmem>>, vector<1x2x128xbf16>
    %83 = vector.shape_cast %82 : vector<1x2x128xbf16> to vector<2x128xbf16>
    %84 = arith.extf %83 : vector<2x128xbf16> to vector<2x128xf32>
    %c0_51 = arith.constant 0 : index
    %c0_52 = arith.constant 0 : index
    %85 = vector.load %arg3[%c0_51, %c0_52] : memref<1x128xf32, #tpu.memory_space<vmem>>, vector<1x128xf32>
    %86 = vector.broadcast %85 : vector<1x128xf32> to vector<2x128xf32>
    %87 = arith.addf %84, %86 : vector<2x128xf32>
    %c0_53 = arith.constant 0 : index
    %c0_54 = arith.constant 0 : index
    %88 = vector.load %arg12[%c0_53, %c0_54] : memref<2x32xf32, #tpu.memory_space<vmem>>, vector<2x32xf32>
    %89 = arith.truncf %88 : vector<2x32xf32> to vector<2x32xbf16>
    %c0_55 = arith.constant 0 : index
    %c0_56 = arith.constant 0 : index
    %90 = vector.load %arg2[%c0_55, %c0_56] : memref<32x128xbf16, #tpu.memory_space<vmem>>, vector<32x128xbf16>
    %cst_57 = arith.constant dense<0.000000e+00> : vector<2x128xf32>
    %91 = tpu.matmul %89, %90, %cst_57 {dimension_numbers = #tpu.dot_dimension_numbers<[1], [0], [0], [1], [0, 0, 1, 1], [], []>} : vector<2x32xbf16>, vector<32x128xbf16>, vector<2x128xf32> -> vector<2x128xf32>
    %92 = arith.addf %87, %91 : vector<2x128xf32>
    %93 = arith.negf %92 : vector<2x128xf32>
    %94 = math.exp %93 : vector<2x128xf32>
    %cst_58 = arith.constant 1.000000e+00 : f32
    %95 = vector.broadcast %cst_58 : f32 to vector<2x128xf32>
    %96 = arith.addf %95, %94 : vector<2x128xf32>
    %97 = arith.divf %95, %96 : vector<2x128xf32>
    %98 = math.tanh %92 : vector<2x128xf32>
    %99 = vector.extract_strided_slice %97 {offsets = [0, 0], sizes = [2, 32], strides = [1, 1]} : vector<2x128xf32> to vector<2x32xf32>
    %100 = vector.extract_strided_slice %97 {offsets = [0, 32], sizes = [2, 32], strides = [1, 1]} : vector<2x128xf32> to vector<2x32xf32>
    %101 = vector.extract_strided_slice %97 {offsets = [0, 96], sizes = [2, 32], strides = [1, 1]} : vector<2x128xf32> to vector<2x32xf32>
    %102 = vector.extract_strided_slice %98 {offsets = [0, 64], sizes = [2, 32], strides = [1, 1]} : vector<2x128xf32> to vector<2x32xf32>
    %c0_59 = arith.constant 0 : index
    %c0_60 = arith.constant 0 : index
    %103 = vector.load %arg13[%c0_59, %c0_60] : memref<2x32xf32, #tpu.memory_space<vmem>>, vector<2x32xf32>
    %104 = arith.mulf %100, %103 : vector<2x32xf32>
    %105 = arith.mulf %99, %102 : vector<2x32xf32>
    %106 = arith.addf %104, %105 : vector<2x32xf32>
    %107 = math.tanh %106 : vector<2x32xf32>
    %108 = arith.mulf %101, %107 : vector<2x32xf32>
    %c0_61 = arith.constant 0 : index
    %c0_62 = arith.constant 0 : index
    %109 = vector.load %arg13[%c0_61, %c0_62] : memref<2x32xf32, #tpu.memory_space<vmem>>, vector<2x32xf32>
    tpu.vector_store %arg13[%c0_61, %c0_62], %106 {strides = array<i32>} : memref<2x32xf32, #tpu.memory_space<vmem>>, vector<2x32xf32>,
    %c0_63 = arith.constant 0 : index
    %c0_64 = arith.constant 0 : index
    %110 = vector.load %arg12[%c0_63, %c0_64] : memref<2x32xf32, #tpu.memory_space<vmem>>, vector<2x32xf32>
    tpu.vector_store %arg12[%c0_63, %c0_64], %108 {strides = array<i32>} : memref<2x32xf32, #tpu.memory_space<vmem>>, vector<2x32xf32>,
    %111 = arith.truncf %108 : vector<2x32xf32> to vector<2x32xbf16>
    %112 = arith.index_cast %c2_i32 : i32 to index
    %c0_65 = arith.constant 0 : index
    %c0_66 = arith.constant 0 : index
    %113 = vector.load %arg10[%112, %c0_65, %c0_66] : memref<8x2x32xbf16, #tpu.memory_space<vmem>>, vector<1x2x32xbf16>
    %114 = vector.shape_cast %113 : vector<1x2x32xbf16> to vector<2x32xbf16>
    %115 = vector.shape_cast %111 : vector<2x32xbf16> to vector<1x2x32xbf16>
    tpu.vector_store %arg10[%112, %c0_65, %c0_66], %115 {strides = array<i32>} : memref<8x2x32xbf16, #tpu.memory_space<vmem>>, vector<1x2x32xbf16>,
    %c3_i32 = arith.constant 3 : i32
    %116 = arith.index_cast %c3_i32 : i32 to index
    %c0_67 = arith.constant 0 : index
    %c0_68 = arith.constant 0 : index
    %117 = vector.load %arg11[%116, %c0_67, %c0_68] : memref<8x2x128xbf16, #tpu.memory_space<vmem>>, vector<1x2x128xbf16>
    %118 = vector.shape_cast %117 : vector<1x2x128xbf16> to vector<2x128xbf16>
    %119 = arith.extf %118 : vector<2x128xbf16> to vector<2x128xf32>
    %c0_69 = arith.constant 0 : index
    %c0_70 = arith.constant 0 : index
    %120 = vector.load %arg3[%c0_69, %c0_70] : memref<1x128xf32, #tpu.memory_space<vmem>>, vector<1x128xf32>
    %121 = vector.broadcast %120 : vector<1x128xf32> to vector<2x128xf32>
    %122 = arith.addf %119, %121 : vector<2x128xf32>
    %c0_71 = arith.constant 0 : index
    %c0_72 = arith.constant 0 : index
    %123 = vector.load %arg12[%c0_71, %c0_72] : memref<2x32xf32, #tpu.memory_space<vmem>>, vector<2x32xf32>
    %124 = arith.truncf %123 : vector<2x32xf32> to vector<2x32xbf16>
    %c0_73 = arith.constant 0 : index
    %c0_74 = arith.constant 0 : index
    %125 = vector.load %arg2[%c0_73, %c0_74] : memref<32x128xbf16, #tpu.memory_space<vmem>>, vector<32x128xbf16>
    %cst_75 = arith.constant dense<0.000000e+00> : vector<2x128xf32>
    %126 = tpu.matmul %124, %125, %cst_75 {dimension_numbers = #tpu.dot_dimension_numbers<[1], [0], [0], [1], [0, 0, 1, 1], [], []>} : vector<2x32xbf16>, vector<32x128xbf16>, vector<2x128xf32> -> vector<2x128xf32>
    %127 = arith.addf %122, %126 : vector<2x128xf32>
    %128 = arith.negf %127 : vector<2x128xf32>
    %129 = math.exp %128 : vector<2x128xf32>
    %cst_76 = arith.constant 1.000000e+00 : f32
    %130 = vector.broadcast %cst_76 : f32 to vector<2x128xf32>
    %131 = arith.addf %130, %129 : vector<2x128xf32>
    %132 = arith.divf %130, %131 : vector<2x128xf32>
    %133 = math.tanh %127 : vector<2x128xf32>
    %134 = vector.extract_strided_slice %132 {offsets = [0, 0], sizes = [2, 32], strides = [1, 1]} : vector<2x128xf32> to vector<2x32xf32>
    %135 = vector.extract_strided_slice %132 {offsets = [0, 32], sizes = [2, 32], strides = [1, 1]} : vector<2x128xf32> to vector<2x32xf32>
    %136 = vector.extract_strided_slice %132 {offsets = [0, 96], sizes = [2, 32], strides = [1, 1]} : vector<2x128xf32> to vector<2x32xf32>
    %137 = vector.extract_strided_slice %133 {offsets = [0, 64], sizes = [2, 32], strides = [1, 1]} : vector<2x128xf32> to vector<2x32xf32>
    %c0_77 = arith.constant 0 : index
    %c0_78 = arith.constant 0 : index
    %138 = vector.load %arg13[%c0_77, %c0_78] : memref<2x32xf32, #tpu.memory_space<vmem>>, vector<2x32xf32>
    %139 = arith.mulf %135, %138 : vector<2x32xf32>
    %140 = arith.mulf %134, %137 : vector<2x32xf32>
    %141 = arith.addf %139, %140 : vector<2x32xf32>
    %142 = math.tanh %141 : vector<2x32xf32>
    %143 = arith.mulf %136, %142 : vector<2x32xf32>
    %c0_79 = arith.constant 0 : index
    %c0_80 = arith.constant 0 : index
    %144 = vector.load %arg13[%c0_79, %c0_80] : memref<2x32xf32, #tpu.memory_space<vmem>>, vector<2x32xf32>
    tpu.vector_store %arg13[%c0_79, %c0_80], %141 {strides = array<i32>} : memref<2x32xf32, #tpu.memory_space<vmem>>, vector<2x32xf32>,
    %c0_81 = arith.constant 0 : index
    %c0_82 = arith.constant 0 : index
    %145 = vector.load %arg12[%c0_81, %c0_82] : memref<2x32xf32, #tpu.memory_space<vmem>>, vector<2x32xf32>
    tpu.vector_store %arg12[%c0_81, %c0_82], %143 {strides = array<i32>} : memref<2x32xf32, #tpu.memory_space<vmem>>, vector<2x32xf32>,
    %146 = arith.truncf %143 : vector<2x32xf32> to vector<2x32xbf16>
    %147 = arith.index_cast %c3_i32 : i32 to index
    %c0_83 = arith.constant 0 : index
    %c0_84 = arith.constant 0 : index
    %148 = vector.load %arg10[%147, %c0_83, %c0_84] : memref<8x2x32xbf16, #tpu.memory_space<vmem>>, vector<1x2x32xbf16>
    %149 = vector.shape_cast %148 : vector<1x2x32xbf16> to vector<2x32xbf16>
    %150 = vector.shape_cast %146 : vector<2x32xbf16> to vector<1x2x32xbf16>
    tpu.vector_store %arg10[%147, %c0_83, %c0_84], %150 {strides = array<i32>} : memref<8x2x32xbf16, #tpu.memory_space<vmem>>, vector<1x2x32xbf16>,
    %c4_i32 = arith.constant 4 : i32
    %151 = arith.index_cast %c4_i32 : i32 to index
    %c0_85 = arith.constant 0 : index
    %c0_86 = arith.constant 0 : index
    %152 = vector.load %arg11[%151, %c0_85, %c0_86] : memref<8x2x128xbf16, #tpu.memory_space<vmem>>, vector<1x2x128xbf16>
    %153 = vector.shape_cast %152 : vector<1x2x128xbf16> to vector<2x128xbf16>
    %154 = arith.extf %153 : vector<2x128xbf16> to vector<2x128xf32>
    %c0_87 = arith.constant 0 : index
    %c0_88 = arith.constant 0 : index
    %155 = vector.load %arg3[%c0_87, %c0_88] : memref<1x128xf32, #tpu.memory_space<vmem>>, vector<1x128xf32>
    %156 = vector.broadcast %155 : vector<1x128xf32> to vector<2x128xf32>
    %157 = arith.addf %154, %156 : vector<2x128xf32>
    %c0_89 = arith.constant 0 : index
    %c0_90 = arith.constant 0 : index
    %158 = vector.load %arg12[%c0_89, %c0_90] : memref<2x32xf32, #tpu.memory_space<vmem>>, vector<2x32xf32>
    %159 = arith.truncf %158 : vector<2x32xf32> to vector<2x32xbf16>
    %c0_91 = arith.constant 0 : index
    %c0_92 = arith.constant 0 : index
    %160 = vector.load %arg2[%c0_91, %c0_92] : memref<32x128xbf16, #tpu.memory_space<vmem>>, vector<32x128xbf16>
    %cst_93 = arith.constant dense<0.000000e+00> : vector<2x128xf32>
    %161 = tpu.matmul %159, %160, %cst_93 {dimension_numbers = #tpu.dot_dimension_numbers<[1], [0], [0], [1], [0, 0, 1, 1], [], []>} : vector<2x32xbf16>, vector<32x128xbf16>, vector<2x128xf32> -> vector<2x128xf32>
    %162 = arith.addf %157, %161 : vector<2x128xf32>
    %163 = arith.negf %162 : vector<2x128xf32>
    %164 = math.exp %163 : vector<2x128xf32>
    %cst_94 = arith.constant 1.000000e+00 : f32
    %165 = vector.broadcast %cst_94 : f32 to vector<2x128xf32>
    %166 = arith.addf %165, %164 : vector<2x128xf32>
    %167 = arith.divf %165, %166 : vector<2x128xf32>
    %168 = math.tanh %162 : vector<2x128xf32>
    %169 = vector.extract_strided_slice %167 {offsets = [0, 0], sizes = [2, 32], strides = [1, 1]} : vector<2x128xf32> to vector<2x32xf32>
    %170 = vector.extract_strided_slice %167 {offsets = [0, 32], sizes = [2, 32], strides = [1, 1]} : vector<2x128xf32> to vector<2x32xf32>
    %171 = vector.extract_strided_slice %167 {offsets = [0, 96], sizes = [2, 32], strides = [1, 1]} : vector<2x128xf32> to vector<2x32xf32>
    %172 = vector.extract_strided_slice %168 {offsets = [0, 64], sizes = [2, 32], strides = [1, 1]} : vector<2x128xf32> to vector<2x32xf32>
    %c0_95 = arith.constant 0 : index
    %c0_96 = arith.constant 0 : index
    %173 = vector.load %arg13[%c0_95, %c0_96] : memref<2x32xf32, #tpu.memory_space<vmem>>, vector<2x32xf32>
    %174 = arith.mulf %170, %173 : vector<2x32xf32>
    %175 = arith.mulf %169, %172 : vector<2x32xf32>
    %176 = arith.addf %174, %175 : vector<2x32xf32>
    %177 = math.tanh %176 : vector<2x32xf32>
    %178 = arith.mulf %171, %177 : vector<2x32xf32>
    %c0_97 = arith.constant 0 : index
    %c0_98 = arith.constant 0 : index
    %179 = vector.load %arg13[%c0_97, %c0_98] : memref<2x32xf32, #tpu.memory_space<vmem>>, vector<2x32xf32>
    tpu.vector_store %arg13[%c0_97, %c0_98], %176 {strides = array<i32>} : memref<2x32xf32, #tpu.memory_space<vmem>>, vector<2x32xf32>,
    %c0_99 = arith.constant 0 : index
    %c0_100 = arith.constant 0 : index
    %180 = vector.load %arg12[%c0_99, %c0_100] : memref<2x32xf32, #tpu.memory_space<vmem>>, vector<2x32xf32>
    tpu.vector_store %arg12[%c0_99, %c0_100], %178 {strides = array<i32>} : memref<2x32xf32, #tpu.memory_space<vmem>>, vector<2x32xf32>,
    %181 = arith.truncf %178 : vector<2x32xf32> to vector<2x32xbf16>
    %182 = arith.index_cast %c4_i32 : i32 to index
    %c0_101 = arith.constant 0 : index
    %c0_102 = arith.constant 0 : index
    %183 = vector.load %arg10[%182, %c0_101, %c0_102] : memref<8x2x32xbf16, #tpu.memory_space<vmem>>, vector<1x2x32xbf16>
    %184 = vector.shape_cast %183 : vector<1x2x32xbf16> to vector<2x32xbf16>
    %185 = vector.shape_cast %181 : vector<2x32xbf16> to vector<1x2x32xbf16>
    tpu.vector_store %arg10[%182, %c0_101, %c0_102], %185 {strides = array<i32>} : memref<8x2x32xbf16, #tpu.memory_space<vmem>>, vector<1x2x32xbf16>,
    %c5_i32 = arith.constant 5 : i32
    %186 = arith.index_cast %c5_i32 : i32 to index
    %c0_103 = arith.constant 0 : index
    %c0_104 = arith.constant 0 : index
    %187 = vector.load %arg11[%186, %c0_103, %c0_104] : memref<8x2x128xbf16, #tpu.memory_space<vmem>>, vector<1x2x128xbf16>
    %188 = vector.shape_cast %187 : vector<1x2x128xbf16> to vector<2x128xbf16>
    %189 = arith.extf %188 : vector<2x128xbf16> to vector<2x128xf32>
    %c0_105 = arith.constant 0 : index
    %c0_106 = arith.constant 0 : index
    %190 = vector.load %arg3[%c0_105, %c0_106] : memref<1x128xf32, #tpu.memory_space<vmem>>, vector<1x128xf32>
    %191 = vector.broadcast %190 : vector<1x128xf32> to vector<2x128xf32>
    %192 = arith.addf %189, %191 : vector<2x128xf32>
    %c0_107 = arith.constant 0 : index
    %c0_108 = arith.constant 0 : index
    %193 = vector.load %arg12[%c0_107, %c0_108] : memref<2x32xf32, #tpu.memory_space<vmem>>, vector<2x32xf32>
    %194 = arith.truncf %193 : vector<2x32xf32> to vector<2x32xbf16>
    %c0_109 = arith.constant 0 : index
    %c0_110 = arith.constant 0 : index
    %195 = vector.load %arg2[%c0_109, %c0_110] : memref<32x128xbf16, #tpu.memory_space<vmem>>, vector<32x128xbf16>
    %cst_111 = arith.constant dense<0.000000e+00> : vector<2x128xf32>
    %196 = tpu.matmul %194, %195, %cst_111 {dimension_numbers = #tpu.dot_dimension_numbers<[1], [0], [0], [1], [0, 0, 1, 1], [], []>} : vector<2x32xbf16>, vector<32x128xbf16>, vector<2x128xf32> -> vector<2x128xf32>
    %197 = arith.addf %192, %196 : vector<2x128xf32>
    %198 = arith.negf %197 : vector<2x128xf32>
    %199 = math.exp %198 : vector<2x128xf32>
    %cst_112 = arith.constant 1.000000e+00 : f32
    %200 = vector.broadcast %cst_112 : f32 to vector<2x128xf32>
    %201 = arith.addf %200, %199 : vector<2x128xf32>
    %202 = arith.divf %200, %201 : vector<2x128xf32>
    %203 = math.tanh %197 : vector<2x128xf32>
    %204 = vector.extract_strided_slice %202 {offsets = [0, 0], sizes = [2, 32], strides = [1, 1]} : vector<2x128xf32> to vector<2x32xf32>
    %205 = vector.extract_strided_slice %202 {offsets = [0, 32], sizes = [2, 32], strides = [1, 1]} : vector<2x128xf32> to vector<2x32xf32>
    %206 = vector.extract_strided_slice %202 {offsets = [0, 96], sizes = [2, 32], strides = [1, 1]} : vector<2x128xf32> to vector<2x32xf32>
    %207 = vector.extract_strided_slice %203 {offsets = [0, 64], sizes = [2, 32], strides = [1, 1]} : vector<2x128xf32> to vector<2x32xf32>
    %c0_113 = arith.constant 0 : index
    %c0_114 = arith.constant 0 : index
    %208 = vector.load %arg13[%c0_113, %c0_114] : memref<2x32xf32, #tpu.memory_space<vmem>>, vector<2x32xf32>
    %209 = arith.mulf %205, %208 : vector<2x32xf32>
    %210 = arith.mulf %204, %207 : vector<2x32xf32>
    %211 = arith.addf %209, %210 : vector<2x32xf32>
    %212 = math.tanh %211 : vector<2x32xf32>
    %213 = arith.mulf %206, %212 : vector<2x32xf32>
    %c0_115 = arith.constant 0 : index
    %c0_116 = arith.constant 0 : index
    %214 = vector.load %arg13[%c0_115, %c0_116] : memref<2x32xf32, #tpu.memory_space<vmem>>, vector<2x32xf32>
    tpu.vector_store %arg13[%c0_115, %c0_116], %211 {strides = array<i32>} : memref<2x32xf32, #tpu.memory_space<vmem>>, vector<2x32xf32>,
    %c0_117 = arith.constant 0 : index
    %c0_118 = arith.constant 0 : index
    %215 = vector.load %arg12[%c0_117, %c0_118] : memref<2x32xf32, #tpu.memory_space<vmem>>, vector<2x32xf32>
    tpu.vector_store %arg12[%c0_117, %c0_118], %213 {strides = array<i32>} : memref<2x32xf32, #tpu.memory_space<vmem>>, vector<2x32xf32>,
    %216 = arith.truncf %213 : vector<2x32xf32> to vector<2x32xbf16>
    %217 = arith.index_cast %c5_i32 : i32 to index
    %c0_119 = arith.constant 0 : index
    %c0_120 = arith.constant 0 : index
    %218 = vector.load %arg10[%217, %c0_119, %c0_120] : memref<8x2x32xbf16, #tpu.memory_space<vmem>>, vector<1x2x32xbf16>
    %219 = vector.shape_cast %218 : vector<1x2x32xbf16> to vector<2x32xbf16>
    %220 = vector.shape_cast %216 : vector<2x32xbf16> to vector<1x2x32xbf16>
    tpu.vector_store %arg10[%217, %c0_119, %c0_120], %220 {strides = array<i32>} : memref<8x2x32xbf16, #tpu.memory_space<vmem>>, vector<1x2x32xbf16>,
    %c6_i32 = arith.constant 6 : i32
    %221 = arith.index_cast %c6_i32 : i32 to index
    %c0_121 = arith.constant 0 : index
    %c0_122 = arith.constant 0 : index
    %222 = vector.load %arg11[%221, %c0_121, %c0_122] : memref<8x2x128xbf16, #tpu.memory_space<vmem>>, vector<1x2x128xbf16>
    %223 = vector.shape_cast %222 : vector<1x2x128xbf16> to vector<2x128xbf16>
    %224 = arith.extf %223 : vector<2x128xbf16> to vector<2x128xf32>
    %c0_123 = arith.constant 0 : index
    %c0_124 = arith.constant 0 : index
    %225 = vector.load %arg3[%c0_123, %c0_124] : memref<1x128xf32, #tpu.memory_space<vmem>>, vector<1x128xf32>
    %226 = vector.broadcast %225 : vector<1x128xf32> to vector<2x128xf32>
    %227 = arith.addf %224, %226 : vector<2x128xf32>
    %c0_125 = arith.constant 0 : index
    %c0_126 = arith.constant 0 : index
    %228 = vector.load %arg12[%c0_125, %c0_126] : memref<2x32xf32, #tpu.memory_space<vmem>>, vector<2x32xf32>
    %229 = arith.truncf %228 : vector<2x32xf32> to vector<2x32xbf16>
    %c0_127 = arith.constant 0 : index
    %c0_128 = arith.constant 0 : index
    %230 = vector.load %arg2[%c0_127, %c0_128] : memref<32x128xbf16, #tpu.memory_space<vmem>>, vector<32x128xbf16>
    %cst_129 = arith.constant dense<0.000000e+00> : vector<2x128xf32>
    %231 = tpu.matmul %229, %230, %cst_129 {dimension_numbers = #tpu.dot_dimension_numbers<[1], [0], [0], [1], [0, 0, 1, 1], [], []>} : vector<2x32xbf16>, vector<32x128xbf16>, vector<2x128xf32> -> vector<2x128xf32>
    %232 = arith.addf %227, %231 : vector<2x128xf32>
    %233 = arith.negf %232 : vector<2x128xf32>
    %234 = math.exp %233 : vector<2x128xf32>
    %cst_130 = arith.constant 1.000000e+00 : f32
    %235 = vector.broadcast %cst_130 : f32 to vector<2x128xf32>
    %236 = arith.addf %235, %234 : vector<2x128xf32>
    %237 = arith.divf %235, %236 : vector<2x128xf32>
    %238 = math.tanh %232 : vector<2x128xf32>
    %239 = vector.extract_strided_slice %237 {offsets = [0, 0], sizes = [2, 32], strides = [1, 1]} : vector<2x128xf32> to vector<2x32xf32>
    %240 = vector.extract_strided_slice %237 {offsets = [0, 32], sizes = [2, 32], strides = [1, 1]} : vector<2x128xf32> to vector<2x32xf32>
    %241 = vector.extract_strided_slice %237 {offsets = [0, 96], sizes = [2, 32], strides = [1, 1]} : vector<2x128xf32> to vector<2x32xf32>
    %242 = vector.extract_strided_slice %238 {offsets = [0, 64], sizes = [2, 32], strides = [1, 1]} : vector<2x128xf32> to vector<2x32xf32>
    %c0_131 = arith.constant 0 : index
    %c0_132 = arith.constant 0 : index
    %243 = vector.load %arg13[%c0_131, %c0_132] : memref<2x32xf32, #tpu.memory_space<vmem>>, vector<2x32xf32>
    %244 = arith.mulf %240, %243 : vector<2x32xf32>
    %245 = arith.mulf %239, %242 : vector<2x32xf32>
    %246 = arith.addf %244, %245 : vector<2x32xf32>
    %247 = math.tanh %246 : vector<2x32xf32>
    %248 = arith.mulf %241, %247 : vector<2x32xf32>
    %c0_133 = arith.constant 0 : index
    %c0_134 = arith.constant 0 : index
    %249 = vector.load %arg13[%c0_133, %c0_134] : memref<2x32xf32, #tpu.memory_space<vmem>>, vector<2x32xf32>
    tpu.vector_store %arg13[%c0_133, %c0_134], %246 {strides = array<i32>} : memref<2x32xf32, #tpu.memory_space<vmem>>, vector<2x32xf32>,
    %c0_135 = arith.constant 0 : index
    %c0_136 = arith.constant 0 : index
    %250 = vector.load %arg12[%c0_135, %c0_136] : memref<2x32xf32, #tpu.memory_space<vmem>>, vector<2x32xf32>
    tpu.vector_store %arg12[%c0_135, %c0_136], %248 {strides = array<i32>} : memref<2x32xf32, #tpu.memory_space<vmem>>, vector<2x32xf32>,
    %251 = arith.truncf %248 : vector<2x32xf32> to vector<2x32xbf16>
    %252 = arith.index_cast %c6_i32 : i32 to index
    %c0_137 = arith.constant 0 : index
    %c0_138 = arith.constant 0 : index
    %253 = vector.load %arg10[%252, %c0_137, %c0_138] : memref<8x2x32xbf16, #tpu.memory_space<vmem>>, vector<1x2x32xbf16>
    %254 = vector.shape_cast %253 : vector<1x2x32xbf16> to vector<2x32xbf16>
    %255 = vector.shape_cast %251 : vector<2x32xbf16> to vector<1x2x32xbf16>
    tpu.vector_store %arg10[%252, %c0_137, %c0_138], %255 {strides = array<i32>} : memref<8x2x32xbf16, #tpu.memory_space<vmem>>, vector<1x2x32xbf16>,
    %c7_i32 = arith.constant 7 : i32
    %256 = arith.index_cast %c7_i32 : i32 to index
    %c0_139 = arith.constant 0 : index
    %c0_140 = arith.constant 0 : index
    %257 = vector.load %arg11[%256, %c0_139, %c0_140] : memref<8x2x128xbf16, #tpu.memory_space<vmem>>, vector<1x2x128xbf16>
    %258 = vector.shape_cast %257 : vector<1x2x128xbf16> to vector<2x128xbf16>
    %259 = arith.extf %258 : vector<2x128xbf16> to vector<2x128xf32>
    %c0_141 = arith.constant 0 : index
    %c0_142 = arith.constant 0 : index
    %260 = vector.load %arg3[%c0_141, %c0_142] : memref<1x128xf32, #tpu.memory_space<vmem>>, vector<1x128xf32>
    %261 = vector.broadcast %260 : vector<1x128xf32> to vector<2x128xf32>
    %262 = arith.addf %259, %261 : vector<2x128xf32>
    %c0_143 = arith.constant 0 : index
    %c0_144 = arith.constant 0 : index
    %263 = vector.load %arg12[%c0_143, %c0_144] : memref<2x32xf32, #tpu.memory_space<vmem>>, vector<2x32xf32>
    %264 = arith.truncf %263 : vector<2x32xf32> to vector<2x32xbf16>
    %c0_145 = arith.constant 0 : index
    %c0_146 = arith.constant 0 : index
    %265 = vector.load %arg2[%c0_145, %c0_146] : memref<32x128xbf16, #tpu.memory_space<vmem>>, vector<32x128xbf16>
    %cst_147 = arith.constant dense<0.000000e+00> : vector<2x128xf32>
    %266 = tpu.matmul %264, %265, %cst_147 {dimension_numbers = #tpu.dot_dimension_numbers<[1], [0], [0], [1], [0, 0, 1, 1], [], []>} : vector<2x32xbf16>, vector<32x128xbf16>, vector<2x128xf32> -> vector<2x128xf32>
    %267 = arith.addf %262, %266 : vector<2x128xf32>
    %268 = arith.negf %267 : vector<2x128xf32>
    %269 = math.exp %268 : vector<2x128xf32>
    %cst_148 = arith.constant 1.000000e+00 : f32
    %270 = vector.broadcast %cst_148 : f32 to vector<2x128xf32>
    %271 = arith.addf %270, %269 : vector<2x128xf32>
    %272 = arith.divf %270, %271 : vector<2x128xf32>
    %273 = math.tanh %267 : vector<2x128xf32>
    %274 = vector.extract_strided_slice %272 {offsets = [0, 0], sizes = [2, 32], strides = [1, 1]} : vector<2x128xf32> to vector<2x32xf32>
    %275 = vector.extract_strided_slice %272 {offsets = [0, 32], sizes = [2, 32], strides = [1, 1]} : vector<2x128xf32> to vector<2x32xf32>
    %276 = vector.extract_strided_slice %272 {offsets = [0, 96], sizes = [2, 32], strides = [1, 1]} : vector<2x128xf32> to vector<2x32xf32>
    %277 = vector.extract_strided_slice %273 {offsets = [0, 64], sizes = [2, 32], strides = [1, 1]} : vector<2x128xf32> to vector<2x32xf32>
    %c0_149 = arith.constant 0 : index
    %c0_150 = arith.constant 0 : index
    %278 = vector.load %arg13[%c0_149, %c0_150] : memref<2x32xf32, #tpu.memory_space<vmem>>, vector<2x32xf32>
    %279 = arith.mulf %275, %278 : vector<2x32xf32>
    %280 = arith.mulf %274, %277 : vector<2x32xf32>
    %281 = arith.addf %279, %280 : vector<2x32xf32>
    %282 = math.tanh %281 : vector<2x32xf32>
    %283 = arith.mulf %276, %282 : vector<2x32xf32>
    %c0_151 = arith.constant 0 : index
    %c0_152 = arith.constant 0 : index
    %284 = vector.load %arg13[%c0_151, %c0_152] : memref<2x32xf32, #tpu.memory_space<vmem>>, vector<2x32xf32>
    tpu.vector_store %arg13[%c0_151, %c0_152], %281 {strides = array<i32>} : memref<2x32xf32, #tpu.memory_space<vmem>>, vector<2x32xf32>,
    %c0_153 = arith.constant 0 : index
    %c0_154 = arith.constant 0 : index
    %285 = vector.load %arg12[%c0_153, %c0_154] : memref<2x32xf32, #tpu.memory_space<vmem>>, vector<2x32xf32>
    tpu.vector_store %arg12[%c0_153, %c0_154], %283 {strides = array<i32>} : memref<2x32xf32, #tpu.memory_space<vmem>>, vector<2x32xf32>,
    %286 = arith.truncf %283 : vector<2x32xf32> to vector<2x32xbf16>
    %287 = arith.index_cast %c7_i32 : i32 to index
    %c0_155 = arith.constant 0 : index
    %c0_156 = arith.constant 0 : index
    %288 = vector.load %arg10[%287, %c0_155, %c0_156] : memref<8x2x32xbf16, #tpu.memory_space<vmem>>, vector<1x2x32xbf16>
    %289 = vector.shape_cast %288 : vector<1x2x32xbf16> to vector<2x32xbf16>
    %290 = vector.shape_cast %286 : vector<2x32xbf16> to vector<1x2x32xbf16>
    tpu.vector_store %arg10[%287, %c0_155, %c0_156], %290 {strides = array<i32>} : memref<8x2x32xbf16, #tpu.memory_space<vmem>>, vector<1x2x32xbf16>,
    %c8_i32 = arith.constant 8 : i32
    %c0_157 = arith.constant 0 : index
    %c0_158 = arith.constant 0 : index
    %c0_159 = arith.constant 0 : index
    %291 = vector.load %arg10[%c0_157, %c0_158, %c0_159] : memref<8x2x32xbf16, #tpu.memory_space<vmem>>, vector<8x2x32xbf16>
    %292 = vector.shape_cast %291 : vector<8x2x32xbf16> to vector<16x32xbf16>
    %c0_160 = arith.constant 0 : index
    %c0_161 = arith.constant 0 : index
    %293 = vector.load %arg4[%c0_160, %c0_161] : memref<32x128xbf16, #tpu.memory_space<vmem>>, vector<32x128xbf16>
    %cst_162 = arith.constant dense<0.000000e+00> : vector<16x128xf32>
    %294 = tpu.matmul %292, %293, %cst_162 {dimension_numbers = #tpu.dot_dimension_numbers<[1], [0], [0], [1], [0, 0, 1, 1], [], []>} : vector<16x32xbf16>, vector<32x128xbf16>, vector<16x128xf32> -> vector<16x128xf32>
    %295 = vector.shape_cast %294 : vector<16x128xf32> to vector<8x2x128xf32>
    %296 = arith.truncf %295 : vector<8x2x128xf32> to vector<8x2x128xbf16>
    %c0_163 = arith.constant 0 : index
    %c0_164 = arith.constant 0 : index
    %c0_165 = arith.constant 0 : index
    %297 = vector.load %arg11[%c0_163, %c0_164, %c0_165] : memref<8x2x128xbf16, #tpu.memory_space<vmem>>, vector<8x2x128xbf16>
    tpu.vector_store %arg11[%c0_163, %c0_164, %c0_165], %296 {strides = array<i32>} : memref<8x2x128xbf16, #tpu.memory_space<vmem>>, vector<8x2x128xbf16>,
    %cst_166 = arith.constant 0.000000e+00 : f32
    %298 = vector.broadcast %cst_166 : f32 to vector<2x32xf32>
    %c0_167 = arith.constant 0 : index
    %c0_168 = arith.constant 0 : index
    %299 = vector.load %arg12[%c0_167, %c0_168] : memref<2x32xf32, #tpu.memory_space<vmem>>, vector<2x32xf32>
    tpu.vector_store %arg12[%c0_167, %c0_168], %298 {strides = array<i32>} : memref<2x32xf32, #tpu.memory_space<vmem>>, vector<2x32xf32>,
    %cst_169 = arith.constant 0.000000e+00 : f32
    %300 = vector.broadcast %cst_169 : f32 to vector<2x32xf32>
    %c0_170 = arith.constant 0 : index
    %c0_171 = arith.constant 0 : index
    %301 = vector.load %arg13[%c0_170, %c0_171] : memref<2x32xf32, #tpu.memory_space<vmem>>, vector<2x32xf32>
    tpu.vector_store %arg13[%c0_170, %c0_171], %300 {strides = array<i32>} : memref<2x32xf32, #tpu.memory_space<vmem>>, vector<2x32xf32>,
    %c0_i32_172 = arith.constant 0 : i32
    %302 = arith.index_cast %c0_i32_172 : i32 to index
    %c0_173 = arith.constant 0 : index
    %c0_174 = arith.constant 0 : index
    %303 = vector.load %arg11[%302, %c0_173, %c0_174] : memref<8x2x128xbf16, #tpu.memory_space<vmem>>, vector<1x2x128xbf16>
    %304 = vector.shape_cast %303 : vector<1x2x128xbf16> to vector<2x128xbf16>
    %305 = arith.extf %304 : vector<2x128xbf16> to vector<2x128xf32>
    %c0_175 = arith.constant 0 : index
    %c0_176 = arith.constant 0 : index
    %306 = vector.load %arg6[%c0_175, %c0_176] : memref<1x128xf32, #tpu.memory_space<vmem>>, vector<1x128xf32>
    %307 = vector.broadcast %306 : vector<1x128xf32> to vector<2x128xf32>
    %308 = arith.addf %305, %307 : vector<2x128xf32>
    %c0_177 = arith.constant 0 : index
    %c0_178 = arith.constant 0 : index
    %309 = vector.load %arg12[%c0_177, %c0_178] : memref<2x32xf32, #tpu.memory_space<vmem>>, vector<2x32xf32>
    %310 = arith.truncf %309 : vector<2x32xf32> to vector<2x32xbf16>
    %c0_179 = arith.constant 0 : index
    %c0_180 = arith.constant 0 : index
    %311 = vector.load %arg5[%c0_179, %c0_180] : memref<32x128xbf16, #tpu.memory_space<vmem>>, vector<32x128xbf16>
    %cst_181 = arith.constant dense<0.000000e+00> : vector<2x128xf32>
    %312 = tpu.matmul %310, %311, %cst_181 {dimension_numbers = #tpu.dot_dimension_numbers<[1], [0], [0], [1], [0, 0, 1, 1], [], []>} : vector<2x32xbf16>, vector<32x128xbf16>, vector<2x128xf32> -> vector<2x128xf32>
    %313 = arith.addf %308, %312 : vector<2x128xf32>
    %314 = arith.negf %313 : vector<2x128xf32>
    %315 = math.exp %314 : vector<2x128xf32>
    %cst_182 = arith.constant 1.000000e+00 : f32
    %316 = vector.broadcast %cst_182 : f32 to vector<2x128xf32>
    %317 = arith.addf %316, %315 : vector<2x128xf32>
    %318 = arith.divf %316, %317 : vector<2x128xf32>
    %319 = math.tanh %313 : vector<2x128xf32>
    %320 = vector.extract_strided_slice %318 {offsets = [0, 0], sizes = [2, 32], strides = [1, 1]} : vector<2x128xf32> to vector<2x32xf32>
    %321 = vector.extract_strided_slice %318 {offsets = [0, 32], sizes = [2, 32], strides = [1, 1]} : vector<2x128xf32> to vector<2x32xf32>
    %322 = vector.extract_strided_slice %318 {offsets = [0, 96], sizes = [2, 32], strides = [1, 1]} : vector<2x128xf32> to vector<2x32xf32>
    %323 = vector.extract_strided_slice %319 {offsets = [0, 64], sizes = [2, 32], strides = [1, 1]} : vector<2x128xf32> to vector<2x32xf32>
    %c0_183 = arith.constant 0 : index
    %c0_184 = arith.constant 0 : index
    %324 = vector.load %arg13[%c0_183, %c0_184] : memref<2x32xf32, #tpu.memory_space<vmem>>, vector<2x32xf32>
    %325 = arith.mulf %321, %324 : vector<2x32xf32>
    %326 = arith.mulf %320, %323 : vector<2x32xf32>
    %327 = arith.addf %325, %326 : vector<2x32xf32>
    %328 = math.tanh %327 : vector<2x32xf32>
    %329 = arith.mulf %322, %328 : vector<2x32xf32>
    %c0_185 = arith.constant 0 : index
    %c0_186 = arith.constant 0 : index
    %330 = vector.load %arg13[%c0_185, %c0_186] : memref<2x32xf32, #tpu.memory_space<vmem>>, vector<2x32xf32>
    tpu.vector_store %arg13[%c0_185, %c0_186], %327 {strides = array<i32>} : memref<2x32xf32, #tpu.memory_space<vmem>>, vector<2x32xf32>,
    %c0_187 = arith.constant 0 : index
    %c0_188 = arith.constant 0 : index
    %331 = vector.load %arg12[%c0_187, %c0_188] : memref<2x32xf32, #tpu.memory_space<vmem>>, vector<2x32xf32>
    tpu.vector_store %arg12[%c0_187, %c0_188], %329 {strides = array<i32>} : memref<2x32xf32, #tpu.memory_space<vmem>>, vector<2x32xf32>,
    %c1_i32_189 = arith.constant 1 : i32
    %332 = arith.index_cast %c1_i32_189 : i32 to index
    %c0_190 = arith.constant 0 : index
    %c0_191 = arith.constant 0 : index
    %333 = vector.load %arg11[%332, %c0_190, %c0_191] : memref<8x2x128xbf16, #tpu.memory_space<vmem>>, vector<1x2x128xbf16>
    %334 = vector.shape_cast %333 : vector<1x2x128xbf16> to vector<2x128xbf16>
    %335 = arith.extf %334 : vector<2x128xbf16> to vector<2x128xf32>
    %c0_192 = arith.constant 0 : index
    %c0_193 = arith.constant 0 : index
    %336 = vector.load %arg6[%c0_192, %c0_193] : memref<1x128xf32, #tpu.memory_space<vmem>>, vector<1x128xf32>
    %337 = vector.broadcast %336 : vector<1x128xf32> to vector<2x128xf32>
    %338 = arith.addf %335, %337 : vector<2x128xf32>
    %c0_194 = arith.constant 0 : index
    %c0_195 = arith.constant 0 : index
    %339 = vector.load %arg12[%c0_194, %c0_195] : memref<2x32xf32, #tpu.memory_space<vmem>>, vector<2x32xf32>
    %340 = arith.truncf %339 : vector<2x32xf32> to vector<2x32xbf16>
    %c0_196 = arith.constant 0 : index
    %c0_197 = arith.constant 0 : index
    %341 = vector.load %arg5[%c0_196, %c0_197] : memref<32x128xbf16, #tpu.memory_space<vmem>>, vector<32x128xbf16>
    %cst_198 = arith.constant dense<0.000000e+00> : vector<2x128xf32>
    %342 = tpu.matmul %340, %341, %cst_198 {dimension_numbers = #tpu.dot_dimension_numbers<[1], [0], [0], [1], [0, 0, 1, 1], [], []>} : vector<2x32xbf16>, vector<32x128xbf16>, vector<2x128xf32> -> vector<2x128xf32>
    %343 = arith.addf %338, %342 : vector<2x128xf32>
    %344 = arith.negf %343 : vector<2x128xf32>
    %345 = math.exp %344 : vector<2x128xf32>
    %cst_199 = arith.constant 1.000000e+00 : f32
    %346 = vector.broadcast %cst_199 : f32 to vector<2x128xf32>
    %347 = arith.addf %346, %345 : vector<2x128xf32>
    %348 = arith.divf %346, %347 : vector<2x128xf32>
    %349 = math.tanh %343 : vector<2x128xf32>
    %350 = vector.extract_strided_slice %348 {offsets = [0, 0], sizes = [2, 32], strides = [1, 1]} : vector<2x128xf32> to vector<2x32xf32>
    %351 = vector.extract_strided_slice %348 {offsets = [0, 32], sizes = [2, 32], strides = [1, 1]} : vector<2x128xf32> to vector<2x32xf32>
    %352 = vector.extract_strided_slice %348 {offsets = [0, 96], sizes = [2, 32], strides = [1, 1]} : vector<2x128xf32> to vector<2x32xf32>
    %353 = vector.extract_strided_slice %349 {offsets = [0, 64], sizes = [2, 32], strides = [1, 1]} : vector<2x128xf32> to vector<2x32xf32>
    %c0_200 = arith.constant 0 : index
    %c0_201 = arith.constant 0 : index
    %354 = vector.load %arg13[%c0_200, %c0_201] : memref<2x32xf32, #tpu.memory_space<vmem>>, vector<2x32xf32>
    %355 = arith.mulf %351, %354 : vector<2x32xf32>
    %356 = arith.mulf %350, %353 : vector<2x32xf32>
    %357 = arith.addf %355, %356 : vector<2x32xf32>
    %358 = math.tanh %357 : vector<2x32xf32>
    %359 = arith.mulf %352, %358 : vector<2x32xf32>
    %c0_202 = arith.constant 0 : index
    %c0_203 = arith.constant 0 : index
    %360 = vector.load %arg13[%c0_202, %c0_203] : memref<2x32xf32, #tpu.memory_space<vmem>>, vector<2x32xf32>
    tpu.vector_store %arg13[%c0_202, %c0_203], %357 {strides = array<i32>} : memref<2x32xf32, #tpu.memory_space<vmem>>, vector<2x32xf32>,
    %c0_204 = arith.constant 0 : index
    %c0_205 = arith.constant 0 : index
    %361 = vector.load %arg12[%c0_204, %c0_205] : memref<2x32xf32, #tpu.memory_space<vmem>>, vector<2x32xf32>
    tpu.vector_store %arg12[%c0_204, %c0_205], %359 {strides = array<i32>} : memref<2x32xf32, #tpu.memory_space<vmem>>, vector<2x32xf32>,
    %c2_i32_206 = arith.constant 2 : i32
    %362 = arith.index_cast %c2_i32_206 : i32 to index
    %c0_207 = arith.constant 0 : index
    %c0_208 = arith.constant 0 : index
    %363 = vector.load %arg11[%362, %c0_207, %c0_208] : memref<8x2x128xbf16, #tpu.memory_space<vmem>>, vector<1x2x128xbf16>
    %364 = vector.shape_cast %363 : vector<1x2x128xbf16> to vector<2x128xbf16>
    %365 = arith.extf %364 : vector<2x128xbf16> to vector<2x128xf32>
    %c0_209 = arith.constant 0 : index
    %c0_210 = arith.constant 0 : index
    %366 = vector.load %arg6[%c0_209, %c0_210] : memref<1x128xf32, #tpu.memory_space<vmem>>, vector<1x128xf32>
    %367 = vector.broadcast %366 : vector<1x128xf32> to vector<2x128xf32>
    %368 = arith.addf %365, %367 : vector<2x128xf32>
    %c0_211 = arith.constant 0 : index
    %c0_212 = arith.constant 0 : index
    %369 = vector.load %arg12[%c0_211, %c0_212] : memref<2x32xf32, #tpu.memory_space<vmem>>, vector<2x32xf32>
    %370 = arith.truncf %369 : vector<2x32xf32> to vector<2x32xbf16>
    %c0_213 = arith.constant 0 : index
    %c0_214 = arith.constant 0 : index
    %371 = vector.load %arg5[%c0_213, %c0_214] : memref<32x128xbf16, #tpu.memory_space<vmem>>, vector<32x128xbf16>
    %cst_215 = arith.constant dense<0.000000e+00> : vector<2x128xf32>
    %372 = tpu.matmul %370, %371, %cst_215 {dimension_numbers = #tpu.dot_dimension_numbers<[1], [0], [0], [1], [0, 0, 1, 1], [], []>} : vector<2x32xbf16>, vector<32x128xbf16>, vector<2x128xf32> -> vector<2x128xf32>
    %373 = arith.addf %368, %372 : vector<2x128xf32>
    %374 = arith.negf %373 : vector<2x128xf32>
    %375 = math.exp %374 : vector<2x128xf32>
    %cst_216 = arith.constant 1.000000e+00 : f32
    %376 = vector.broadcast %cst_216 : f32 to vector<2x128xf32>
    %377 = arith.addf %376, %375 : vector<2x128xf32>
    %378 = arith.divf %376, %377 : vector<2x128xf32>
    %379 = math.tanh %373 : vector<2x128xf32>
    %380 = vector.extract_strided_slice %378 {offsets = [0, 0], sizes = [2, 32], strides = [1, 1]} : vector<2x128xf32> to vector<2x32xf32>
    %381 = vector.extract_strided_slice %378 {offsets = [0, 32], sizes = [2, 32], strides = [1, 1]} : vector<2x128xf32> to vector<2x32xf32>
    %382 = vector.extract_strided_slice %378 {offsets = [0, 96], sizes = [2, 32], strides = [1, 1]} : vector<2x128xf32> to vector<2x32xf32>
    %383 = vector.extract_strided_slice %379 {offsets = [0, 64], sizes = [2, 32], strides = [1, 1]} : vector<2x128xf32> to vector<2x32xf32>
    %c0_217 = arith.constant 0 : index
    %c0_218 = arith.constant 0 : index
    %384 = vector.load %arg13[%c0_217, %c0_218] : memref<2x32xf32, #tpu.memory_space<vmem>>, vector<2x32xf32>
    %385 = arith.mulf %381, %384 : vector<2x32xf32>
    %386 = arith.mulf %380, %383 : vector<2x32xf32>
    %387 = arith.addf %385, %386 : vector<2x32xf32>
    %388 = math.tanh %387 : vector<2x32xf32>
    %389 = arith.mulf %382, %388 : vector<2x32xf32>
    %c0_219 = arith.constant 0 : index
    %c0_220 = arith.constant 0 : index
    %390 = vector.load %arg13[%c0_219, %c0_220] : memref<2x32xf32, #tpu.memory_space<vmem>>, vector<2x32xf32>
    tpu.vector_store %arg13[%c0_219, %c0_220], %387 {strides = array<i32>} : memref<2x32xf32, #tpu.memory_space<vmem>>, vector<2x32xf32>,
    %c0_221 = arith.constant 0 : index
    %c0_222 = arith.constant 0 : index
    %391 = vector.load %arg12[%c0_221, %c0_222] : memref<2x32xf32, #tpu.memory_space<vmem>>, vector<2x32xf32>
    tpu.vector_store %arg12[%c0_221, %c0_222], %389 {strides = array<i32>} : memref<2x32xf32, #tpu.memory_space<vmem>>, vector<2x32xf32>,
    %c3_i32_223 = arith.constant 3 : i32
    %392 = arith.index_cast %c3_i32_223 : i32 to index
    %c0_224 = arith.constant 0 : index
    %c0_225 = arith.constant 0 : index
    %393 = vector.load %arg11[%392, %c0_224, %c0_225] : memref<8x2x128xbf16, #tpu.memory_space<vmem>>, vector<1x2x128xbf16>
    %394 = vector.shape_cast %393 : vector<1x2x128xbf16> to vector<2x128xbf16>
    %395 = arith.extf %394 : vector<2x128xbf16> to vector<2x128xf32>
    %c0_226 = arith.constant 0 : index
    %c0_227 = arith.constant 0 : index
    %396 = vector.load %arg6[%c0_226, %c0_227] : memref<1x128xf32, #tpu.memory_space<vmem>>, vector<1x128xf32>
    %397 = vector.broadcast %396 : vector<1x128xf32> to vector<2x128xf32>
    %398 = arith.addf %395, %397 : vector<2x128xf32>
    %c0_228 = arith.constant 0 : index
    %c0_229 = arith.constant 0 : index
    %399 = vector.load %arg12[%c0_228, %c0_229] : memref<2x32xf32, #tpu.memory_space<vmem>>, vector<2x32xf32>
    %400 = arith.truncf %399 : vector<2x32xf32> to vector<2x32xbf16>
    %c0_230 = arith.constant 0 : index
    %c0_231 = arith.constant 0 : index
    %401 = vector.load %arg5[%c0_230, %c0_231] : memref<32x128xbf16, #tpu.memory_space<vmem>>, vector<32x128xbf16>
    %cst_232 = arith.constant dense<0.000000e+00> : vector<2x128xf32>
    %402 = tpu.matmul %400, %401, %cst_232 {dimension_numbers = #tpu.dot_dimension_numbers<[1], [0], [0], [1], [0, 0, 1, 1], [], []>} : vector<2x32xbf16>, vector<32x128xbf16>, vector<2x128xf32> -> vector<2x128xf32>
    %403 = arith.addf %398, %402 : vector<2x128xf32>
    %404 = arith.negf %403 : vector<2x128xf32>
    %405 = math.exp %404 : vector<2x128xf32>
    %cst_233 = arith.constant 1.000000e+00 : f32
    %406 = vector.broadcast %cst_233 : f32 to vector<2x128xf32>
    %407 = arith.addf %406, %405 : vector<2x128xf32>
    %408 = arith.divf %406, %407 : vector<2x128xf32>
    %409 = math.tanh %403 : vector<2x128xf32>
    %410 = vector.extract_strided_slice %408 {offsets = [0, 0], sizes = [2, 32], strides = [1, 1]} : vector<2x128xf32> to vector<2x32xf32>
    %411 = vector.extract_strided_slice %408 {offsets = [0, 32], sizes = [2, 32], strides = [1, 1]} : vector<2x128xf32> to vector<2x32xf32>
    %412 = vector.extract_strided_slice %408 {offsets = [0, 96], sizes = [2, 32], strides = [1, 1]} : vector<2x128xf32> to vector<2x32xf32>
    %413 = vector.extract_strided_slice %409 {offsets = [0, 64], sizes = [2, 32], strides = [1, 1]} : vector<2x128xf32> to vector<2x32xf32>
    %c0_234 = arith.constant 0 : index
    %c0_235 = arith.constant 0 : index
    %414 = vector.load %arg13[%c0_234, %c0_235] : memref<2x32xf32, #tpu.memory_space<vmem>>, vector<2x32xf32>
    %415 = arith.mulf %411, %414 : vector<2x32xf32>
    %416 = arith.mulf %410, %413 : vector<2x32xf32>
    %417 = arith.addf %415, %416 : vector<2x32xf32>
    %418 = math.tanh %417 : vector<2x32xf32>
    %419 = arith.mulf %412, %418 : vector<2x32xf32>
    %c0_236 = arith.constant 0 : index
    %c0_237 = arith.constant 0 : index
    %420 = vector.load %arg13[%c0_236, %c0_237] : memref<2x32xf32, #tpu.memory_space<vmem>>, vector<2x32xf32>
    tpu.vector_store %arg13[%c0_236, %c0_237], %417 {strides = array<i32>} : memref<2x32xf32, #tpu.memory_space<vmem>>, vector<2x32xf32>,
    %c0_238 = arith.constant 0 : index
    %c0_239 = arith.constant 0 : index
    %421 = vector.load %arg12[%c0_238, %c0_239] : memref<2x32xf32, #tpu.memory_space<vmem>>, vector<2x32xf32>
    tpu.vector_store %arg12[%c0_238, %c0_239], %419 {strides = array<i32>} : memref<2x32xf32, #tpu.memory_space<vmem>>, vector<2x32xf32>,
    %c4_i32_240 = arith.constant 4 : i32
    %422 = arith.index_cast %c4_i32_240 : i32 to index
    %c0_241 = arith.constant 0 : index
    %c0_242 = arith.constant 0 : index
    %423 = vector.load %arg11[%422, %c0_241, %c0_242] : memref<8x2x128xbf16, #tpu.memory_space<vmem>>, vector<1x2x128xbf16>
    %424 = vector.shape_cast %423 : vector<1x2x128xbf16> to vector<2x128xbf16>
    %425 = arith.extf %424 : vector<2x128xbf16> to vector<2x128xf32>
    %c0_243 = arith.constant 0 : index
    %c0_244 = arith.constant 0 : index
    %426 = vector.load %arg6[%c0_243, %c0_244] : memref<1x128xf32, #tpu.memory_space<vmem>>, vector<1x128xf32>
    %427 = vector.broadcast %426 : vector<1x128xf32> to vector<2x128xf32>
    %428 = arith.addf %425, %427 : vector<2x128xf32>
    %c0_245 = arith.constant 0 : index
    %c0_246 = arith.constant 0 : index
    %429 = vector.load %arg12[%c0_245, %c0_246] : memref<2x32xf32, #tpu.memory_space<vmem>>, vector<2x32xf32>
    %430 = arith.truncf %429 : vector<2x32xf32> to vector<2x32xbf16>
    %c0_247 = arith.constant 0 : index
    %c0_248 = arith.constant 0 : index
    %431 = vector.load %arg5[%c0_247, %c0_248] : memref<32x128xbf16, #tpu.memory_space<vmem>>, vector<32x128xbf16>
    %cst_249 = arith.constant dense<0.000000e+00> : vector<2x128xf32>
    %432 = tpu.matmul %430, %431, %cst_249 {dimension_numbers = #tpu.dot_dimension_numbers<[1], [0], [0], [1], [0, 0, 1, 1], [], []>} : vector<2x32xbf16>, vector<32x128xbf16>, vector<2x128xf32> -> vector<2x128xf32>
    %433 = arith.addf %428, %432 : vector<2x128xf32>
    %434 = arith.negf %433 : vector<2x128xf32>
    %435 = math.exp %434 : vector<2x128xf32>
    %cst_250 = arith.constant 1.000000e+00 : f32
    %436 = vector.broadcast %cst_250 : f32 to vector<2x128xf32>
    %437 = arith.addf %436, %435 : vector<2x128xf32>
    %438 = arith.divf %436, %437 : vector<2x128xf32>
    %439 = math.tanh %433 : vector<2x128xf32>
    %440 = vector.extract_strided_slice %438 {offsets = [0, 0], sizes = [2, 32], strides = [1, 1]} : vector<2x128xf32> to vector<2x32xf32>
    %441 = vector.extract_strided_slice %438 {offsets = [0, 32], sizes = [2, 32], strides = [1, 1]} : vector<2x128xf32> to vector<2x32xf32>
    %442 = vector.extract_strided_slice %438 {offsets = [0, 96], sizes = [2, 32], strides = [1, 1]} : vector<2x128xf32> to vector<2x32xf32>
    %443 = vector.extract_strided_slice %439 {offsets = [0, 64], sizes = [2, 32], strides = [1, 1]} : vector<2x128xf32> to vector<2x32xf32>
    %c0_251 = arith.constant 0 : index
    %c0_252 = arith.constant 0 : index
    %444 = vector.load %arg13[%c0_251, %c0_252] : memref<2x32xf32, #tpu.memory_space<vmem>>, vector<2x32xf32>
    %445 = arith.mulf %441, %444 : vector<2x32xf32>
    %446 = arith.mulf %440, %443 : vector<2x32xf32>
    %447 = arith.addf %445, %446 : vector<2x32xf32>
    %448 = math.tanh %447 : vector<2x32xf32>
    %449 = arith.mulf %442, %448 : vector<2x32xf32>
    %c0_253 = arith.constant 0 : index
    %c0_254 = arith.constant 0 : index
    %450 = vector.load %arg13[%c0_253, %c0_254] : memref<2x32xf32, #tpu.memory_space<vmem>>, vector<2x32xf32>
    tpu.vector_store %arg13[%c0_253, %c0_254], %447 {strides = array<i32>} : memref<2x32xf32, #tpu.memory_space<vmem>>, vector<2x32xf32>,
    %c0_255 = arith.constant 0 : index
    %c0_256 = arith.constant 0 : index
    %451 = vector.load %arg12[%c0_255, %c0_256] : memref<2x32xf32, #tpu.memory_space<vmem>>, vector<2x32xf32>
    tpu.vector_store %arg12[%c0_255, %c0_256], %449 {strides = array<i32>} : memref<2x32xf32, #tpu.memory_space<vmem>>, vector<2x32xf32>,
    %c5_i32_257 = arith.constant 5 : i32
    %452 = arith.index_cast %c5_i32_257 : i32 to index
    %c0_258 = arith.constant 0 : index
    %c0_259 = arith.constant 0 : index
    %453 = vector.load %arg11[%452, %c0_258, %c0_259] : memref<8x2x128xbf16, #tpu.memory_space<vmem>>, vector<1x2x128xbf16>
    %454 = vector.shape_cast %453 : vector<1x2x128xbf16> to vector<2x128xbf16>
    %455 = arith.extf %454 : vector<2x128xbf16> to vector<2x128xf32>
    %c0_260 = arith.constant 0 : index
    %c0_261 = arith.constant 0 : index
    %456 = vector.load %arg6[%c0_260, %c0_261] : memref<1x128xf32, #tpu.memory_space<vmem>>, vector<1x128xf32>
    %457 = vector.broadcast %456 : vector<1x128xf32> to vector<2x128xf32>
    %458 = arith.addf %455, %457 : vector<2x128xf32>
    %c0_262 = arith.constant 0 : index
    %c0_263 = arith.constant 0 : index
    %459 = vector.load %arg12[%c0_262, %c0_263] : memref<2x32xf32, #tpu.memory_space<vmem>>, vector<2x32xf32>
    %460 = arith.truncf %459 : vector<2x32xf32> to vector<2x32xbf16>
    %c0_264 = arith.constant 0 : index
    %c0_265 = arith.constant 0 : index
    %461 = vector.load %arg5[%c0_264, %c0_265] : memref<32x128xbf16, #tpu.memory_space<vmem>>, vector<32x128xbf16>
    %cst_266 = arith.constant dense<0.000000e+00> : vector<2x128xf32>
    %462 = tpu.matmul %460, %461, %cst_266 {dimension_numbers = #tpu.dot_dimension_numbers<[1], [0], [0], [1], [0, 0, 1, 1], [], []>} : vector<2x32xbf16>, vector<32x128xbf16>, vector<2x128xf32> -> vector<2x128xf32>
    %463 = arith.addf %458, %462 : vector<2x128xf32>
    %464 = arith.negf %463 : vector<2x128xf32>
    %465 = math.exp %464 : vector<2x128xf32>
    %cst_267 = arith.constant 1.000000e+00 : f32
    %466 = vector.broadcast %cst_267 : f32 to vector<2x128xf32>
    %467 = arith.addf %466, %465 : vector<2x128xf32>
    %468 = arith.divf %466, %467 : vector<2x128xf32>
    %469 = math.tanh %463 : vector<2x128xf32>
    %470 = vector.extract_strided_slice %468 {offsets = [0, 0], sizes = [2, 32], strides = [1, 1]} : vector<2x128xf32> to vector<2x32xf32>
    %471 = vector.extract_strided_slice %468 {offsets = [0, 32], sizes = [2, 32], strides = [1, 1]} : vector<2x128xf32> to vector<2x32xf32>
    %472 = vector.extract_strided_slice %468 {offsets = [0, 96], sizes = [2, 32], strides = [1, 1]} : vector<2x128xf32> to vector<2x32xf32>
    %473 = vector.extract_strided_slice %469 {offsets = [0, 64], sizes = [2, 32], strides = [1, 1]} : vector<2x128xf32> to vector<2x32xf32>
    %c0_268 = arith.constant 0 : index
    %c0_269 = arith.constant 0 : index
    %474 = vector.load %arg13[%c0_268, %c0_269] : memref<2x32xf32, #tpu.memory_space<vmem>>, vector<2x32xf32>
    %475 = arith.mulf %471, %474 : vector<2x32xf32>
    %476 = arith.mulf %470, %473 : vector<2x32xf32>
    %477 = arith.addf %475, %476 : vector<2x32xf32>
    %478 = math.tanh %477 : vector<2x32xf32>
    %479 = arith.mulf %472, %478 : vector<2x32xf32>
    %c0_270 = arith.constant 0 : index
    %c0_271 = arith.constant 0 : index
    %480 = vector.load %arg13[%c0_270, %c0_271] : memref<2x32xf32, #tpu.memory_space<vmem>>, vector<2x32xf32>
    tpu.vector_store %arg13[%c0_270, %c0_271], %477 {strides = array<i32>} : memref<2x32xf32, #tpu.memory_space<vmem>>, vector<2x32xf32>,
    %c0_272 = arith.constant 0 : index
    %c0_273 = arith.constant 0 : index
    %481 = vector.load %arg12[%c0_272, %c0_273] : memref<2x32xf32, #tpu.memory_space<vmem>>, vector<2x32xf32>
    tpu.vector_store %arg12[%c0_272, %c0_273], %479 {strides = array<i32>} : memref<2x32xf32, #tpu.memory_space<vmem>>, vector<2x32xf32>,
    %c6_i32_274 = arith.constant 6 : i32
    %482 = arith.index_cast %c6_i32_274 : i32 to index
    %c0_275 = arith.constant 0 : index
    %c0_276 = arith.constant 0 : index
    %483 = vector.load %arg11[%482, %c0_275, %c0_276] : memref<8x2x128xbf16, #tpu.memory_space<vmem>>, vector<1x2x128xbf16>
    %484 = vector.shape_cast %483 : vector<1x2x128xbf16> to vector<2x128xbf16>
    %485 = arith.extf %484 : vector<2x128xbf16> to vector<2x128xf32>
    %c0_277 = arith.constant 0 : index
    %c0_278 = arith.constant 0 : index
    %486 = vector.load %arg6[%c0_277, %c0_278] : memref<1x128xf32, #tpu.memory_space<vmem>>, vector<1x128xf32>
    %487 = vector.broadcast %486 : vector<1x128xf32> to vector<2x128xf32>
    %488 = arith.addf %485, %487 : vector<2x128xf32>
    %c0_279 = arith.constant 0 : index
    %c0_280 = arith.constant 0 : index
    %489 = vector.load %arg12[%c0_279, %c0_280] : memref<2x32xf32, #tpu.memory_space<vmem>>, vector<2x32xf32>
    %490 = arith.truncf %489 : vector<2x32xf32> to vector<2x32xbf16>
    %c0_281 = arith.constant 0 : index
    %c0_282 = arith.constant 0 : index
    %491 = vector.load %arg5[%c0_281, %c0_282] : memref<32x128xbf16, #tpu.memory_space<vmem>>, vector<32x128xbf16>
    %cst_283 = arith.constant dense<0.000000e+00> : vector<2x128xf32>
    %492 = tpu.matmul %490, %491, %cst_283 {dimension_numbers = #tpu.dot_dimension_numbers<[1], [0], [0], [1], [0, 0, 1, 1], [], []>} : vector<2x32xbf16>, vector<32x128xbf16>, vector<2x128xf32> -> vector<2x128xf32>
    %493 = arith.addf %488, %492 : vector<2x128xf32>
    %494 = arith.negf %493 : vector<2x128xf32>
    %495 = math.exp %494 : vector<2x128xf32>
    %cst_284 = arith.constant 1.000000e+00 : f32
    %496 = vector.broadcast %cst_284 : f32 to vector<2x128xf32>
    %497 = arith.addf %496, %495 : vector<2x128xf32>
    %498 = arith.divf %496, %497 : vector<2x128xf32>
    %499 = math.tanh %493 : vector<2x128xf32>
    %500 = vector.extract_strided_slice %498 {offsets = [0, 0], sizes = [2, 32], strides = [1, 1]} : vector<2x128xf32> to vector<2x32xf32>
    %501 = vector.extract_strided_slice %498 {offsets = [0, 32], sizes = [2, 32], strides = [1, 1]} : vector<2x128xf32> to vector<2x32xf32>
    %502 = vector.extract_strided_slice %498 {offsets = [0, 96], sizes = [2, 32], strides = [1, 1]} : vector<2x128xf32> to vector<2x32xf32>
    %503 = vector.extract_strided_slice %499 {offsets = [0, 64], sizes = [2, 32], strides = [1, 1]} : vector<2x128xf32> to vector<2x32xf32>
    %c0_285 = arith.constant 0 : index
    %c0_286 = arith.constant 0 : index
    %504 = vector.load %arg13[%c0_285, %c0_286] : memref<2x32xf32, #tpu.memory_space<vmem>>, vector<2x32xf32>
    %505 = arith.mulf %501, %504 : vector<2x32xf32>
    %506 = arith.mulf %500, %503 : vector<2x32xf32>
    %507 = arith.addf %505, %506 : vector<2x32xf32>
    %508 = math.tanh %507 : vector<2x32xf32>
    %509 = arith.mulf %502, %508 : vector<2x32xf32>
    %c0_287 = arith.constant 0 : index
    %c0_288 = arith.constant 0 : index
    %510 = vector.load %arg13[%c0_287, %c0_288] : memref<2x32xf32, #tpu.memory_space<vmem>>, vector<2x32xf32>
    tpu.vector_store %arg13[%c0_287, %c0_288], %507 {strides = array<i32>} : memref<2x32xf32, #tpu.memory_space<vmem>>, vector<2x32xf32>,
    %c0_289 = arith.constant 0 : index
    %c0_290 = arith.constant 0 : index
    %511 = vector.load %arg12[%c0_289, %c0_290] : memref<2x32xf32, #tpu.memory_space<vmem>>, vector<2x32xf32>
    tpu.vector_store %arg12[%c0_289, %c0_290], %509 {strides = array<i32>} : memref<2x32xf32, #tpu.memory_space<vmem>>, vector<2x32xf32>,
    %c7_i32_291 = arith.constant 7 : i32
    %512 = arith.index_cast %c7_i32_291 : i32 to index
    %c0_292 = arith.constant 0 : index
    %c0_293 = arith.constant 0 : index
    %513 = vector.load %arg11[%512, %c0_292, %c0_293] : memref<8x2x128xbf16, #tpu.memory_space<vmem>>, vector<1x2x128xbf16>
    %514 = vector.shape_cast %513 : vector<1x2x128xbf16> to vector<2x128xbf16>
    %515 = arith.extf %514 : vector<2x128xbf16> to vector<2x128xf32>
    %c0_294 = arith.constant 0 : index
    %c0_295 = arith.constant 0 : index
    %516 = vector.load %arg6[%c0_294, %c0_295] : memref<1x128xf32, #tpu.memory_space<vmem>>, vector<1x128xf32>
    %517 = vector.broadcast %516 : vector<1x128xf32> to vector<2x128xf32>
    %518 = arith.addf %515, %517 : vector<2x128xf32>
    %c0_296 = arith.constant 0 : index
    %c0_297 = arith.constant 0 : index
    %519 = vector.load %arg12[%c0_296, %c0_297] : memref<2x32xf32, #tpu.memory_space<vmem>>, vector<2x32xf32>
    %520 = arith.truncf %519 : vector<2x32xf32> to vector<2x32xbf16>
    %c0_298 = arith.constant 0 : index
    %c0_299 = arith.constant 0 : index
    %521 = vector.load %arg5[%c0_298, %c0_299] : memref<32x128xbf16, #tpu.memory_space<vmem>>, vector<32x128xbf16>
    %cst_300 = arith.constant dense<0.000000e+00> : vector<2x128xf32>
    %522 = tpu.matmul %520, %521, %cst_300 {dimension_numbers = #tpu.dot_dimension_numbers<[1], [0], [0], [1], [0, 0, 1, 1], [], []>} : vector<2x32xbf16>, vector<32x128xbf16>, vector<2x128xf32> -> vector<2x128xf32>
    %523 = arith.addf %518, %522 : vector<2x128xf32>
    %524 = arith.negf %523 : vector<2x128xf32>
    %525 = math.exp %524 : vector<2x128xf32>
    %cst_301 = arith.constant 1.000000e+00 : f32
    %526 = vector.broadcast %cst_301 : f32 to vector<2x128xf32>
    %527 = arith.addf %526, %525 : vector<2x128xf32>
    %528 = arith.divf %526, %527 : vector<2x128xf32>
    %529 = math.tanh %523 : vector<2x128xf32>
    %530 = vector.extract_strided_slice %528 {offsets = [0, 0], sizes = [2, 32], strides = [1, 1]} : vector<2x128xf32> to vector<2x32xf32>
    %531 = vector.extract_strided_slice %528 {offsets = [0, 32], sizes = [2, 32], strides = [1, 1]} : vector<2x128xf32> to vector<2x32xf32>
    %532 = vector.extract_strided_slice %528 {offsets = [0, 96], sizes = [2, 32], strides = [1, 1]} : vector<2x128xf32> to vector<2x32xf32>
    %533 = vector.extract_strided_slice %529 {offsets = [0, 64], sizes = [2, 32], strides = [1, 1]} : vector<2x128xf32> to vector<2x32xf32>
    %c0_302 = arith.constant 0 : index
    %c0_303 = arith.constant 0 : index
    %534 = vector.load %arg13[%c0_302, %c0_303] : memref<2x32xf32, #tpu.memory_space<vmem>>, vector<2x32xf32>
    %535 = arith.mulf %531, %534 : vector<2x32xf32>
    %536 = arith.mulf %530, %533 : vector<2x32xf32>
    %537 = arith.addf %535, %536 : vector<2x32xf32>
    %538 = math.tanh %537 : vector<2x32xf32>
    %539 = arith.mulf %532, %538 : vector<2x32xf32>
    %c0_304 = arith.constant 0 : index
    %c0_305 = arith.constant 0 : index
    %540 = vector.load %arg13[%c0_304, %c0_305] : memref<2x32xf32, #tpu.memory_space<vmem>>, vector<2x32xf32>
    tpu.vector_store %arg13[%c0_304, %c0_305], %537 {strides = array<i32>} : memref<2x32xf32, #tpu.memory_space<vmem>>, vector<2x32xf32>,
    %c0_306 = arith.constant 0 : index
    %c0_307 = arith.constant 0 : index
    %541 = vector.load %arg12[%c0_306, %c0_307] : memref<2x32xf32, #tpu.memory_space<vmem>>, vector<2x32xf32>
    tpu.vector_store %arg12[%c0_306, %c0_307], %539 {strides = array<i32>} : memref<2x32xf32, #tpu.memory_space<vmem>>, vector<2x32xf32>,
    %c8_i32_308 = arith.constant 8 : i32
    %c0_309 = arith.constant 0 : index
    %c0_310 = arith.constant 0 : index
    %542 = vector.load %arg12[%c0_309, %c0_310] : memref<2x32xf32, #tpu.memory_space<vmem>>, vector<2x32xf32>
    %c0_311 = arith.constant 0 : index
    %c0_312 = arith.constant 0 : index
    %543 = vector.load %arg7[%c0_311, %c0_312] : memref<32x4xf32, #tpu.memory_space<vmem>>, vector<32x4xf32>
    %cst_313 = arith.constant dense<0.000000e+00> : vector<2x4xf32>
    %544 = tpu.matmul %542, %543, %cst_313 {dimension_numbers = #tpu.dot_dimension_numbers<[1], [0], [0], [1], [0, 0, 1, 1], [], []>} : vector<2x32xf32>, vector<32x4xf32>, vector<2x4xf32> -> vector<2x4xf32>
    %c0_314 = arith.constant 0 : index
    %c0_315 = arith.constant 0 : index
    %545 = vector.load %arg8[%c0_314, %c0_315] : memref<1x4xf32, #tpu.memory_space<vmem>>, vector<1x4xf32>
    %546 = vector.broadcast %545 : vector<1x4xf32> to vector<2x4xf32>
    %547 = arith.addf %544, %546 : vector<2x4xf32>
    %c0_316 = arith.constant 0 : index
    %c0_317 = arith.constant 0 : index
    %548 = vector.load %arg9[%c0_316, %c0_317] : memref<2x4xf32, #tpu.memory_space<vmem>>, vector<2x4xf32>
    tpu.vector_store %arg9[%c0_316, %c0_317], %547 {strides = array<i32>} : memref<2x4xf32, #tpu.memory_space<vmem>>, vector<2x4xf32>,
    return
  }
}

</mosaic_0001>

<bundles_post_ra>
// kernel: cnn_lstm_forward.4
= control target key start
LH: loop header
LB: loop body
LE: loop exit
PB: predicated region body
PF: predicated region fallthrough
CT: control target
= control target key end

     0   :  { %v535_v0 = vmov 0   ;;  %v536_v3 = vmov 1966171168   ;;  %v85_v5 = vlaneseq  ;;  %vm284_vm0 = vcmask 523264   ;;  %s743_s1 = inlined_call_operand.vmem [shape: bf16[192,128], index: 1, kind: input, shape index: {}]   ;;  %s744_s0 = inlined_call_operand.vmem [shape: bf16[16,2,192], index: 0, kind: input, shape index: {}]   ;;  %s745_s2 = inlined_call_operand.vmem [shape: f32[1,128], index: 2, kind: input, shape index: {}]   ;;  %s746_s3 = inlined_call_operand.vmem [shape: bf16[8,2,128], index: 3, kind: output, shape index: {}]  }
   0x1   :  { %291 = vmatprep.subr.bf16.mxu0 %v535_v0  ;;  %496 = vmatprep.subr.bf16.mxu1 %v535_v0  ;;  %v523_v1 = vld [vmem:[%s743_s1] sm:$0xff]   ;;  %v524_v2 = vld [vmem:[%s743_s1 + $0x8] sm:$0xff]   ;;  %v83_v4 = vunpack.c.l.s4 %v536_v3  ;;  %v525_v6 = vld [vmem:[%s743_s1 + $0x10] sm:$0xff]   ;;  %vm428_vm1 = vcmask 1041408  }
   0x2   :  { %292 = vmatpush1.bf16.msra.mxu0 %v523_v1  ;;  %508 = vmatpush1.bf16.msra.mxu1 %v523_v1  ;;  %v573_v8 = vshrl.u32 %v85_v5, 7  ;;  %v526_v9 = vld [vmem:[%s743_s1 + $0x18] sm:$0xff]   ;;  %v527_v11 = vld [vmem:[%s743_s1 + $0x20] sm:$0xff]   ;;  %v19_v16 = vld [vmem:[%s744_s0 + $0x8] sm:$0x3] }
   0x3   :  { %293 = vmatprep.subr.bf16.mxu0 %v535_v0  ;;  %497 = vmatprep.subr.bf16.mxu1 %v535_v0  ;;  %v84_v7 = vunpack.c.0.s8 %v83_v4  ;;  %v15_v12 = vld [vmem:[%s744_s0] sm:$0x3]  ;;  %v16_v13 = vld [vmem:[%s744_s0 + $0x2] sm:$0x3]  ;;  %v17_v14 = vld [vmem:[%s744_s0 + $0x4] sm:$0x3] }
   0x4   :  { %v18_v15 = vld [vmem:[%s744_s0 + $0x6] sm:$0x3]  ;;  %v20_v17 = vld [vmem:[%s744_s0 + $0xa] sm:$0x3]  ;;  %v78_v18 = vcombine.low %v15_v12, %v16_v13  ;;  %v21_v19 = vld [vmem:[%s744_s0 + $0xc] sm:$0x3] }
   0x5   :  { %v581_v10 = vsub.s32 %v84_v7, %v573_v8  ;;  %v22_v20 = vld [vmem:[%s744_s0 + $0xe] sm:$0x3]  ;;  %v79_v21 = vcombine.low %v17_v14, %v18_v15  ;;  %v80_v22 = vcombine.low %v19_v16, %v20_v17  ;;  %v23_v23 = vld [vmem:[%s744_s0 + $0x10] sm:$0x3]  ;;  %v24_v26 = vld [vmem:[%s744_s0 + $0x12] sm:$0x3] }
   0x6   :  { %294 = vmatpush1.bf16.msra.mxu0 %v524_v2  ;;  %509 = vmatpush1.bf16.msra.mxu1 %v524_v2  ;;  %v81_v24 = vcombine.low %v21_v19, %v22_v20  ;;  %v25_v27 = vld [vmem:[%s744_s0 + $0x14] sm:$0x3]  ;;  %v26_v28 = vld [vmem:[%s744_s0 + $0x16] sm:$0x3]  ;;  %v27_v31 = vld [vmem:[%s744_s0 + $0x18] sm:$0x3]  ;;  %v144_v34 = vcombine.low %v23_v23, %v24_v26 }
   0x7   :  { %295 = vmatprep.subr.bf16.mxu0 %v535_v0  ;;  %498 = vmatprep.subr.bf16.mxu1 %v535_v0  ;;  %v616_v25 = vrot.slane %v78_v18, %v581_v10  ;;  %v628_v29 = vrot.slane %v79_v21, %v581_v10  ;;  %v631_v30 = vrot.slane %v80_v22, %v581_v10  ;;  %v28_v32 = vld [vmem:[%s744_s0 + $0x1a] sm:$0x3]  ;;  %v29_v33 = vld [vmem:[%s744_s0 + $0x1c] sm:$0x3]  ;;  %v30_v37 = vld [vmem:[%s744_s0 + $0x1e] sm:$0x3] }
   0x8   :  { %v145_v35 = vcombine.low %v25_v27, %v26_v28  ;;  %v109_v36 = vrot.slane %v81_v24, %v581_v10  ;;  %v146_v38 = vcombine.low %v27_v31, %v28_v32  ;;  %v528_v39 = vld [vmem:[%s743_s1 + $0x28] sm:$0xff]   ;;  %v147_v41 = vcombine.low %v29_v33, %v30_v37  ;;  %v529_v50 = vld [vmem:[%s743_s1 + $0x30] sm:$0xff]   ;;  %v530_v55 = vld [vmem:[%s743_s1 + $0x38] sm:$0xff]  }
   0x9   :  { %v111_v40 = vcombine.high %v616_v25, %v628_v29  ;;  %v154_v42 = vrot.slane %v144_v34, %v581_v10  ;;  %v531_v57 = vld [vmem:[%s743_s1 + $0x40] sm:$0xff]   ;;  %v532_v58 = vld [vmem:[%s743_s1 + $0x48] sm:$0xff]   ;;  %v110_v59 = vcombine.low %v616_v25, %v628_v29  ;;  %v533_v63 = vld [vmem:[%s743_s1 + $0x50] sm:$0xff]  }
   0xa   :  { %296 = vmatpush1.bf16.msra.mxu0 %v525_v6  ;;  %510 = vmatpush1.bf16.msra.mxu1 %v525_v6  ;;  %v113_v43 = vcombine.high %v631_v30, %v109_v36  ;;  %v161_v44 = vrot.slane %v145_v35, %v581_v10  ;;  %v168_v45 = vrot.slane %v146_v38, %v581_v10  ;;  %v534_v5 = vld [vmem:[%s743_s1 + $0x58] sm:$0xff]  }
   0xb   :  { %297 = vmatprep.subr.bf16.mxu0 %v535_v0  ;;  %499 = vmatprep.subr.bf16.mxu1 %v535_v0  ;;  %v127_v46 = vrot.slane %v111_v40, %v581_v10  ;;  %v175_v47 = vrot.slane %v147_v41, %v581_v10  ;;  %v112_v60 = vcombine.low %v631_v30, %v109_v36 }
   0xc   :  { %v141_v48 = vrot.slane %v113_v43, %v581_v10  ;;  %v177_v49 = vcombine.high %v154_v42, %v161_v44  ;;  %v176_v61 = vcombine.low %v154_v42, %v161_v44  ;;  %v120_v1 = vrot.slane %v110_v59, %v581_v10 }
   0xd   :  { %v179_v51 = vcombine.high %v168_v45, %v175_v47  ;;  %v178_v62 = vcombine.low %v168_v45, %v175_v47  ;;  %v134_v2 = vrot.slane %v112_v60, %v581_v10 }
   0xe   :  { %298 = vmatpush1.bf16.msra.mxu0 %v526_v9  ;;  %511 = vmatpush1.bf16.msra.mxu1 %v526_v9  ;;  %v143_v52 = vcombine.low %v127_v46, %v141_v48  ;;  %v193_v53 = vrot.slane %v177_v49, %v581_v10  ;;  %v186_v3 = vrot.slane %v176_v61, %v581_v10  ;;  %v537_v9 = vmov 1983009808  }
   0xf   :  { %299 = vmatprep.subr.bf16.mxu0 %v535_v0  ;;  %500 = vmatprep.subr.bf16.mxu1 %v535_v0  ;;  %v207_v54 = vrot.slane %v179_v51, %v581_v10  ;;  %v200_v4 = vrot.slane %v178_v62, %v581_v10  ;;  %v142_v6 = vcombine.low %v120_v1, %v134_v2  ;;  %v481_v10 = vld [vmem:[%s745_s2] ss:$0 sm:$0xff] }
  0x10   :  { %494 = vmatprep.mubr.msk.bf16.mxu0 %vm284_vm0, %v143_v52 }
  0x11   :  { %v209_v56 = vcombine.low %v193_v53, %v207_v54  ;;  %v208_v7 = vcombine.low %v186_v3, %v200_v4 }
  0x12   :  { %300 = vmatpush1.bf16.msra.mxu0 %v527_v11  ;;  %512 = vmatpush1.bf16.msra.mxu1 %v527_v11  ;;  %v346_v11 = vunpack.c.l.s4 %v537_v9 }
  0x13   :  { %301 = vmatprep.subr.bf16.mxu0 %v535_v0  ;;  %501 = vmatprep.subr.bf16.mxu1 %v535_v0 }
  0x14   :  { %495 = vmatprep.mubr.msk.bf16.mxu1 %vm284_vm0, %v209_v56  ;;  %v347_v12 = vunpack.c.0.s8 %v346_v11 }
  0x16   :  { %302 = vmatpush1.bf16.msra.mxu0 %v528_v39  ;;  %513 = vmatpush1.bf16.msra.mxu1 %v528_v39  ;;  %v350_v13 = vsub.s32 %v347_v12, %v573_v8 }
  0x17   :  { %303 = vmatprep.subr.bf16.mxu0 %v535_v0  ;;  %502 = vmatprep.subr.bf16.mxu1 %v535_v0 }
  0x1a   :  { %304 = vmatpush1.bf16.msra.mxu0 %v529_v50  ;;  %514 = vmatpush1.bf16.msra.mxu1 %v529_v50 }
  0x1b   :  { %305 = vmatprep.subr.bf16.mxu0 %v535_v0  ;;  %503 = vmatprep.subr.bf16.mxu1 %v535_v0 }
  0x1e   :  { %306 = vmatpush1.bf16.msra.mxu0 %v530_v55  ;;  %515 = vmatpush1.bf16.msra.mxu1 %v530_v55 }
  0x1f   :  { %307 = vmatprep.subr.bf16.mxu0 %v535_v0  ;;  %504 = vmatprep.subr.bf16.mxu1 %v535_v0 }
  0x22   :  { %308 = vmatpush1.bf16.msra.mxu0 %v531_v57  ;;  %516 = vmatpush1.bf16.msra.mxu1 %v531_v57 }
  0x23   :  { %309 = vmatprep.subr.bf16.mxu0 %v535_v0  ;;  %505 = vmatprep.subr.bf16.mxu1 %v535_v0 }
  0x26   :  { %310 = vmatpush1.bf16.msra.mxu0 %v532_v58  ;;  %517 = vmatpush1.bf16.msra.mxu1 %v532_v58 }
  0x27   :  { %311 = vmatprep.subr.bf16.mxu0 %v535_v0  ;;  %506 = vmatprep.subr.bf16.mxu1 %v535_v0 }
  0x2a   :  { %312 = vmatpush1.bf16.msra.mxu0 %v533_v63  ;;  %518 = vmatpush1.bf16.msra.mxu1 %v533_v63 }
  0x2b   :  { %313 = vmatprep.subr.bf16.mxu0 %v535_v0  ;;  %507 = vmatprep.subr.bf16.mxu1 %v535_v0 }
  0x2e   :  { %314 = vmatpush1.bf16.msra.mxu0 %v534_v5  ;;  %519 = vmatpush1.bf16.msra.mxu1 %v534_v5 }
  0x31   :  { %324 = vmatmul.mubr.bf16.vlgmr.msra.gmra.mrb[0].mxu0 %v142_v6  ;;  %332 = vmatmul.mubr.bf16.vlgmr.msra.gmra.mrb[0].mxu1 %v208_v7 }
 0x104   :  { %v325_v14 = vpop.f32.mrb[0].mxu0  ;;  %v333_v15 = vpop.f32.mrb[0].mxu1 }
 0x105   :  { %v326_v16 = vadd.f32 %v481_v10, %v325_v14  ;;  %v334_v17 = vadd.f32 %v481_v10, %v333_v15  ;;  %v327_v0 = vpop.f32.mrb[1].mxu0  ;;  %v335_v18 = vpop.f32.mrb[1].mxu1 }
 0x106   :  { %v328_v19 = vpop.f32.mrb[2].mxu0  ;;  %v336_v20 = vpop.f32.mrb[2].mxu1 }
 0x107   :  { %v344_v21 = vcombine.high %v326_v16, %v326_v16  ;;  %v351_v22 = vrot.slane %v326_v16, %v350_v13  ;;  %v378_v23 = vcombine.high %v334_v17, %v334_v17  ;;  %v385_v24 = vrot.slane %v334_v17, %v350_v13  ;;  %v330_v25 = vpop.f32.mrb[3].mxu0  ;;  %v338_v26 = vpop.f32.mrb[3].mxu1 }
 0x108   :  { %v329_v27 = vadd.f32 %v481_v10, %v328_v19  ;;  %v337_v28 = vadd.f32 %v481_v10, %v336_v20 }
 0x109   :  { %v358_v29 = vrot.slane %v344_v21, %v350_v13  ;;  %v359_v30 = vcombine.high %v351_v22, %v351_v22  ;;  %v429_v8 = vsel %vm428_vm1, %v351_v22, -inf  ;;  %v392_v31 = vrot.slane %v378_v23, %v350_v13 }
 0x10a   :  { %v393_v32 = vcombine.high %v385_v24, %v385_v24  ;;  %v441_v33 = vsel %vm428_vm1, %v385_v24, -inf  ;;  %v361_v34 = vcombine.high %v329_v27, %v329_v27  ;;  %v368_v35 = vrot.slane %v329_v27, %v350_v13 }
 0x10b   :  { %v360_v36 = vcombine.high %v358_v29, %v358_v29  ;;  %v430_v37 = vsel %vm428_vm1, %v359_v30, -inf  ;;  %v432_v38 = vsel %vm428_vm1, %v358_v29, -inf  ;;  %v394_v39 = vcombine.high %v392_v31, %v392_v31 }
 0x10c   :  { %v431_v40 = vmax.f32 %v429_v8, %v430_v37  ;;  %v442_v41 = vsel %vm428_vm1, %v393_v32, -inf  ;;  %v444_v42 = vsel %vm428_vm1, %v392_v31, -inf  ;;  %v375_v43 = vrot.slane %v361_v34, %v350_v13 }
 0x10d   :  { %v433_v44 = vsel %vm428_vm1, %v360_v36, -inf  ;;  %v443_v45 = vmax.f32 %v441_v33, %v442_v41  ;;  %v445_v46 = vsel %vm428_vm1, %v394_v39, -inf  ;;  %v376_v47 = vcombine.high %v368_v35, %v368_v35 }
 0x10e   :  { %v434_v48 = vmax.f32 %v432_v38, %v433_v44  ;;  %v453_v49 = vmax.f32 %v431_v40, 0.0  ;;  %v446_v50 = vmax.f32 %v444_v42, %v445_v46  ;;  %v377_v51 = vcombine.high %v375_v43, %v375_v43 }
 0x10f   :  { %v457_v52 = vmax.f32 %v443_v45, 0.0  ;;  %v435_v53 = vsel %vm428_vm1, %v368_v35, -inf  ;;  %v436_v54 = vsel %vm428_vm1, %v376_v47, -inf  ;;  %v438_v55 = vsel %vm428_vm1, %v375_v43, -inf }
 0x110   :  { %v454_v56 = vmax.f32 %v434_v48, 0.0  ;;  %v461_v57 = vpack.c.bf16 %v453_v49, %v453_v49  ;;  %v458_v58 = vmax.f32 %v446_v50, 0.0  ;;  %v437_v59 = vmax.f32 %v435_v53, %v436_v54 }
 0x111   :  { %v465_v60 = vpack.c.bf16 %v457_v52, %v457_v52  ;;  %v439_v61 = vsel %vm428_vm1, %v377_v51, -inf  ;;  %v395_v62 = vcombine.high %v337_v28, %v337_v28  ;;  %v402_v63 = vrot.slane %v337_v28, %v350_v13 }
 0x112   :  { %v462_v1 = vpack.c.bf16 %v454_v56, %v454_v56  ;;  %469 = vst [vmem:[%s746_s3] sm:$0x1] %v461_v57  ;;  %v466_v2 = vpack.c.bf16 %v458_v58, %v458_v58  ;;  %v440_v3 = vmax.f32 %v438_v55, %v439_v61  ;;  %v455_v4 = vmax.f32 %v437_v59, 0.0 }
 0x113   :  { %473 = vst [vmem:[%s746_s3 + $0x4] sm:$0x1] %v465_v60  ;;  %v409_v5 = vrot.slane %v395_v62, %v350_v13  ;;  %v410_v6 = vcombine.high %v402_v63, %v402_v63  ;;  %v447_v12 = vsel %vm428_vm1, %v402_v63, -inf }
 0x114   :  { %470 = vst [vmem:[%s746_s3 + $0x1] sm:$0x1] %v462_v1  ;;  %474 = vst [vmem:[%s746_s3 + $0x5] sm:$0x1] %v466_v2  ;;  %v456_v7 = vmax.f32 %v440_v3, 0.0  ;;  %v463_v9 = vpack.c.bf16 %v455_v4, %v455_v4 }
 0x115   :  { %v411_v11 = vcombine.high %v409_v5, %v409_v5  ;;  %v448_v10 = vsel %vm428_vm1, %v410_v6, -inf  ;;  %v450_v15 = vsel %vm428_vm1, %v409_v5, -inf }
 0x116   :  { %v464_v14 = vpack.c.bf16 %v456_v7, %v456_v7  ;;  %471 = vst [vmem:[%s746_s3 + $0x2] sm:$0x1] %v463_v9  ;;  %v449_v13 = vmax.f32 %v447_v12, %v448_v10 }
 0x117   :  { %v451_v16 = vsel %vm428_vm1, %v411_v11, -inf }
 0x118   :  { %472 = vst [vmem:[%s746_s3 + $0x3] sm:$0x1] %v464_v14  ;;  %v452_v17 = vmax.f32 %v450_v15, %v451_v16  ;;  %v459_v0 = vmax.f32 %v449_v13, 0.0 }
 0x11a   :  { %v460_v18 = vmax.f32 %v452_v17, 0.0  ;;  %v467_v19 = vpack.c.bf16 %v459_v0, %v459_v0 }
 0x11c   :  { %v468_v20 = vpack.c.bf16 %v460_v18, %v460_v18  ;;  %475 = vst [vmem:[%s746_s3 + $0x6] sm:$0x1] %v467_v19 }
 0x11e   :  { %476 = vst [vmem:[%s746_s3 + $0x7] sm:$0x1] %v468_v20 }

// kernel: cnn_lstm_forward.3
= control target key start
LH: loop header
LB: loop body
LE: loop exit
PB: predicated region body
PF: predicated region fallthrough
CT: control target
= control target key end

     0   :  { %vm239_vm0 = vcmask 1042432   ;;  %v91_v0 = vlaneseq  ;;  %v662_v4 = vmov 1983009808   ;;  %vm222_vm1 = vcmask 23552   ;;  %s933_s1 = inlined_call_operand.vmem [shape: f32[3,64], index: 1, kind: input, shape index: {}]   ;;  %s934_s0 = inlined_call_operand.vmem [shape: f32[32,2,3], index: 0, kind: input, shape index: {}]   ;;  %s935_s2 = inlined_call_operand.vmem [shape: f32[1,64], index: 2, kind: input, shape index: {}]   ;;  %s936_s3 = inlined_call_operand.vmem [shape: bf16[16,2,64], index: 3, kind: output, shape index: {}]  }
   0x1   :  { %v46_v1 = vld [vmem:[%s933_s1] sm:$0x7]  ;;  %v89_v5 = vunpack.c.l.s4 %v662_v4  ;;  %v16_v6 = vld [vmem:[%s934_s0 + $0x4] sm:$0x3]  ;;  %v17_v7 = vld [vmem:[%s934_s0 + $0x6] sm:$0x3] }
   0x2   :  { %v14_v2 = vld [vmem:[%s934_s0] sm:$0x3]  ;;  %v15_v3 = vld [vmem:[%s934_s0 + $0x2] sm:$0x3]  ;;  %645 = vmatprep.subr.msk.mxu0 %vm239_vm0, %v46_v1  ;;  %659 = vmatprep.subr.msk.mxu1 %vm239_vm0, %v46_v1  ;;  %v92_v8 = vshrl.u32 %v91_v0, 7  ;;  %v87_v10 = vcombine.low %v16_v6, %v17_v7  ;;  %vm524_vm2 = vcmask 517120  }
   0x3   :  { %646 = vmatpush3.msk.msra.mxu0 %vm239_vm0, %v46_v1  ;;  %660 = vmatpush3.msk.msra.mxu1 %vm239_vm0, %v46_v1  ;;  %v86_v9 = vcombine.low %v14_v2, %v15_v3  ;;  %v90_v11 = vunpack.c.0.s8 %v89_v5  ;;  %v30_v12 = vld [vmem:[%s934_s0 + $0x20] sm:$0x3]  ;;  %v31_v13 = vld [vmem:[%s934_s0 + $0x22] sm:$0x3]  ;;  %v32_v14 = vld [vmem:[%s934_s0 + $0x24] sm:$0x3] }
   0x4   :  { %v33_v15 = vld [vmem:[%s934_s0 + $0x26] sm:$0x3]  ;;  %v154_v16 = vcombine.low %v30_v12, %v31_v13  ;;  %v18_v17 = vld [vmem:[%s934_s0 + $0x8] sm:$0x3]  ;;  %v19_v18 = vld [vmem:[%s934_s0 + $0xa] sm:$0x3] }
   0x5   :  { %v716_v19 = vsub.s32 %v90_v11, %v92_v8  ;;  %v155_v20 = vcombine.low %v32_v14, %v33_v15  ;;  %v20_v21 = vld [vmem:[%s934_s0 + $0xc] sm:$0x3]  ;;  %v21_v22 = vld [vmem:[%s934_s0 + $0xe] sm:$0x3]  ;;  %v103_v23 = vcombine.low %v18_v17, %v19_v18  ;;  %v34_v24 = vld [vmem:[%s934_s0 + $0x28] sm:$0x3] }
   0x6   :  { %v104_v25 = vcombine.low %v20_v21, %v21_v22  ;;  %v35_v26 = vld [vmem:[%s934_s0 + $0x2a] sm:$0x3]  ;;  %v36_v27 = vld [vmem:[%s934_s0 + $0x2c] sm:$0x3]  ;;  %v37_v28 = vld [vmem:[%s934_s0 + $0x2e] sm:$0x3] }
   0x7   :  { %v94_v29 = vrot.slane %v86_v9, %v716_v19  ;;  %v101_v30 = vrot.slane %v87_v10, %v716_v19  ;;  %v162_v31 = vrot.slane %v154_v16, %v716_v19  ;;  %v169_v32 = vrot.slane %v155_v20, %v716_v19  ;;  %v22_v33 = vld [vmem:[%s934_s0 + $0x10] sm:$0x3]  ;;  %v23_v34 = vld [vmem:[%s934_s0 + $0x12] sm:$0x3]  ;;  %v24_v35 = vld [vmem:[%s934_s0 + $0x14] sm:$0x3] }
   0x8   :  { %v111_v36 = vrot.slane %v103_v23, %v716_v19  ;;  %v118_v37 = vrot.slane %v104_v25, %v716_v19  ;;  %v171_v38 = vcombine.low %v34_v24, %v35_v26  ;;  %v172_v39 = vcombine.low %v36_v27, %v37_v28  ;;  %v25_v40 = vld [vmem:[%s934_s0 + $0x16] sm:$0x3]  ;;  %v38_v41 = vld [vmem:[%s934_s0 + $0x30] sm:$0x3]  ;;  %v39_v42 = vld [vmem:[%s934_s0 + $0x32] sm:$0x3] }
   0x9   :  { %v102_v43 = vcombine.low %v94_v29, %v101_v30  ;;  %v170_v44 = vcombine.low %v162_v31, %v169_v32  ;;  %v120_v45 = vcombine.low %v22_v33, %v23_v34  ;;  %v121_v46 = vcombine.low %v24_v35, %v25_v40  ;;  %v40_v47 = vld [vmem:[%s934_s0 + $0x34] sm:$0x3]  ;;  %v41_v48 = vld [vmem:[%s934_s0 + $0x36] sm:$0x3]  ;;  %v26_v49 = vld [vmem:[%s934_s0 + $0x18] sm:$0x3] }
   0xa   :  { %v119_v50 = vcombine.low %v111_v36, %v118_v37  ;;  %v179_v51 = vrot.slane %v171_v38, %v716_v19  ;;  %v186_v52 = vrot.slane %v172_v39, %v716_v19  ;;  %v188_v53 = vcombine.low %v38_v41, %v39_v42  ;;  %v27_v54 = vld [vmem:[%s934_s0 + $0x1a] sm:$0x3]  ;;  %v28_v55 = vld [vmem:[%s934_s0 + $0x1c] sm:$0x3]  ;;  %v29_v56 = vld [vmem:[%s934_s0 + $0x1e] sm:$0x3] }
   0xb   :  { %647 = vmatprep.mubr.msk.f32.mxu0 %vm222_vm1, %v102_v43  ;;  %653 = vmatprep.mubr.msk.f32.mxu1 %vm222_vm1, %v170_v44  ;;  %v128_v57 = vrot.slane %v120_v45, %v716_v19  ;;  %v135_v58 = vrot.slane %v121_v46, %v716_v19  ;;  %v189_v59 = vcombine.low %v40_v47, %v41_v48  ;;  %v42_v60 = vld [vmem:[%s934_s0 + $0x38] sm:$0x3]  ;;  %v43_v61 = vld [vmem:[%s934_s0 + $0x3a] sm:$0x3]  ;;  %v44_v62 = vld [vmem:[%s934_s0 + $0x3c] sm:$0x3] }
   0xc   :  { %648 = vmatmul.mubr.msk.f32.vlgmr.msra.gmra.mrb[0].mxu0 %vm222_vm1, %v119_v50  ;;  %v187_v63 = vcombine.low %v179_v51, %v186_v52  ;;  %v196_v0 = vrot.slane %v188_v53, %v716_v19  ;;  %v137_v1 = vcombine.low %v26_v49, %v27_v54  ;;  %v138_v2 = vcombine.low %v28_v55, %v29_v56  ;;  %v45_v3 = vld [vmem:[%s934_s0 + $0x3e] sm:$0x3]  ;;  %v811_v15 = vld [vmem:[%s935_s2] ss:$0 sm:$0xff] }
   0xd   :  { %v136_v4 = vcombine.low %v128_v57, %v135_v58  ;;  %v203_v5 = vrot.slane %v189_v59, %v716_v19  ;;  %v205_v6 = vcombine.low %v42_v60, %v43_v61  ;;  %v206_v7 = vcombine.low %v44_v62, %v45_v3 }
   0xe   :  { %654 = vmatmul.mubr.msk.f32.vlgmr.msra.gmra.mrb[0].mxu1 %vm222_vm1, %v187_v63  ;;  %v145_v8 = vrot.slane %v137_v1, %v716_v19  ;;  %v152_v9 = vrot.slane %v138_v2, %v716_v19  ;;  %vm605_vm3 = vcmask 516096  }
   0xf   :  { %650 = vmatprep.mubr.msk.f32.mxu0 %vm222_vm1, %v136_v4  ;;  %v204_v10 = vcombine.low %v196_v0, %v203_v5  ;;  %v213_v11 = vrot.slane %v205_v6, %v716_v19  ;;  %v220_v12 = vrot.slane %v206_v7, %v716_v19 }
  0x10   :  { %v153_v13 = vcombine.low %v145_v8, %v152_v9 }
  0x11   :  { %656 = vmatprep.mubr.msk.f32.mxu1 %vm222_vm1, %v204_v10  ;;  %v221_v14 = vcombine.low %v213_v11, %v220_v12 }
  0x12   :  { %651 = vmatmul.mubr.msk.f32.gmra.mrb[2].mxu0 %vm222_vm1, %v153_v13 }
  0x13   :  { %657 = vmatmul.mubr.msk.f32.gmra.mrb[2].mxu1 %vm222_vm1, %v221_v14 }
  0xdf   :  { %v649_v16 = vpop.f32.mrb[0].mxu0 }
  0xe0   :  { %v315_v17 = vadd.f32 %v649_v16, %v811_v15  ;;  %v309_v18 = vpop.f32.mrb[1].mxu0 }
  0xe1   :  { %v655_v20 = vpop.f32.mrb[0].mxu1  ;;  %v310_v21 = vadd.f32 %v811_v15, %v309_v18 }
  0xe2   :  { %v373_v22 = vcombine.high %v315_v17, %v315_v17  ;;  %v380_v23 = vrot.slane %v315_v17, %v716_v19  ;;  %v335_v24 = vadd.f32 %v655_v20, %v811_v15  ;;  %v329_v25 = vpop.f32.mrb[1].mxu1 }
  0xe3   :  { %v356_v26 = vcombine.high %v310_v21, %v310_v21  ;;  %v363_v27 = vrot.slane %v310_v21, %v716_v19  ;;  %v330_v28 = vadd.f32 %v811_v15, %v329_v25 }
  0xe4   :  { %v387_v29 = vrot.slane %v373_v22, %v716_v19  ;;  %v388_v30 = vcombine.high %v380_v23, %v380_v23  ;;  %v531_v31 = vsel %vm524_vm2, %v380_v23, -inf  ;;  %v441_v32 = vcombine.high %v335_v24, %v335_v24 }
  0xe5   :  { %v448_v33 = vrot.slane %v335_v24, %v716_v19  ;;  %v370_v34 = vrot.slane %v356_v26, %v716_v19  ;;  %v371_v35 = vcombine.high %v363_v27, %v363_v27  ;;  %v525_v36 = vsel %vm524_vm2, %v363_v27, -inf  ;;  %v652_v37 = vpop.f32.mrb[2].mxu0 }
  0xe6   :  { %v389_v38 = vcombine.high %v387_v29, %v387_v29  ;;  %v532_v39 = vsel %vm524_vm2, %v388_v30, -inf  ;;  %v534_v40 = vsel %vm524_vm2, %v387_v29, -inf  ;;  %v455_v41 = vrot.slane %v441_v32, %v716_v19  ;;  %v658_v42 = vpop.f32.mrb[2].mxu1  ;;  %v319_v43 = vpop.f32.mrb[3].mxu0 }
  0xe7   :  { %v533_v44 = vmax.f32 %v531_v31, %v532_v39  ;;  %v456_v45 = vcombine.high %v448_v33, %v448_v33  ;;  %v555_v46 = vsel %vm524_vm2, %v448_v33, -inf  ;;  %v372_v47 = vcombine.high %v370_v34, %v370_v34  ;;  %v339_v48 = vpop.f32.mrb[3].mxu1 }
  0xe8   :  { %v535_v49 = vsel %vm524_vm2, %v389_v38, -inf  ;;  %v457_v50 = vcombine.high %v455_v41, %v455_v41  ;;  %v558_v51 = vsel %vm524_vm2, %v455_v41, -inf  ;;  %v526_v52 = vsel %vm524_vm2, %v371_v35, -inf }
  0xe9   :  { %v536_v53 = vmax.f32 %v534_v40, %v535_v49  ;;  %v575_v54 = vmax.f32 %v533_v44, 0.0  ;;  %v556_v55 = vsel %vm524_vm2, %v456_v45, -inf  ;;  %v527_v56 = vmax.f32 %v525_v36, %v526_v52 }
  0xea   :  { %v557_v57 = vmax.f32 %v555_v46, %v556_v55  ;;  %v559_v58 = vsel %vm524_vm2, %v457_v50, -inf  ;;  %v528_v59 = vsel %vm524_vm2, %v370_v34, -inf  ;;  %v529_v60 = vsel %vm524_vm2, %v372_v47, -inf }
  0xeb   :  { %v576_v61 = vmax.f32 %v536_v53, 0.0  ;;  %v591_v62 = vpack.c.bf16 %v575_v54, %v575_v54  ;;  %v560_v63 = vmax.f32 %v558_v51, %v559_v58  ;;  %v530_v0 = vmax.f32 %v528_v59, %v529_v60 }
  0xec   :  { %v583_v1 = vmax.f32 %v557_v57, 0.0  ;;  %v573_v2 = vmax.f32 %v527_v56, 0.0  ;;  %v424_v3 = vcombine.high %v330_v28, %v330_v28  ;;  %v431_v4 = vrot.slane %v330_v28, %v716_v19 }
  0xed   :  { %v592_v5 = vpack.c.bf16 %v576_v61, %v576_v61  ;;  %608 = vst.msk [vmem:[%s936_s3 + $0x2] sm:$0x1] %vm605_vm3, %v591_v62  ;;  %v584_v6 = vmax.f32 %v560_v63, 0.0  ;;  %v574_v7 = vmax.f32 %v530_v0, 0.0  ;;  %v325_v8 = vadd.f32 %v652_v37, %v811_v15 }
  0xee   :  { %v599_v9 = vpack.c.bf16 %v583_v1, %v583_v1  ;;  %v589_v10 = vpack.c.bf16 %v573_v2, %v573_v2  ;;  %v438_v11 = vrot.slane %v424_v3, %v716_v19  ;;  %v439_v12 = vcombine.high %v431_v4, %v431_v4 }
  0xef   :  { %609 = vst.msk [vmem:[%s936_s3 + $0x3] sm:$0x1] %vm605_vm3, %v592_v5  ;;  %v600_v13 = vpack.c.bf16 %v584_v6, %v584_v6  ;;  %v590_v14 = vpack.c.bf16 %v574_v7, %v574_v7  ;;  %v549_v16 = vsel %vm524_vm2, %v431_v4, -inf  ;;  %v407_v17 = vcombine.high %v325_v8, %v325_v8 }
  0xf0   :  { %616 = vst.msk [vmem:[%s936_s3 + $0xa] sm:$0x1] %vm605_vm3, %v599_v9  ;;  %606 = vst.msk [vmem:[%s936_s3] sm:$0x1] %vm605_vm3, %v589_v10  ;;  %v440_v18 = vcombine.high %v438_v11, %v438_v11  ;;  %v550_v20 = vsel %vm524_vm2, %v439_v12, -inf  ;;  %v552_v21 = vsel %vm524_vm2, %v438_v11, -inf  ;;  %v414_v22 = vrot.slane %v325_v8, %v716_v19 }
  0xf1   :  { %617 = vst.msk [vmem:[%s936_s3 + $0xb] sm:$0x1] %vm605_vm3, %v600_v13  ;;  %607 = vst.msk [vmem:[%s936_s3 + $0x1] sm:$0x1] %vm605_vm3, %v590_v14  ;;  %v551_v23 = vmax.f32 %v549_v16, %v550_v20  ;;  %v421_v24 = vrot.slane %v407_v17, %v716_v19  ;;  %v345_v25 = vadd.f32 %v658_v42, %v811_v15 }
  0xf2   :  { %v320_v26 = vadd.f32 %v811_v15, %v319_v43  ;;  %v553_v27 = vsel %vm524_vm2, %v440_v18, -inf  ;;  %v422_v28 = vcombine.high %v414_v22, %v414_v22  ;;  %v543_v29 = vsel %vm524_vm2, %v414_v22, -inf }
  0xf3   :  { %v340_v30 = vadd.f32 %v811_v15, %v339_v48  ;;  %v554_v31 = vmax.f32 %v552_v21, %v553_v27  ;;  %v581_v32 = vmax.f32 %v551_v23, 0.0  ;;  %v423_v33 = vcombine.high %v421_v24, %v421_v24 }
  0xf4   :  { %v546_v34 = vsel %vm524_vm2, %v421_v24, -inf  ;;  %v544_v35 = vsel %vm524_vm2, %v422_v28, -inf  ;;  %v475_v36 = vcombine.high %v345_v25, %v345_v25  ;;  %v482_v37 = vrot.slane %v345_v25, %v716_v19 }
  0xf5   :  { %v390_v38 = vcombine.high %v320_v26, %v320_v26  ;;  %v582_v39 = vmax.f32 %v554_v31, 0.0  ;;  %v597_v40 = vpack.c.bf16 %v581_v32, %v581_v32  ;;  %v545_v41 = vmax.f32 %v543_v29, %v544_v35 }
  0xf6   :  { %v547_v42 = vsel %vm524_vm2, %v423_v33, -inf  ;;  %v489_v44 = vrot.slane %v475_v36, %v716_v19  ;;  %v490_v15 = vcombine.high %v482_v37, %v482_v37  ;;  %v567_v45 = vsel %vm524_vm2, %v482_v37, -inf }
  0xf7   :  { %v548_v43 = vmax.f32 %v546_v34, %v547_v42  ;;  %v598_v46 = vpack.c.bf16 %v582_v39, %v582_v39  ;;  %614 = vst.msk [vmem:[%s936_s3 + $0x8] sm:$0x1] %vm605_vm3, %v597_v40  ;;  %v579_v47 = vmax.f32 %v545_v41, 0.0  ;;  %v397_v48 = vrot.slane %v320_v26, %v716_v19 }
  0xf8   :  { %v404_v49 = vrot.slane %v390_v38, %v716_v19  ;;  %v491_v51 = vcombine.high %v489_v44, %v489_v44  ;;  %v568_v52 = vsel %vm524_vm2, %v490_v15, -inf  ;;  %v570_v53 = vsel %vm524_vm2, %v489_v44, -inf }
  0xf9   :  { %v580_v50 = vmax.f32 %v548_v43, 0.0  ;;  %615 = vst.msk [vmem:[%s936_s3 + $0x9] sm:$0x1] %vm605_vm3, %v598_v46  ;;  %v595_v54 = vpack.c.bf16 %v579_v47, %v579_v47  ;;  %v569_v55 = vmax.f32 %v567_v45, %v568_v52  ;;  %v405_v56 = vcombine.high %v397_v48, %v397_v48 }
  0xfa   :  { %v406_v57 = vcombine.high %v404_v49, %v404_v49  ;;  %v571_v59 = vsel %vm524_vm2, %v491_v51, -inf  ;;  %v537_v60 = vsel %vm524_vm2, %v397_v48, -inf  ;;  %v540_v61 = vsel %vm524_vm2, %v404_v49, -inf }
  0xfb   :  { %v596_v58 = vpack.c.bf16 %v580_v50, %v580_v50  ;;  %612 = vst.msk [vmem:[%s936_s3 + $0x6] sm:$0x1] %vm605_vm3, %v595_v54  ;;  %v572_v62 = vmax.f32 %v570_v53, %v571_v59  ;;  %v587_v63 = vmax.f32 %v569_v55, 0.0  ;;  %v538_v0 = vsel %vm524_vm2, %v405_v56, -inf }
  0xfc   :  { %v541_v1 = vsel %vm524_vm2, %v406_v57, -inf  ;;  %v539_v2 = vmax.f32 %v537_v60, %v538_v0  ;;  %v458_v4 = vcombine.high %v340_v30, %v340_v30  ;;  %v465_v5 = vrot.slane %v340_v30, %v716_v19 }
  0xfd   :  { %613 = vst.msk [vmem:[%s936_s3 + $0x7] sm:$0x1] %vm605_vm3, %v596_v58  ;;  %v542_v3 = vmax.f32 %v540_v61, %v541_v1  ;;  %v588_v6 = vmax.f32 %v572_v62, 0.0  ;;  %v603_v7 = vpack.c.bf16 %v587_v63, %v587_v63 }
  0xfe   :  { %v577_v8 = vmax.f32 %v539_v2, 0.0  ;;  %v472_v10 = vrot.slane %v458_v4, %v716_v19  ;;  %v473_v11 = vcombine.high %v465_v5, %v465_v5  ;;  %v561_v13 = vsel %vm524_vm2, %v465_v5, -inf }
  0xff   :  { %v578_v9 = vmax.f32 %v542_v3, 0.0  ;;  %v604_v12 = vpack.c.bf16 %v588_v6, %v588_v6  ;;  %620 = vst.msk [vmem:[%s936_s3 + $0xe] sm:$0x1] %vm605_vm3, %v603_v7 }
 0x100   :  { %v593_v14 = vpack.c.bf16 %v577_v8, %v577_v8  ;;  %v474_v17 = vcombine.high %v472_v10, %v472_v10  ;;  %v562_v18 = vsel %vm524_vm2, %v473_v11, -inf  ;;  %v564_v20 = vsel %vm524_vm2, %v472_v10, -inf }
 0x101   :  { %v594_v16 = vpack.c.bf16 %v578_v9, %v578_v9  ;;  %621 = vst.msk [vmem:[%s936_s3 + $0xf] sm:$0x1] %vm605_vm3, %v604_v12  ;;  %v563_v19 = vmax.f32 %v561_v13, %v562_v18 }
 0x102   :  { %610 = vst.msk [vmem:[%s936_s3 + $0x4] sm:$0x1] %vm605_vm3, %v593_v14  ;;  %v565_v21 = vsel %vm524_vm2, %v474_v17, -inf }
 0x103   :  { %611 = vst.msk [vmem:[%s936_s3 + $0x5] sm:$0x1] %vm605_vm3, %v594_v16  ;;  %v566_v22 = vmax.f32 %v564_v20, %v565_v21  ;;  %v585_v23 = vmax.f32 %v563_v19, 0.0 }
 0x105   :  { %v586_v24 = vmax.f32 %v566_v22, 0.0  ;;  %v601_v25 = vpack.c.bf16 %v585_v23, %v585_v23 }
 0x107   :  { %v602_v26 = vpack.c.bf16 %v586_v24, %v586_v24  ;;  %618 = vst.msk [vmem:[%s936_s3 + $0xc] sm:$0x1] %vm605_vm3, %v601_v25 }
 0x109   :  { %619 = vst.msk [vmem:[%s936_s3 + $0xd] sm:$0x1] %vm605_vm3, %v602_v26 }

// kernel: cnn_lstm_forward.5
= control target key start
LH: loop header
LB: loop body
LE: loop exit
PB: predicated region body
PF: predicated region fallthrough
CT: control target
= control target key end

     0   :  { %v3394_v1 = vmov 0.0   ;;  %vm3395_vm0 = vmmov 0   ;;  %vm265_vm1 = vcmask 254976   ;;  %v73_v4 = vlaneseq  ;;  %s4008_s0 = inlined_call_operand.vmem [shape: bf16[8,2,128], index: 0, kind: input, shape index: {}]   ;;  %s4009_s1 = inlined_call_operand.vmem [shape: bf16[128,128], index: 1, kind: input, shape index: {}]   ;;  %s4010_s2 = inlined_call_operand.vmem [shape: bf16[32,128], index: 2, kind: input, shape index: {}]   ;;  %s4011_s3 = inlined_call_operand.vmem [shape: f32[1,128], index: 3, kind: input, shape index: {}]   ;;  %s4012_s4 = inlined_call_operand.vmem [shape: bf16[32,128], index: 4, kind: input, shape index: {}]   ;;  %s4013_s5 = inlined_call_operand.vmem [shape: bf16[32,128], index: 5, kind: input, shape index: {}]   ;;  %s4014_s6 = inlined_call_operand.vmem [shape: f32[1,128], index: 6, kind: input, shape index: {}]   ;;  %s4015_s7 = inlined_call_operand.vmem [shape: f32[32,4], index: 7, kind: input, shape index: {}]   ;;  %s4016_s8 = inlined_call_operand.vmem [shape: f32[1,4], index: 8, kind: input, shape index: {}]   ;;  %s4017_s9 = inlined_call_operand.hbm [shape: f32[2,4], index: 9, kind: output, shape index: {}]  }
   0x1   :  { %v3200_v0 = vld [vmem:[%s4009_s1] sm:$0xff]   ;;  %3018 = vmatprep.subr.bf16.mxu0 %v3394_v1  ;;  %3038 = vmatprep.subr.bf16.mxu1 %v3394_v1  ;;  %v3201_v2 = vld [vmem:[%s4009_s1 + $0x8] sm:$0xff]   ;;  %266 = vst.msk [vmem:[#allocation4] sm:$0x3] %vm265_vm1, %v3394_v1  ;;  %267 = vst.msk [vmem:[#allocation5] sm:$0x3] %vm265_vm1, %v3394_v1 }
   0x2   :  { %3019 = vmatpush3.bf16.msra.mxu0 %v3200_v0  ;;  %3034 = vmatprep.mubr.msk.bf16.mxu0 %vm3395_vm0, %v3394_v1  ;;  %v3202_v3 = vld [vmem:[%s4009_s1 + $0x10] sm:$0xff]   ;;  %v3203_v5 = vld [vmem:[%s4009_s1 + $0x18] sm:$0xff]   ;;  %v34_v6 = vld [vmem:[%s4008_s0] sm:$0x1]  ;;  %v3396_v14 = vmov 1966171168  }
   0x3   :  { %3020 = vmatprep.subr.bf16.mxu0 %v3394_v1  ;;  %3042 = vmatprep.mubr.msk.bf16.mxu1 %vm3395_vm0, %v3394_v1  ;;  %v35_v7 = vld [vmem:[%s4008_s0 + $0x1] sm:$0x1]  ;;  %v36_v8 = vld [vmem:[%s4008_s0 + $0x2] sm:$0x1]  ;;  %v37_v9 = vld [vmem:[%s4008_s0 + $0x3] sm:$0x1]  ;;  %v71_v15 = vunpack.c.l.s4 %v3396_v14 }
   0x4   :  { %v38_v10 = vld [vmem:[%s4008_s0 + $0x4] sm:$0x1]  ;;  %v39_v11 = vld [vmem:[%s4008_s0 + $0x5] sm:$0x1]  ;;  %v40_v12 = vld [vmem:[%s4008_s0 + $0x6] sm:$0x1]  ;;  %v66_v18 = vcombine.low %v34_v6, %v35_v7  ;;  %v67_v20 = vcombine.low %v36_v8, %v37_v9 }
   0x5   :  { %v41_v13 = vld [vmem:[%s4008_s0 + $0x7] sm:$0x1]  ;;  %v74_v16 = vshrl.u32 %v73_v4, 7  ;;  %vm296_vm2 = vcmask 261120   ;;  %v68_v21 = vcombine.low %v38_v10, %v39_v11  ;;  %v72_v23 = vunpack.c.0.s8 %v71_v15  ;;  %v3209_v24 = vld [vmem:[%s4010_s2 + $0x8] sm:$0xff]   ;;  %v3206_v33 = vld [vmem:[%s4009_s1 + $0x30] sm:$0xff]  }
   0x6   :  { %3021 = vmatpush3.bf16.msra.mxu0 %v3201_v2  ;;  %v3204_v17 = vld [vmem:[%s4009_s1 + $0x20] sm:$0xff]   ;;  %v69_v22 = vcombine.low %v40_v12, %v41_v13  ;;  %v3205_v27 = vld [vmem:[%s4009_s1 + $0x28] sm:$0xff]   ;;  %v3207_v36 = vld [vmem:[%s4009_s1 + $0x38] sm:$0xff]  }
   0x7   :  { %3022 = vmatprep.subr.bf16.mxu0 %v3394_v1  ;;  %v3208_v19 = vld [vmem:[%s4010_s2] sm:$0xff]   ;;  %v3512_v26 = vsub.s32 %v72_v23, %v74_v16 }
   0x8   :  { %v278_v25 = vld [vmem:[#allocation4] sm:$0x3]  ;;  %3039 = vmatpush3.bf16.msra.mxu1 %v3208_v19 }
   0x9   :  { %3040 = vmatprep.subr.bf16.mxu1 %v3394_v1  ;;  %v279_v28 = vpack.c.bf16 %v278_v25, %v278_v25  ;;  %v76_v29 = vrot.slane %v66_v18, %v3512_v26  ;;  %v83_v30 = vrot.slane %v67_v20, %v3512_v26  ;;  %v90_v31 = vrot.slane %v68_v21, %v3512_v26 }
   0xa   :  { %3023 = vmatpush3.bf16.msra.mxu0 %v3202_v3  ;;  %v97_v32 = vrot.slane %v69_v22, %v3512_v26 }
   0xb   :  { %3024 = vmatprep.subr.bf16.mxu0 %v3394_v1  ;;  %v98_v34 = vcombine.low %v76_v29, %v83_v30 }
   0xc   :  { %3041 = vmatpush3.bf16.msra.mxu1 %v3209_v24  ;;  %v99_v35 = vcombine.low %v90_v31, %v97_v32 }
   0xd   :  { %3046 = vmatprep.subr.bf16.mxu1 %v3394_v1  ;;  %v106_v37 = vrot.slane %v98_v34, %v3512_v26 }
   0xe   :  { %3025 = vmatpush3.bf16.msra.mxu0 %v3203_v5  ;;  %v113_v38 = vrot.slane %v99_v35, %v3512_v26 }
   0xf   :  { %3026 = vmatprep.subr.bf16.mxu0 %v3394_v1  ;;  %3043 = vmatmul.mubr.msk.bf16.vlgmr.msra.gmra.mrb[0].mxu1 %vm296_vm2, %v279_v28 }
  0x10   :  { %3050 = vmatprep.mubr.msk.bf16.mxu1 %vm3395_vm0, %v3394_v1  ;;  %v114_v39 = vcombine.low %v106_v37, %v113_v38 }
  0x12   :  { %3027 = vmatpush3.bf16.msra.mxu0 %v3204_v17 }
  0x13   :  { %3028 = vmatprep.subr.bf16.mxu0 %v3394_v1 }
  0x16   :  { %3029 = vmatpush3.bf16.msra.mxu0 %v3205_v27 }
  0x17   :  { %3030 = vmatprep.subr.bf16.mxu0 %v3394_v1 }
  0x1a   :  { %3031 = vmatpush3.bf16.msra.mxu0 %v3206_v33 }
  0x1b   :  { %3032 = vmatprep.subr.bf16.mxu0 %v3394_v1 }
  0x1e   :  { %3033 = vmatpush3.bf16.msra.mxu0 %v3207_v36 }
  0x1f   :  { %3070 = vmatprep.subr.bf16.mxu0 %v3394_v1 }
  0x21   :  { %3035 = vmatmul.mubr.bf16.vlgmr.msra.gmra.mrb[0].mxu0 %v114_v39 }
  0x22   :  { %3074 = vmatprep.mubr.msk.bf16.mxu0 %vm3395_vm0, %v3394_v1 }
  0x23   :  { %14 = vsyncpa [#allocation7], 0  ;;  %v3397_v41 = vmov 1983009808   ;;  %v3549_v8 = vld [vmem:[%s4011_s3] ss:$0 sm:$0xff] }
  0x24   :  { %v209_v42 = vunpack.c.l.s4 %v3397_v41  ;;  %s3398_s24 = smov 64   ;;  %v2857_v13 = vld.sshfl [vmem:[#allocation5] sm:$0x3 pattern:$0x76325410]  ;;  %s3399_s25 = smov 32  }
  0x25   :  { %s3400_s3 = smov 96   ;;  %v3210_v27 = vld [vmem:[%s4010_s2] sm:$0xff]   ;;  %v3211_v28 = vld [vmem:[%s4010_s2 + $0x8] sm:$0xff]   ;;  %vm420_vm3 = vcmask 253952   ;;  %vm2828_vm4 = vcmask 25600  }
  0x26   :  { %v210_v46 = vunpack.c.0.s8 %v209_v42  ;;  %3047 = vmatpush3.bf16.msra.mxu1 %v3210_v27 }
  0x27   :  { %3048 = vmatprep.subr.bf16.mxu1 %v3394_v1 }
  0x28   :  { %v3540_v47 = vsub.s32 %v210_v46, %v74_v16 }
  0x2a   :  { %3049 = vmatpush3.bf16.msra.mxu1 %v3211_v28 }
  0x2b   :  { %3054 = vmatprep.subr.bf16.mxu1 %v3394_v1 }
  0xe2   :  { %v334_v40 = vpop.f32.mrb[0].mxu1 }
  0xe3   :  { %v3044_v43 = vpop.f32.mrb[1].mxu1 }
  0xe4   :  { %v337_v44 = vpop.f32.mrb[2].mxu1 }
  0xe5   :  { %v3045_v45 = vpop.f32.mrb[3].mxu1 }
  0xf4   :  { %v198_v48 = vpop.f32.mrb[0].mxu0 }
  0xf5   :  { %v207_v49 = vcombine.high %v198_v48, %v198_v48  ;;  %v214_v50 = vrot.slane %v198_v48, %v3540_v47  ;;  %v3036_v51 = vpop.f32.mrb[1].mxu0 }
  0xf6   :  { %v201_v52 = vpop.f32.mrb[2].mxu0 }
  0xf7   :  { %v221_v53 = vrot.slane %v207_v49, %v3540_v47  ;;  %v222_v54 = vcombine.high %v214_v50, %v214_v50  ;;  %v249_v55 = vpack.c.bf16 %v214_v50, %v214_v50  ;;  %v224_v56 = vcombine.high %v201_v52, %v201_v52  ;;  %v3037_v57 = vpop.f32.mrb[3].mxu0 }
  0xf8   :  { %v231_v58 = vrot.slane %v201_v52, %v3540_v47 }
  0xf9   :  { %v223_v59 = vcombine.high %v221_v53, %v221_v53  ;;  %v250_v60 = vpack.c.bf16 %v222_v54, %v222_v54  ;;  %v251_v61 = vpack.c.bf16 %v221_v53, %v221_v53  ;;  %257 = vst [vmem:[#allocation3] sm:$0x1] %v249_v55  ;;  %v238_v62 = vrot.slane %v224_v56, %v3540_v47 }
  0xfa   :  { %v239_v63 = vcombine.high %v231_v58, %v231_v58  ;;  %v253_v0 = vpack.c.bf16 %v231_v58, %v231_v58 }
  0xfb   :  { %v252_v2 = vpack.c.bf16 %v223_v59, %v223_v59  ;;  %258 = vst [vmem:[#allocation3 + $0x1] sm:$0x1] %v250_v60  ;;  %259 = vst [vmem:[#allocation3 + $0x2] sm:$0x1] %v251_v61  ;;  %v240_v3 = vcombine.high %v238_v62, %v238_v62  ;;  %v255_v4 = vpack.c.bf16 %v238_v62, %v238_v62  ;;  %v3212_v59 = vld [vmem:[%s4010_s2] sm:$0xff]   ;;  %v3213_v60 = vld [vmem:[%s4010_s2 + $0x8] sm:$0xff]  }
  0xfc   :  { %v254_v5 = vpack.c.bf16 %v239_v63, %v239_v63  ;;  %261 = vst [vmem:[#allocation3 + $0x4] sm:$0x1] %v253_v0 }
  0xfd   :  { %260 = vst [vmem:[#allocation3 + $0x3] sm:$0x1] %v252_v2  ;;  %v256_v6 = vpack.c.bf16 %v240_v3, %v240_v3  ;;  %263 = vst [vmem:[#allocation3 + $0x6] sm:$0x1] %v255_v4 }
  0xfe   :  { %262 = vst [vmem:[#allocation3 + $0x5] sm:$0x1] %v254_v5 }
  0xff   :  { %264 = vst [vmem:[#allocation3 + $0x7] sm:$0x1] %v256_v6 }
 0x100   :  { %v268_v7 = vld [vmem:[#allocation3] sm:$0x1] }
 0x101   :  { %v269_v9 = vunpack.c.l.bf16 %v268_v7 }
 0x102   :  { %v423_v37 = vld [vmem:[#allocation3 + $0x1] sm:$0x1]  ;;  %v577_v6 = vld [vmem:[#allocation3 + $0x2] sm:$0x1] }
 0x103   :  { %v277_v10 = vadd.f32 %v3549_v8, %v269_v9  ;;  %v424_v38 = vunpack.c.l.bf16 %v423_v37  ;;  %v578_v7 = vunpack.c.l.bf16 %v577_v6 }
 0x105   :  { %v340_v11 = vadd.f32 %v334_v40, %v277_v10  ;;  %v432_v39 = vadd.f32 %v3549_v8, %v424_v38  ;;  %v586_v9 = vadd.f32 %v3549_v8, %v578_v7 }
 0x107   :  { %3242 = vtanh.f32 %v340_v11  ;;  %v2856_v14 = vmul.f32 -1.442695, %v340_v11 }
 0x109   :  { %3244 = vpow2.f32 %v2856_v14 }
 0x111   :  { %v3243_v12 = vpop.eup %3242 }
 0x112   :  { %362 = vrot.lane.b32.xlu0 %v3243_v12, %s3398_s24 }
 0x113   :  { %v3245_v15 = vpop.eup %3244 }
 0x114   :  { %v344_v16 = vadd.f32 1.0, %v3245_v15 }
 0x116   :  { %357 = vrot.lane.b32.xlu0 %v2857_v13, %s3399_s25  ;;  %3246 = vrcp.f32 %v344_v16 }
 0x120   :  { %v3247_v17 = vpop.eup %3246 }
 0x184   :  { %v363_v18 = vpop.permute.xlu0 %362 }
 0x185   :  { %v365_v19 = vmul.f32 %v3247_v17, %v363_v18 }
 0x187   :  { %367 = vrot.lane.b32.xlu1 %v365_v19, %s3399_s25 }
 0x188   :  { %v358_v20 = vpop.permute.xlu0 %357 }
 0x189   :  { %v360_v21 = vmul.f32 %v3247_v17, %v358_v20 }
 0x1f9   :  { %v368_v22 = vpop.permute.xlu1 %367 }
 0x1fa   :  { %v370_v23 = vadd.f32 %v368_v22, %v360_v21 }
 0x1fc   :  { %3248 = vtanh.f32 %v370_v23  ;;  %v384_v25 = vrot.slane %v370_v23, %v3540_v47 }
 0x206   :  { %v3249_v24 = vpop.eup %3248 }
 0x207   :  { %373 = vrot.lane.b32.xlu1 %v3249_v24, %s3398_s24 }
 0x20b   :  { %385 = vrot.lane.b32.xlu1 %v384_v25, %s3400_s3 }
 0x279   :  { %v374_v29 = vpop.permute.xlu1 %373 }
 0x27a   :  { %v3565_v30 = vmul.f32 %v3247_v17, %v374_v29  ;;  %v3214_v29 = vld [vmem:[%s4010_s2] sm:$0xff]  }
 0x27c   :  { %v396_v31 = vrot.slane %v3565_v30, %v3540_v47 }
 0x27d   :  { %v386_v32 = vpop.permute.xlu1 %385 }
 0x27e   :  { %388 = vst.msk [vmem:[#allocation5] sm:$0x3] %vm265_vm1, %v386_v32  ;;  %397 = vrot.lane.b32.xlu0 %v396_v31, %s3399_s25  ;;  %v3215_v31 = vld [vmem:[%s4010_s2 + $0x8] sm:$0xff]  }
 0x285   :  { %v2863_v33 = vld.sshfl [vmem:[#allocation5] sm:$0x3 pattern:$0x76325410] }
 0x286   :  { %511 = vrot.lane.b32.xlu1 %v2863_v33, %s3399_s25 }
 0x2f0   :  { %v398_v34 = vpop.permute.xlu0 %397 }
 0x2f1   :  { %400 = vst.msk [vmem:[#allocation4] sm:$0x3] %vm265_vm1, %v398_v34 }
 0x2f8   :  { %v433_v35 = vld [vmem:[#allocation4] sm:$0x3]  ;;  %v512_v53 = vpop.permute.xlu1 %511 }
 0x2f9   :  { %v434_v36 = vpack.c.bf16 %v433_v35, %v433_v35 }
 0x2fb   :  { %3051 = vmatmul.mubr.msk.bf16.vlgmr.msra.gmra.mrb[4].mxu1 %vm296_vm2, %v434_v36 }
 0x2fc   :  { %3058 = vmatprep.mubr.msk.bf16.mxu1 %vm3395_vm0, %v3394_v1  ;;  %3055 = vmatpush3.bf16.msra.mxu1 %v3212_v59 }
 0x2fd   :  { %3056 = vmatprep.subr.bf16.mxu1 %v3394_v1 }
 0x300   :  { %3057 = vmatpush3.bf16.msra.mxu1 %v3213_v60 }
 0x301   :  { %3062 = vmatprep.subr.bf16.mxu1 %v3394_v1 }
 0x3ce   :  { %v488_v40 = vpop.f32.mrb[4].mxu1 }
 0x3cf   :  { %v494_v41 = vadd.f32 %v488_v40, %v432_v39  ;;  %v3052_v42 = vpop.f32.mrb[5].mxu1  ;;  %v731_v40 = vld [vmem:[#allocation3 + $0x3] sm:$0x1] }
 0x3d0   :  { %v491_v43 = vpop.f32.mrb[6].mxu1 }
 0x3d1   :  { %3250 = vtanh.f32 %v494_v41  ;;  %v3053_v44 = vpop.f32.mrb[7].mxu1  ;;  %v2862_v46 = vmul.f32 -1.442695, %v494_v41  ;;  %v732_v41 = vunpack.c.l.bf16 %v731_v40 }
 0x3d3   :  { %3252 = vpow2.f32 %v2862_v46  ;;  %v740_v42 = vadd.f32 %v3549_v8, %v732_v41 }
 0x3db   :  { %v3251_v45 = vpop.eup %3250 }
 0x3dc   :  { %516 = vrot.lane.b32.xlu0 %v3251_v45, %s3398_s24 }
 0x3dd   :  { %v3253_v48 = vpop.eup %3252 }
 0x3de   :  { %v498_v49 = vadd.f32 1.0, %v3253_v48 }
 0x3e0   :  { %3254 = vrcp.f32 %v498_v49 }
 0x3ea   :  { %v3255_v50 = vpop.eup %3254 }
 0x3eb   :  { %v514_v54 = vmul.f32 %v3255_v50, %v512_v53 }
 0x44e   :  { %v517_v51 = vpop.permute.xlu0 %516 }
 0x44f   :  { %v519_v52 = vmul.f32 %v3255_v50, %v517_v51 }
 0x451   :  { %521 = vrot.lane.b32.xlu0 %v519_v52, %s3399_s25 }
 0x4c3   :  { %v522_v55 = vpop.permute.xlu0 %521 }
 0x4c4   :  { %v524_v56 = vadd.f32 %v522_v55, %v514_v54 }
 0x4c6   :  { %3256 = vtanh.f32 %v524_v56  ;;  %v538_v58 = vrot.slane %v524_v56, %v3540_v47 }
 0x4d0   :  { %v3257_v57 = vpop.eup %3256 }
 0x4d1   :  { %527 = vrot.lane.b32.xlu1 %v3257_v57, %s3398_s24 }
 0x4d5   :  { %539 = vrot.lane.b32.xlu1 %v538_v58, %s3400_s3 }
 0x543   :  { %v528_v61 = vpop.permute.xlu1 %527 }
 0x544   :  { %v3590_v62 = vmul.f32 %v3255_v50, %v528_v61 }
 0x546   :  { %v550_v63 = vrot.slane %v3590_v62, %v3540_v47 }
 0x547   :  { %v540_v0 = vpop.permute.xlu1 %539 }
 0x548   :  { %542 = vst.msk [vmem:[#allocation5] sm:$0x3] %vm265_vm1, %v540_v0  ;;  %551 = vrot.lane.b32.xlu0 %v550_v63, %s3399_s25  ;;  %v3216_v63 = vld [vmem:[%s4010_s2] sm:$0xff]   ;;  %v3217_v0 = vld [vmem:[%s4010_s2 + $0x8] sm:$0xff]  }
 0x549   :  { %3071 = vmatpush3.bf16.msra.mxu0 %v3216_v63 }
 0x54a   :  { %3072 = vmatprep.subr.bf16.mxu0 %v3394_v1 }
 0x54d   :  { %3073 = vmatpush3.bf16.msra.mxu0 %v3217_v0 }
 0x54e   :  { %3086 = vmatprep.subr.bf16.mxu0 %v3394_v1 }
 0x54f   :  { %v2869_v2 = vld.sshfl [vmem:[#allocation5] sm:$0x3 pattern:$0x76325410] }
 0x550   :  { %665 = vrot.lane.b32.xlu1 %v2869_v2, %s3399_s25 }
 0x5ba   :  { %v552_v3 = vpop.permute.xlu0 %551 }
 0x5bb   :  { %554 = vst.msk [vmem:[#allocation4] sm:$0x3] %vm265_vm1, %v552_v3 }
 0x5c2   :  { %v587_v4 = vld [vmem:[#allocation4] sm:$0x3]  ;;  %v666_v22 = vpop.permute.xlu1 %665 }
 0x5c3   :  { %v588_v5 = vpack.c.bf16 %v587_v4, %v587_v4 }
 0x5c5   :  { %3059 = vmatmul.mubr.msk.bf16.vlgmr.msra.gmra.mrb[8].mxu1 %vm296_vm2, %v588_v5 }
 0x5c6   :  { %3066 = vmatprep.mubr.msk.bf16.mxu1 %vm3395_vm0, %v3394_v1  ;;  %3063 = vmatpush3.bf16.msra.mxu1 %v3214_v29 }
 0x5c7   :  { %3064 = vmatprep.subr.bf16.mxu1 %v3394_v1 }
 0x5ca   :  { %3065 = vmatpush3.bf16.msra.mxu1 %v3215_v31 }
 0x5cb   :  { %3078 = vmatprep.subr.bf16.mxu1 %v3394_v1 }
 0x698   :  { %v642_v10 = vpop.f32.mrb[8].mxu1 }
 0x699   :  { %v648_v11 = vadd.f32 %v642_v10, %v586_v9  ;;  %v3060_v12 = vpop.f32.mrb[9].mxu1 }
 0x69a   :  { %v645_v13 = vpop.f32.mrb[10].mxu1 }
 0x69b   :  { %3258 = vtanh.f32 %v648_v11  ;;  %v3061_v14 = vpop.f32.mrb[11].mxu1  ;;  %v2868_v16 = vmul.f32 -1.442695, %v648_v11  ;;  %v885_v11 = vld [vmem:[#allocation3 + $0x4] sm:$0x1] }
 0x69c   :  { %v886_v12 = vunpack.c.l.bf16 %v885_v11 }
 0x69d   :  { %3260 = vpow2.f32 %v2868_v16 }
 0x69e   :  { %v894_v13 = vadd.f32 %v3549_v8, %v886_v12 }
 0x6a5   :  { %v3259_v15 = vpop.eup %3258 }
 0x6a6   :  { %670 = vrot.lane.b32.xlu0 %v3259_v15, %s3398_s24 }
 0x6a7   :  { %v3261_v17 = vpop.eup %3260 }
 0x6a8   :  { %v652_v18 = vadd.f32 1.0, %v3261_v17 }
 0x6aa   :  { %3262 = vrcp.f32 %v652_v18 }
 0x6b4   :  { %v3263_v19 = vpop.eup %3262 }
 0x6b5   :  { %v668_v23 = vmul.f32 %v3263_v19, %v666_v22 }
 0x718   :  { %v671_v20 = vpop.permute.xlu0 %670 }
 0x719   :  { %v673_v21 = vmul.f32 %v3263_v19, %v671_v20 }
 0x71b   :  { %675 = vrot.lane.b32.xlu0 %v673_v21, %s3399_s25 }
 0x78d   :  { %v676_v24 = vpop.permute.xlu0 %675 }
 0x78e   :  { %v678_v25 = vadd.f32 %v676_v24, %v668_v23 }
 0x790   :  { %3264 = vtanh.f32 %v678_v25  ;;  %v692_v28 = vrot.slane %v678_v25, %v3540_v47 }
 0x79a   :  { %v3265_v27 = vpop.eup %3264 }
 0x79b   :  { %681 = vrot.lane.b32.xlu1 %v3265_v27, %s3398_s24 }
 0x79f   :  { %693 = vrot.lane.b32.xlu1 %v692_v28, %s3400_s3 }
 0x80d   :  { %v682_v32 = vpop.permute.xlu1 %681 }
 0x80e   :  { %v3615_v33 = vmul.f32 %v3263_v19, %v682_v32 }
 0x810   :  { %v704_v34 = vrot.slane %v3615_v33, %v3540_v47 }
 0x811   :  { %v694_v35 = vpop.permute.xlu1 %693 }
 0x812   :  { %696 = vst.msk [vmem:[#allocation5] sm:$0x3] %vm265_vm1, %v694_v35  ;;  %705 = vrot.lane.b32.xlu0 %v704_v34, %s3399_s25  ;;  %v3218_v35 = vld [vmem:[%s4010_s2] sm:$0xff]  }
 0x819   :  { %v2875_v36 = vld.sshfl [vmem:[#allocation5] sm:$0x3 pattern:$0x76325410] }
 0x81a   :  { %819 = vrot.lane.b32.xlu1 %v2875_v36, %s3399_s25  ;;  %v3219_v36 = vld [vmem:[%s4010_s2 + $0x8] sm:$0xff]  }
 0x884   :  { %v706_v37 = vpop.permute.xlu0 %705 }
 0x885   :  { %708 = vst.msk [vmem:[#allocation4] sm:$0x3] %vm265_vm1, %v706_v37 }
 0x88c   :  { %v741_v38 = vld [vmem:[#allocation4] sm:$0x3]  ;;  %v820_v56 = vpop.permute.xlu1 %819 }
 0x88d   :  { %v742_v39 = vpack.c.bf16 %v741_v38, %v741_v38 }
 0x88f   :  { %3067 = vmatmul.mubr.msk.bf16.vlgmr.msra.gmra.mrb[12].mxu1 %vm296_vm2, %v742_v39 }
 0x890   :  { %3082 = vmatprep.mubr.msk.bf16.mxu1 %vm3395_vm0, %v3394_v1  ;;  %3079 = vmatpush3.bf16.msra.mxu1 %v3218_v35 }
 0x891   :  { %3080 = vmatprep.subr.bf16.mxu1 %v3394_v1 }
 0x894   :  { %3081 = vmatpush3.bf16.msra.mxu1 %v3219_v36 }
 0x895   :  { %3094 = vmatprep.subr.bf16.mxu1 %v3394_v1 }
 0x962   :  { %v796_v43 = vpop.f32.mrb[12].mxu1 }
 0x963   :  { %v802_v44 = vadd.f32 %v796_v43, %v740_v42  ;;  %v3068_v45 = vpop.f32.mrb[13].mxu1 }
 0x964   :  { %v799_v46 = vpop.f32.mrb[14].mxu1  ;;  %v1039_v45 = vld [vmem:[#allocation3 + $0x5] sm:$0x1] }
 0x965   :  { %3266 = vtanh.f32 %v802_v44  ;;  %v3069_v48 = vpop.f32.mrb[15].mxu1  ;;  %v2874_v50 = vmul.f32 -1.442695, %v802_v44  ;;  %v1040_v46 = vunpack.c.l.bf16 %v1039_v45 }
 0x967   :  { %3268 = vpow2.f32 %v2874_v50  ;;  %v1048_v48 = vadd.f32 %v3549_v8, %v1040_v46 }
 0x96f   :  { %v3267_v49 = vpop.eup %3266 }
 0x970   :  { %824 = vrot.lane.b32.xlu0 %v3267_v49, %s3398_s24 }
 0x971   :  { %v3269_v51 = vpop.eup %3268 }
 0x972   :  { %v806_v52 = vadd.f32 1.0, %v3269_v51 }
 0x974   :  { %3270 = vrcp.f32 %v806_v52 }
 0x97e   :  { %v3271_v53 = vpop.eup %3270 }
 0x97f   :  { %v822_v57 = vmul.f32 %v3271_v53, %v820_v56 }
 0x9e2   :  { %v825_v54 = vpop.permute.xlu0 %824 }
 0x9e3   :  { %v827_v55 = vmul.f32 %v3271_v53, %v825_v54 }
 0x9e5   :  { %829 = vrot.lane.b32.xlu0 %v827_v55, %s3399_s25 }
 0xa57   :  { %v830_v58 = vpop.permute.xlu0 %829 }
 0xa58   :  { %v832_v59 = vadd.f32 %v830_v58, %v822_v57 }
 0xa5a   :  { %3272 = vtanh.f32 %v832_v59  ;;  %v846_v61 = vrot.slane %v832_v59, %v3540_v47 }
 0xa64   :  { %v3273_v60 = vpop.eup %3272 }
 0xa65   :  { %835 = vrot.lane.b32.xlu1 %v3273_v60, %s3398_s24 }
 0xa69   :  { %847 = vrot.lane.b32.xlu1 %v846_v61, %s3400_s3 }
 0xad7   :  { %v836_v2 = vpop.permute.xlu1 %835 }
 0xad8   :  { %v3640_v3 = vmul.f32 %v3271_v53, %v836_v2 }
 0xada   :  { %v858_v4 = vrot.slane %v3640_v3, %v3540_v47 }
 0xadb   :  { %v848_v5 = vpop.permute.xlu1 %847 }
 0xadc   :  { %850 = vst.msk [vmem:[#allocation5] sm:$0x3] %vm265_vm1, %v848_v5  ;;  %859 = vrot.lane.b32.xlu0 %v858_v4, %s3399_s25 }
 0xae3   :  { %v2881_v6 = vld.sshfl [vmem:[#allocation5] sm:$0x3 pattern:$0x76325410] }
 0xae4   :  { %973 = vrot.lane.b32.xlu1 %v2881_v6, %s3399_s25  ;;  %v3220_v6 = vld [vmem:[%s4010_s2] sm:$0xff]  }
 0xb4e   :  { %v860_v7 = vpop.permute.xlu0 %859 }
 0xb4f   :  { %862 = vst.msk [vmem:[#allocation4] sm:$0x3] %vm265_vm1, %v860_v7  ;;  %v3221_v7 = vld [vmem:[%s4010_s2 + $0x8] sm:$0xff]  }
 0xb56   :  { %v895_v9 = vld [vmem:[#allocation4] sm:$0x3]  ;;  %v974_v27 = vpop.permute.xlu1 %973 }
 0xb57   :  { %v896_v10 = vpack.c.bf16 %v895_v9, %v895_v9 }
 0xb59   :  { %3075 = vmatmul.mubr.msk.bf16.vlgmr.msra.gmra.mrb[4].mxu0 %vm296_vm2, %v896_v10 }
 0xb5a   :  { %3090 = vmatprep.mubr.msk.bf16.mxu0 %vm3395_vm0, %v3394_v1  ;;  %3087 = vmatpush3.bf16.msra.mxu0 %v3220_v6 }
 0xb5b   :  { %3088 = vmatprep.subr.bf16.mxu0 %v3394_v1 }
 0xb5e   :  { %3089 = vmatpush3.bf16.msra.mxu0 %v3221_v7  ;;  %v709_v7 = vpack.c.bf16 %v3615_v33, %v3615_v33 }
 0xb5f   :  { %3102 = vmatprep.subr.bf16.mxu0 %v3394_v1 }
 0xc2c   :  { %v950_v14 = vpop.f32.mrb[4].mxu0 }
 0xc2d   :  { %v956_v15 = vadd.f32 %v950_v14, %v894_v13  ;;  %v3076_v16 = vpop.f32.mrb[5].mxu0 }
 0xc2e   :  { %v953_v17 = vpop.f32.mrb[6].mxu0 }
 0xc2f   :  { %3274 = vtanh.f32 %v956_v15  ;;  %v3077_v18 = vpop.f32.mrb[7].mxu0  ;;  %v2880_v20 = vmul.f32 -1.442695, %v956_v15  ;;  %v1193_v17 = vld [vmem:[#allocation3 + $0x6] sm:$0x1] }
 0xc30   :  { %v1194_v18 = vunpack.c.l.bf16 %v1193_v17 }
 0xc31   :  { %3276 = vpow2.f32 %v2880_v20 }
 0xc39   :  { %v3275_v19 = vpop.eup %3274 }
 0xc3a   :  { %978 = vrot.lane.b32.xlu0 %v3275_v19, %s3398_s24  ;;  %v1202_v19 = vadd.f32 %v3549_v8, %v1194_v18 }
 0xc3b   :  { %v3277_v21 = vpop.eup %3276 }
 0xc3c   :  { %v960_v22 = vadd.f32 1.0, %v3277_v21 }
 0xc3e   :  { %3278 = vrcp.f32 %v960_v22 }
 0xc48   :  { %v3279_v23 = vpop.eup %3278 }
 0xc49   :  { %v976_v28 = vmul.f32 %v3279_v23, %v974_v27 }
 0xcac   :  { %v979_v24 = vpop.permute.xlu0 %978 }
 0xcad   :  { %v981_v25 = vmul.f32 %v3279_v23, %v979_v24 }
 0xcaf   :  { %983 = vrot.lane.b32.xlu0 %v981_v25, %s3399_s25 }
 0xd21   :  { %v984_v29 = vpop.permute.xlu0 %983 }
 0xd22   :  { %v986_v31 = vadd.f32 %v984_v29, %v976_v28 }
 0xd24   :  { %3280 = vtanh.f32 %v986_v31  ;;  %v1000_v34 = vrot.slane %v986_v31, %v3540_v47 }
 0xd2e   :  { %v3281_v32 = vpop.eup %3280 }
 0xd2f   :  { %989 = vrot.lane.b32.xlu1 %v3281_v32, %s3398_s24 }
 0xd33   :  { %1001 = vrot.lane.b32.xlu1 %v1000_v34, %s3400_s3 }
 0xda1   :  { %v990_v37 = vpop.permute.xlu1 %989 }
 0xda2   :  { %v3665_v38 = vmul.f32 %v3279_v23, %v990_v37 }
 0xda4   :  { %v1012_v39 = vrot.slane %v3665_v38, %v3540_v47 }
 0xda5   :  { %v1002_v40 = vpop.permute.xlu1 %1001 }
 0xda6   :  { %1004 = vst.msk [vmem:[#allocation5] sm:$0x3] %vm265_vm1, %v1002_v40  ;;  %1013 = vrot.lane.b32.xlu0 %v1012_v39, %s3399_s25 }
 0xdad   :  { %v2887_v41 = vld.sshfl [vmem:[#allocation5] sm:$0x3 pattern:$0x76325410] }
 0xdae   :  { %1127 = vrot.lane.b32.xlu1 %v2887_v41, %s3399_s25 }
 0xe18   :  { %v1014_v42 = vpop.permute.xlu0 %1013 }
 0xe19   :  { %1016 = vst.msk [vmem:[#allocation4] sm:$0x3] %vm265_vm1, %v1014_v42  ;;  %v3222_v42 = vld [vmem:[%s4010_s2] sm:$0xff]  }
 0xe20   :  { %v1049_v43 = vld [vmem:[#allocation4] sm:$0x3]  ;;  %v1128_v61 = vpop.permute.xlu1 %1127 }
 0xe21   :  { %v1050_v44 = vpack.c.bf16 %v1049_v43, %v1049_v43  ;;  %v3223_v43 = vld [vmem:[%s4010_s2 + $0x8] sm:$0xff]  }
 0xe23   :  { %3083 = vmatmul.mubr.msk.bf16.vlgmr.msra.gmra.mrb[16].mxu1 %vm296_vm2, %v1050_v44 }
 0xe24   :  { %3098 = vmatprep.mubr.msk.bf16.mxu1 %vm3395_vm0, %v3394_v1  ;;  %3095 = vmatpush3.bf16.msra.mxu1 %v3222_v42 }
 0xe25   :  { %3096 = vmatprep.subr.bf16.mxu1 %v3394_v1 }
 0xe28   :  { %3097 = vmatpush3.bf16.msra.mxu1 %v3223_v43 }
 0xe29   :  { %3110 = vmatprep.subr.bf16.mxu1 %v3394_v1 }
 0xef6   :  { %v1104_v49 = vpop.f32.mrb[16].mxu1 }
 0xef7   :  { %v1110_v50 = vadd.f32 %v1104_v49, %v1048_v48  ;;  %v3084_v51 = vpop.f32.mrb[17].mxu1 }
 0xef8   :  { %v1107_v52 = vpop.f32.mrb[18].mxu1 }
 0xef9   :  { %3282 = vtanh.f32 %v1110_v50  ;;  %v3085_v53 = vpop.f32.mrb[19].mxu1  ;;  %v2886_v55 = vmul.f32 -1.442695, %v1110_v50 }
 0xefa   :  { %v1347_v53 = vld [vmem:[#allocation3 + $0x7] sm:$0x1] }
 0xefb   :  { %3284 = vpow2.f32 %v2886_v55 }
 0xf03   :  { %v3283_v54 = vpop.eup %3282 }
 0xf04   :  { %1132 = vrot.lane.b32.xlu0 %v3283_v54, %s3398_s24  ;;  %v1348_v54 = vunpack.c.l.bf16 %v1347_v53 }
 0xf05   :  { %v3285_v56 = vpop.eup %3284 }
 0xf06   :  { %v1114_v57 = vadd.f32 1.0, %v3285_v56  ;;  %v1356_v55 = vadd.f32 %v3549_v8, %v1348_v54 }
 0xf08   :  { %3286 = vrcp.f32 %v1114_v57 }
 0xf12   :  { %v3287_v58 = vpop.eup %3286 }
 0xf13   :  { %v1130_v63 = vmul.f32 %v3287_v58, %v1128_v61 }
 0xf76   :  { %v1133_v59 = vpop.permute.xlu0 %1132 }
 0xf77   :  { %v1135_v60 = vmul.f32 %v3287_v58, %v1133_v59 }
 0xf79   :  { %1137 = vrot.lane.b32.xlu0 %v1135_v60, %s3399_s25 }
 0xfeb   :  { %v1138_v0 = vpop.permute.xlu0 %1137 }
 0xfec   :  { %v1140_v2 = vadd.f32 %v1138_v0, %v1130_v63 }
 0xfee   :  { %3288 = vtanh.f32 %v1140_v2  ;;  %v1154_v5 = vrot.slane %v1140_v2, %v3540_v47 }
 0xff8   :  { %v3289_v4 = vpop.eup %3288 }
 0xff9   :  { %1143 = vrot.lane.b32.xlu1 %v3289_v4, %s3398_s24  ;;  %v401_v4 = vpack.c.bf16 %v3565_v30, %v3565_v30 }
 0xffb   :  { %v409_v8 = vrot.slane %v401_v4, %v3512_v26 }
 0xffd   :  { %1155 = vrot.lane.b32.xlu1 %v1154_v5, %s3400_s3 }
0x106b   :  { %v1144_v9 = vpop.permute.xlu1 %1143 }
0x106c   :  { %v3691_v10 = vmul.f32 %v3287_v58, %v1144_v9 }
0x106e   :  { %v1166_v11 = vrot.slane %v3691_v10, %v3540_v47 }
0x106f   :  { %v1156_v12 = vpop.permute.xlu1 %1155 }
0x1070   :  { %1158 = vst.msk [vmem:[#allocation5] sm:$0x3] %vm265_vm1, %v1156_v12  ;;  %1167 = vrot.lane.b32.xlu0 %v1166_v11, %s3399_s25  ;;  %v717_v11 = vrot.slane %v709_v7, %v3512_v26  ;;  %v1017_v12 = vpack.c.bf16 %v3665_v38, %v3665_v38 }
0x1072   :  { %v1025_v30 = vrot.slane %v1017_v12, %v3512_v26 }
0x1077   :  { %v2893_v13 = vld.sshfl [vmem:[#allocation5] sm:$0x3 pattern:$0x76325410] }
0x1078   :  { %1281 = vrot.lane.b32.xlu1 %v2893_v13, %s3399_s25  ;;  %v416_v13 = vrot.slane %v409_v8, %v3512_v26 }
0x10e2   :  { %v1168_v14 = vpop.permute.xlu0 %1167 }
0x10e3   :  { %1170 = vst.msk [vmem:[#allocation4] sm:$0x3] %vm265_vm1, %v1168_v14 }
0x10ea   :  { %v1203_v15 = vld [vmem:[#allocation4] sm:$0x3]  ;;  %v1282_v35 = vpop.permute.xlu1 %1281 }
0x10eb   :  { %v1204_v16 = vpack.c.bf16 %v1203_v15, %v1203_v15  ;;  %v724_v15 = vrot.slane %v717_v11, %v3512_v26 }
0x10ed   :  { %3091 = vmatmul.mubr.msk.bf16.vlgmr.msra.gmra.mrb[8].mxu0 %vm296_vm2, %v1204_v16  ;;  %v1032_v16 = vrot.slane %v1025_v30, %v3512_v26 }
0x10ee   :  { %3106 = vmatprep.mubr.msk.bf16.mxu0 %vm3395_vm0, %v3394_v1 }
0x11c0   :  { %v1258_v20 = vpop.f32.mrb[8].mxu0 }
0x11c1   :  { %v1264_v21 = vadd.f32 %v1258_v20, %v1202_v19  ;;  %v3092_v22 = vpop.f32.mrb[9].mxu0 }
0x11c2   :  { %v1261_v23 = vpop.f32.mrb[10].mxu0  ;;  %v555_v22 = vpack.c.bf16 %v3590_v62, %v3590_v62 }
0x11c3   :  { %3290 = vtanh.f32 %v1264_v21  ;;  %v3093_v24 = vpop.f32.mrb[11].mxu0  ;;  %v2892_v27 = vmul.f32 -1.442695, %v1264_v21 }
0x11c4   :  { %v563_v24 = vrot.slane %v555_v22, %v3512_v26 }
0x11c5   :  { %3292 = vpow2.f32 %v2892_v27 }
0x11cd   :  { %v3291_v25 = vpop.eup %3290 }
0x11ce   :  { %1286 = vrot.lane.b32.xlu0 %v3291_v25, %s3398_s24  ;;  %v863_v25 = vpack.c.bf16 %v3640_v3, %v3640_v3 }
0x11cf   :  { %v3293_v28 = vpop.eup %3292 }
0x11d0   :  { %v1268_v29 = vadd.f32 1.0, %v3293_v28 }
0x11d2   :  { %3294 = vrcp.f32 %v1268_v29  ;;  %v871_v29 = vrot.slane %v863_v25, %v3512_v26 }
0x11dc   :  { %v3295_v31 = vpop.eup %3294 }
0x11dd   :  { %v1284_v36 = vmul.f32 %v3295_v31, %v1282_v35 }
0x1240   :  { %v1287_v32 = vpop.permute.xlu0 %1286 }
0x1241   :  { %v1289_v34 = vmul.f32 %v3295_v31, %v1287_v32  ;;  %v570_v32 = vrot.slane %v563_v24, %v3512_v26 }
0x1243   :  { %1291 = vrot.lane.b32.xlu0 %v1289_v34, %s3399_s25  ;;  %v878_v34 = vrot.slane %v871_v29, %v3512_v26 }
0x12b5   :  { %v1292_v37 = vpop.permute.xlu0 %1291 }
0x12b6   :  { %v1294_v39 = vadd.f32 %v1292_v37, %v1284_v36 }
0x12b8   :  { %3296 = vtanh.f32 %v1294_v39  ;;  %v1308_v41 = vrot.slane %v1294_v39, %v3540_v47 }
0x12c2   :  { %v3297_v40 = vpop.eup %3296 }
0x12c3   :  { %1297 = vrot.lane.b32.xlu1 %v3297_v40, %s3398_s24 }
0x12c7   :  { %1309 = vrot.lane.b32.xlu1 %v1308_v41, %s3400_s3  ;;  %v3225_v41 = vld [vmem:[%s4012_s4 + $0x8] sm:$0xff]  }
0x1335   :  { %v1298_v44 = vpop.permute.xlu1 %1297 }
0x1336   :  { %v1300_v45 = vmul.f32 %v3295_v31, %v1298_v44  ;;  %v1171_v31 = vpack.c.bf16 %v3691_v10, %v3691_v10  ;;  %v3224_v10 = vld [vmem:[%s4012_s4] sm:$0xff]  }
0x1337   :  { %3103 = vmatpush3.bf16.msra.mxu0 %v3224_v10 }
0x1338   :  { %v1320_v46 = vrot.slane %v1300_v45, %v3540_v47  ;;  %v1325_v14 = vpack.c.bf16 %v1300_v45, %v1300_v45  ;;  %v1179_v3 = vrot.slane %v1171_v31, %v3512_v26  ;;  %3104 = vmatprep.subr.bf16.mxu0 %v3394_v1 }
0x1339   :  { %v1310_v48 = vpop.permute.xlu1 %1309 }
0x133a   :  { %1312 = vst.msk [vmem:[#allocation5] sm:$0x3] %vm265_vm1, %v1310_v48  ;;  %1321 = vrot.lane.b32.xlu0 %v1320_v46, %s3399_s25  ;;  %v1333_v33 = vrot.slane %v1325_v14, %v3512_v26  ;;  %v1186_v35 = vrot.slane %v1179_v3, %v3512_v26 }
0x133b   :  { %3105 = vmatpush3.bf16.msra.mxu0 %v3225_v41 }
0x133c   :  { %v1340_v17 = vrot.slane %v1333_v33, %v3512_v26  ;;  %3118 = vmatprep.subr.bf16.mxu0 %v3394_v1 }
0x1341   :  { %v2899_v49 = vld.sshfl [vmem:[#allocation5] sm:$0x3 pattern:$0x76325410] }
0x1342   :  { %1435 = vrot.lane.b32.xlu1 %v2899_v49, %s3399_s25  ;;  %v3226_v49 = vld [vmem:[%s4013_s5] sm:$0xff]  }
0x13ac   :  { %v1322_v50 = vpop.permute.xlu0 %1321 }
0x13ad   :  { %1324 = vst.msk [vmem:[#allocation4] sm:$0x3] %vm265_vm1, %v1322_v50  ;;  %v3227_v50 = vld [vmem:[%s4013_s5 + $0x8] sm:$0xff]  }
0x13b4   :  { %v1357_v51 = vld [vmem:[#allocation4] sm:$0x3]  ;;  %v1436_v38 = vpop.permute.xlu1 %1435 }
0x13b5   :  { %v1358_v52 = vpack.c.bf16 %v1357_v51, %v1357_v51 }
0x13b7   :  { %3099 = vmatmul.mubr.msk.bf16.vlgmr.msra.gmra.mrb[20].mxu1 %vm296_vm2, %v1358_v52 }
0x13b8   :  { %3114 = vmatprep.mubr.msk.bf16.mxu1 %vm3395_vm0, %v3394_v1  ;;  %3111 = vmatpush3.bf16.msra.mxu1 %v3226_v49 }
0x13b9   :  { %3112 = vmatprep.subr.bf16.mxu1 %v3394_v1 }
0x13bc   :  { %3113 = vmatpush3.bf16.msra.mxu1 %v3227_v50 }
0x13bd   :  { %3126 = vmatprep.subr.bf16.mxu1 %v3394_v1 }
0x148a   :  { %v1412_v56 = vpop.f32.mrb[20].mxu1 }
0x148b   :  { %v1418_v57 = vadd.f32 %v1412_v56, %v1356_v55  ;;  %v3100_v58 = vpop.f32.mrb[21].mxu1 }
0x148c   :  { %v1415_v59 = vpop.f32.mrb[22].mxu1 }
0x148d   :  { %3298 = vtanh.f32 %v1418_v57  ;;  %v3101_v60 = vpop.f32.mrb[23].mxu1  ;;  %v2898_v63 = vmul.f32 -1.442695, %v1418_v57 }
0x148f   :  { %3300 = vpow2.f32 %v2898_v63 }
0x1497   :  { %v3299_v61 = vpop.eup %3298 }
0x1498   :  { %1440 = vrot.lane.b32.xlu0 %v3299_v61, %s3398_s24 }
0x1499   :  { %v3301_v0 = vpop.eup %3300 }
0x149a   :  { %v1422_v2 = vadd.f32 1.0, %v3301_v0 }
0x149c   :  { %3302 = vrcp.f32 %v1422_v2 }
0x14a6   :  { %v3303_v5 = vpop.eup %3302 }
0x14a7   :  { %v1438_v18 = vmul.f32 %v3303_v5, %v1436_v38 }
0x150a   :  { %v1441_v6 = vpop.permute.xlu0 %1440 }
0x150b   :  { %v1443_v9 = vmul.f32 %v3303_v5, %v1441_v6 }
0x150d   :  { %1445 = vrot.lane.b32.xlu0 %v1443_v9, %s3399_s25 }
0x1511   :  { %417 = vrot.lane.b32.xlu0 %v416_v13, %s3399_s25 }
0x1515   :  { %725 = vrot.lane.b32.xlu0 %v724_v15, %s3399_s25 }
0x1519   :  { %1033 = vrot.lane.b32.xlu0 %v1032_v16, %s3399_s25 }
0x151d   :  { %1341 = vrot.lane.b32.xlu0 %v1340_v17, %s3399_s25 }
0x157f   :  { %v1446_v19 = vpop.permute.xlu0 %1445 }
0x1580   :  { %v1448_v20 = vadd.f32 %v1446_v19, %v1438_v18 }
0x1582   :  { %3304 = vtanh.f32 %v1448_v20  ;;  %v1462_v46 = vrot.slane %v1448_v20, %v3540_v47 }
0x1583   :  { %v418_v21 = vpop.permute.xlu0 %417 }
0x1584   :  { %421 = vst.msk [vmem:[#allocation2] sm:$0x1] %vm420_vm3, %v418_v21 }
0x1587   :  { %v726_v23 = vpop.permute.xlu0 %725 }
0x1588   :  { %729 = vst.msk [vmem:[#allocation2 + $0x2] sm:$0x1] %vm420_vm3, %v726_v23 }
0x158b   :  { %v1034_v27 = vpop.permute.xlu0 %1033  ;;  %v1500_v58 = vld [vmem:[#allocation2] sm:$0x1] }
0x158c   :  { %v3305_v28 = vpop.eup %3304  ;;  %1037 = vst.msk [vmem:[#allocation2 + $0x4] sm:$0x1] %vm420_vm3, %v1034_v27 }
0x158d   :  { %1451 = vrot.lane.b32.xlu1 %v3305_v28, %s3398_s24 }
0x158f   :  { %v1342_v62 = vpop.permute.xlu0 %1341  ;;  %v1502_v55 = vld [vmem:[#allocation2 + $0x2] sm:$0x1] }
0x1590   :  { %1345 = vst.msk [vmem:[#allocation2 + $0x6] sm:$0x1] %vm420_vm3, %v1342_v62 }
0x1591   :  { %571 = vrot.lane.b32.xlu1 %v570_v32, %s3399_s25 }
0x1593   :  { %v1504_v63 = vld [vmem:[#allocation2 + $0x4] sm:$0x1] }
0x1595   :  { %879 = vrot.lane.b32.xlu1 %v878_v34, %s3399_s25 }
0x1599   :  { %1187 = vrot.lane.b32.xlu1 %v1186_v35, %s3399_s25 }
0x15ff   :  { %v1452_v36 = vpop.permute.xlu1 %1451 }
0x1600   :  { %v1454_v37 = vmul.f32 %v3303_v5, %v1452_v36  ;;  %v1506_v5 = vld [vmem:[#allocation2 + $0x6] sm:$0x1] }
0x1602   :  { %v1474_v39 = vrot.slane %v1454_v37, %v3540_v47  ;;  %v1479_v40 = vpack.c.bf16 %v1454_v37, %v1454_v37 }
0x1603   :  { %v572_v42 = vpop.permute.xlu1 %571 }
0x1604   :  { %v1487_v43 = vrot.slane %v1479_v40, %v3512_v26  ;;  %575 = vst.msk [vmem:[#allocation2 + $0x1] sm:$0x1] %vm420_vm3, %v572_v42  ;;  %1475 = vrot.lane.b32.xlu0 %v1474_v39, %s3399_s25  ;;  %v3818_v42 = vld [vmem:[%s4014_s6] ss:$0 sm:$0xff] }
0x1606   :  { %v1494_v44 = vrot.slane %v1487_v43, %v3512_v26 }
0x1607   :  { %v880_v45 = vpop.permute.xlu1 %879 }
0x1608   :  { %883 = vst.msk [vmem:[#allocation2 + $0x3] sm:$0x1] %vm420_vm3, %v880_v45  ;;  %1495 = vrot.lane.b32.xlu1 %v1494_v44, %s3399_s25 }
0x160b   :  { %v1188_v48 = vpop.permute.xlu1 %1187  ;;  %v1501_v54 = vld [vmem:[#allocation2 + $0x1] sm:$0x1] }
0x160c   :  { %1191 = vst.msk [vmem:[#allocation2 + $0x5] sm:$0x1] %vm420_vm3, %v1188_v48  ;;  %1463 = vrot.lane.b32.xlu1 %v1462_v46, %s3400_s3  ;;  %v1520_v60 = vcombine.low %v1500_v58, %v1501_v54 }
0x160e   :  { %v1530_v7 = vrot.slane %v1520_v60, %v3512_v26  ;;  %v3228_v60 = vld [vmem:[%s4013_s5] sm:$0xff]  }
0x160f   :  { %v1503_v53 = vld [vmem:[#allocation2 + $0x3] sm:$0x1] }
0x1610   :  { %v1521_v56 = vcombine.low %v1502_v55, %v1503_v53 }
0x1612   :  { %v1537_v4 = vrot.slane %v1521_v56, %v3512_v26 }
0x1613   :  { %v1505_v59 = vld [vmem:[#allocation2 + $0x5] sm:$0x1] }
0x1614   :  { %v1522_v2 = vcombine.low %v1504_v63, %v1505_v59  ;;  %v1552_v12 = vcombine.low %v1530_v7, %v1537_v4 }
0x1616   :  { %v1544_v9 = vrot.slane %v1522_v2, %v3512_v26  ;;  %v1560_v14 = vrot.slane %v1552_v12, %v3512_v26 }
0x1676   :  { %v1476_v51 = vpop.permute.xlu0 %1475 }
0x1677   :  { %1478 = vst.msk [vmem:[#allocation4] sm:$0x3] %vm265_vm1, %v1476_v51 }
0x1678   :  { %1685 = vst.msk [vmem:[#allocation4] sm:$0x3] %vm265_vm1, %v3394_v1 }
0x167a   :  { %v1496_v52 = vpop.permute.xlu1 %1495 }
0x167b   :  { %1499 = vst.msk [vmem:[#allocation2 + $0x7] sm:$0x1] %vm420_vm3, %v1496_v52 }
0x167e   :  { %v1464_v57 = vpop.permute.xlu1 %1463 }
0x167f   :  { %1466 = vst.msk [vmem:[#allocation5] sm:$0x3] %vm265_vm1, %v1464_v57  ;;  %v1697_v61 = vld [vmem:[#allocation4] sm:$0x3] }
0x1680   :  { %1686 = vst.msk [vmem:[#allocation5] sm:$0x3] %vm265_vm1, %v3394_v1  ;;  %v1698_v0 = vpack.c.bf16 %v1697_v61, %v1697_v61  ;;  %v3229_v61 = vld [vmem:[%s4013_s5 + $0x8] sm:$0xff]  }
0x1682   :  { %v1507_v6 = vld [vmem:[#allocation2 + $0x7] sm:$0x1]  ;;  %3115 = vmatmul.mubr.msk.bf16.vlgmr.msra.gmra.mrb[24].mxu1 %vm296_vm2, %v1698_v0 }
0x1683   :  { %v1523_v8 = vcombine.low %v1506_v5, %v1507_v6  ;;  %3130 = vmatprep.mubr.msk.bf16.mxu1 %vm3395_vm0, %v3394_v1 }
0x1685   :  { %v1551_v11 = vrot.slane %v1523_v8, %v3512_v26 }
0x1687   :  { %v1553_v13 = vcombine.low %v1544_v9, %v1551_v11  ;;  %v2908_v30 = vld.sshfl [vmem:[#allocation5] sm:$0x3 pattern:$0x76325410] }
0x1688   :  { %1775 = vrot.lane.b32.xlu1 %v2908_v30, %s3399_s25 }
0x1689   :  { %v1567_v15 = vrot.slane %v1553_v13, %v3512_v26 }
0x168b   :  { %v1568_v33 = vcombine.low %v1560_v14, %v1567_v15 }
0x168d   :  { %3107 = vmatmul.mubr.msk.bf16.vlgmr.msra.gmra.mrb[12].mxu0 %vm296_vm2, %v1568_v33 }
0x168e   :  { %3122 = vmatprep.mubr.msk.bf16.mxu0 %vm3395_vm0, %v3394_v1  ;;  %3119 = vmatpush3.bf16.msra.mxu0 %v3228_v60 }
0x168f   :  { %3120 = vmatprep.subr.bf16.mxu0 %v3394_v1 }
0x1692   :  { %3121 = vmatpush3.bf16.msra.mxu0 %v3229_v61  ;;  %v3232_v61 = vld [vmem:[%s4013_s5] sm:$0xff]  }
0x1693   :  { %3134 = vmatprep.subr.bf16.mxu0 %v3394_v1 }
0x16fa   :  { %v1776_v54 = vpop.permute.xlu1 %1775 }
0x1755   :  { %v1752_v16 = vpop.f32.mrb[24].mxu1 }
0x1756   :  { %v3116_v17 = vpop.f32.mrb[25].mxu1 }
0x1757   :  { %v1755_v38 = vpop.f32.mrb[26].mxu1 }
0x1758   :  { %v3117_v18 = vpop.f32.mrb[27].mxu1 }
0x1760   :  { %v1618_v19 = vpop.f32.mrb[12].mxu0 }
0x1761   :  { %v1627_v20 = vcombine.high %v1618_v19, %v1618_v19  ;;  %v1634_v21 = vrot.slane %v1618_v19, %v3540_v47  ;;  %v3108_v22 = vpop.f32.mrb[13].mxu0 }
0x1762   :  { %v1621_v23 = vpop.f32.mrb[14].mxu0 }
0x1763   :  { %v1641_v24 = vrot.slane %v1627_v20, %v3540_v47  ;;  %v1642_v25 = vcombine.high %v1634_v21, %v1634_v21  ;;  %v1669_v26 = vpack.c.bf16 %v1634_v21, %v1634_v21  ;;  %v1644_v27 = vcombine.high %v1621_v23, %v1621_v23  ;;  %v3109_v28 = vpop.f32.mrb[15].mxu0 }
0x1764   :  { %v1651_v29 = vrot.slane %v1621_v23, %v3540_v47  ;;  %v3230_v28 = vld [vmem:[%s4013_s5] sm:$0xff]  }
0x1765   :  { %v1643_v31 = vcombine.high %v1641_v24, %v1641_v24  ;;  %v1670_v62 = vpack.c.bf16 %v1642_v25, %v1642_v25  ;;  %v1671_v32 = vpack.c.bf16 %v1641_v24, %v1641_v24  ;;  %1677 = vst [vmem:[#allocation3] sm:$0x1] %v1669_v26  ;;  %v1658_v3 = vrot.slane %v1644_v27, %v3540_v47 }
0x1766   :  { %v1659_v34 = vcombine.high %v1651_v29, %v1651_v29  ;;  %v1673_v35 = vpack.c.bf16 %v1651_v29, %v1651_v29  ;;  %3127 = vmatpush3.bf16.msra.mxu1 %v3230_v28  ;;  %v3231_v29 = vld [vmem:[%s4013_s5 + $0x8] sm:$0xff]  }
0x1767   :  { %v1672_v36 = vpack.c.bf16 %v1643_v31, %v1643_v31  ;;  %1678 = vst [vmem:[#allocation3 + $0x1] sm:$0x1] %v1670_v62  ;;  %1679 = vst [vmem:[#allocation3 + $0x2] sm:$0x1] %v1671_v32  ;;  %v1660_v37 = vcombine.high %v1658_v3, %v1658_v3  ;;  %v1675_v10 = vpack.c.bf16 %v1658_v3, %v1658_v3  ;;  %3128 = vmatprep.subr.bf16.mxu1 %v3394_v1 }
0x1768   :  { %v1674_v39 = vpack.c.bf16 %v1659_v34, %v1659_v34  ;;  %1681 = vst [vmem:[#allocation3 + $0x4] sm:$0x1] %v1673_v35 }
0x1769   :  { %1680 = vst [vmem:[#allocation3 + $0x3] sm:$0x1] %v1672_v36  ;;  %v1676_v40 = vpack.c.bf16 %v1660_v37, %v1660_v37  ;;  %1683 = vst [vmem:[#allocation3 + $0x6] sm:$0x1] %v1675_v10 }
0x176a   :  { %1682 = vst [vmem:[#allocation3 + $0x5] sm:$0x1] %v1674_v39  ;;  %3129 = vmatpush3.bf16.msra.mxu1 %v3231_v29  ;;  %v3234_v29 = vld [vmem:[%s4013_s5] sm:$0xff]  }
0x176b   :  { %1684 = vst [vmem:[#allocation3 + $0x7] sm:$0x1] %v1676_v40  ;;  %3142 = vmatprep.subr.bf16.mxu1 %v3394_v1 }
0x176c   :  { %v1687_v41 = vld [vmem:[#allocation3] sm:$0x1] }
0x176d   :  { %v1688_v43 = vunpack.c.l.bf16 %v1687_v41 }
0x176e   :  { %v1819_v9 = vld [vmem:[#allocation3 + $0x1] sm:$0x1]  ;;  %v1951_v10 = vld [vmem:[#allocation3 + $0x2] sm:$0x1] }
0x176f   :  { %v1696_v44 = vadd.f32 %v3818_v42, %v1688_v43  ;;  %v1820_v11 = vunpack.c.l.bf16 %v1819_v9  ;;  %v1952_v39 = vunpack.c.l.bf16 %v1951_v10 }
0x1771   :  { %v1758_v45 = vadd.f32 %v1752_v16, %v1696_v44  ;;  %v1828_v12 = vadd.f32 %v3818_v42, %v1820_v11  ;;  %v1960_v40 = vadd.f32 %v3818_v42, %v1952_v39  ;;  %v2083_v11 = vld [vmem:[#allocation3 + $0x3] sm:$0x1]  ;;  %v2215_v39 = vld [vmem:[#allocation3 + $0x4] sm:$0x1] }
0x1773   :  { %3306 = vtanh.f32 %v1758_v45  ;;  %v2907_v48 = vmul.f32 -1.442695, %v1758_v45 }
0x1775   :  { %3308 = vpow2.f32 %v2907_v48 }
0x177d   :  { %v3307_v46 = vpop.eup %3306 }
0x177e   :  { %1780 = vrot.lane.b32.xlu0 %v3307_v46, %s3398_s24 }
0x177f   :  { %v3309_v49 = vpop.eup %3308 }
0x1780   :  { %v1762_v50 = vadd.f32 1.0, %v3309_v49 }
0x1782   :  { %3310 = vrcp.f32 %v1762_v50 }
0x178c   :  { %v3311_v51 = vpop.eup %3310 }
0x178d   :  { %v1778_v55 = vmul.f32 %v3311_v51, %v1776_v54 }
0x17f0   :  { %v1781_v52 = vpop.permute.xlu0 %1780 }
0x17f1   :  { %v1783_v53 = vmul.f32 %v3311_v51, %v1781_v52 }
0x17f3   :  { %1785 = vrot.lane.b32.xlu0 %v1783_v53, %s3399_s25 }
0x1865   :  { %v1786_v56 = vpop.permute.xlu0 %1785 }
0x1866   :  { %v1788_v57 = vadd.f32 %v1786_v56, %v1778_v55 }
0x1868   :  { %3312 = vtanh.f32 %v1788_v57  ;;  %v1802_v59 = vrot.slane %v1788_v57, %v3540_v47 }
0x1872   :  { %v3313_v58 = vpop.eup %3312 }
0x1873   :  { %1791 = vrot.lane.b32.xlu1 %v3313_v58, %s3398_s24 }
0x1877   :  { %1803 = vrot.lane.b32.xlu1 %v1802_v59, %s3400_s3 }
0x18e5   :  { %v1792_v63 = vpop.permute.xlu1 %1791 }
0x18e6   :  { %v1794_v0 = vmul.f32 %v3311_v51, %v1792_v63  ;;  %v3233_v63 = vld [vmem:[%s4013_s5 + $0x8] sm:$0xff]  }
0x18e8   :  { %v1814_v2 = vrot.slane %v1794_v0, %v3540_v47 }
0x18e9   :  { %v1804_v4 = vpop.permute.xlu1 %1803 }
0x18ea   :  { %1806 = vst.msk [vmem:[#allocation5] sm:$0x3] %vm265_vm1, %v1804_v4  ;;  %1815 = vrot.lane.b32.xlu0 %v1814_v2, %s3399_s25 }
0x18f1   :  { %v2914_v5 = vld.sshfl [vmem:[#allocation5] sm:$0x3 pattern:$0x76325410] }
0x18f2   :  { %1907 = vrot.lane.b32.xlu1 %v2914_v5, %s3399_s25 }
0x195c   :  { %v1816_v6 = vpop.permute.xlu0 %1815 }
0x195d   :  { %1818 = vst.msk [vmem:[#allocation4] sm:$0x3] %vm265_vm1, %v1816_v6 }
0x1964   :  { %v1829_v8 = vld [vmem:[#allocation4] sm:$0x3]  ;;  %v1908_v22 = vpop.permute.xlu1 %1907 }
0x1965   :  { %v1830_v7 = vpack.c.bf16 %v1829_v8, %v1829_v8 }
0x1967   :  { %3123 = vmatmul.mubr.msk.bf16.vlgmr.msra.gmra.mrb[16].mxu0 %vm296_vm2, %v1830_v7 }
0x1968   :  { %3138 = vmatprep.mubr.msk.bf16.mxu0 %vm3395_vm0, %v3394_v1  ;;  %3135 = vmatpush3.bf16.msra.mxu0 %v3232_v61 }
0x1969   :  { %3136 = vmatprep.subr.bf16.mxu0 %v3394_v1 }
0x196c   :  { %3137 = vmatpush3.bf16.msra.mxu0 %v3233_v63  ;;  %v3236_v63 = vld [vmem:[%s4013_s5] sm:$0xff]  }
0x196d   :  { %3150 = vmatprep.subr.bf16.mxu0 %v3394_v1 }
0x1a3a   :  { %v1884_v13 = vpop.f32.mrb[16].mxu0 }
0x1a3b   :  { %v1890_v30 = vadd.f32 %v1884_v13, %v1828_v12  ;;  %v3124_v14 = vpop.f32.mrb[17].mxu0  ;;  %v2084_v12 = vunpack.c.l.bf16 %v2083_v11 }
0x1a3c   :  { %v1887_v15 = vpop.f32.mrb[18].mxu0 }
0x1a3d   :  { %3314 = vtanh.f32 %v1890_v30  ;;  %v3125_v33 = vpop.f32.mrb[19].mxu0  ;;  %v2913_v17 = vmul.f32 -1.442695, %v1890_v30  ;;  %v2092_v13 = vadd.f32 %v3818_v42, %v2084_v12  ;;  %v2347_v12 = vld [vmem:[#allocation3 + $0x5] sm:$0x1] }
0x1a3f   :  { %3316 = vpow2.f32 %v2913_v17 }
0x1a47   :  { %v3315_v16 = vpop.eup %3314 }
0x1a48   :  { %1912 = vrot.lane.b32.xlu0 %v3315_v16, %s3398_s24 }
0x1a49   :  { %v3317_v38 = vpop.eup %3316 }
0x1a4a   :  { %v1894_v18 = vadd.f32 1.0, %v3317_v38 }
0x1a4c   :  { %3318 = vrcp.f32 %v1894_v18 }
0x1a56   :  { %v3319_v19 = vpop.eup %3318 }
0x1a57   :  { %v1910_v23 = vmul.f32 %v3319_v19, %v1908_v22 }
0x1aba   :  { %v1913_v20 = vpop.permute.xlu0 %1912 }
0x1abb   :  { %v1915_v21 = vmul.f32 %v3319_v19, %v1913_v20 }
0x1abd   :  { %1917 = vrot.lane.b32.xlu0 %v1915_v21, %s3399_s25 }
0x1b2f   :  { %v1918_v24 = vpop.permute.xlu0 %1917 }
0x1b30   :  { %v1920_v25 = vadd.f32 %v1918_v24, %v1910_v23 }
0x1b32   :  { %3320 = vtanh.f32 %v1920_v25  ;;  %v1934_v27 = vrot.slane %v1920_v25, %v3540_v47 }
0x1b3c   :  { %v3321_v26 = vpop.eup %3320 }
0x1b3d   :  { %1923 = vrot.lane.b32.xlu1 %v3321_v26, %s3398_s24 }
0x1b41   :  { %1935 = vrot.lane.b32.xlu1 %v1934_v27, %s3400_s3 }
0x1baf   :  { %v1924_v31 = vpop.permute.xlu1 %1923 }
0x1bb0   :  { %v1926_v62 = vmul.f32 %v3319_v19, %v1924_v31  ;;  %v3235_v31 = vld [vmem:[%s4013_s5 + $0x8] sm:$0xff]  }
0x1bb2   :  { %v1946_v32 = vrot.slane %v1926_v62, %v3540_v47 }
0x1bb3   :  { %v1936_v3 = vpop.permute.xlu1 %1935 }
0x1bb4   :  { %1938 = vst.msk [vmem:[#allocation5] sm:$0x3] %vm265_vm1, %v1936_v3  ;;  %1947 = vrot.lane.b32.xlu0 %v1946_v32, %s3399_s25 }
0x1bbb   :  { %v2920_v34 = vld.sshfl [vmem:[#allocation5] sm:$0x3 pattern:$0x76325410] }
0x1bbc   :  { %2039 = vrot.lane.b32.xlu1 %v2920_v34, %s3399_s25 }
0x1c26   :  { %v1948_v35 = vpop.permute.xlu0 %1947 }
0x1c27   :  { %1950 = vst.msk [vmem:[#allocation4] sm:$0x3] %vm265_vm1, %v1948_v35 }
0x1c2e   :  { %v1961_v36 = vld [vmem:[#allocation4] sm:$0x3]  ;;  %v2040_v55 = vpop.permute.xlu1 %2039 }
0x1c2f   :  { %v1962_v37 = vpack.c.bf16 %v1961_v36, %v1961_v36 }
0x1c31   :  { %3131 = vmatmul.mubr.msk.bf16.vlgmr.msra.gmra.mrb[28].mxu1 %vm296_vm2, %v1962_v37 }
0x1c32   :  { %3146 = vmatprep.mubr.msk.bf16.mxu1 %vm3395_vm0, %v3394_v1  ;;  %3143 = vmatpush3.bf16.msra.mxu1 %v3234_v29 }
0x1c33   :  { %3144 = vmatprep.subr.bf16.mxu1 %v3394_v1 }
0x1c36   :  { %3145 = vmatpush3.bf16.msra.mxu1 %v3235_v31  ;;  %v3238_v31 = vld [vmem:[%s4013_s5] sm:$0xff]  }
0x1c37   :  { %3158 = vmatprep.subr.bf16.mxu1 %v3394_v1 }
0x1d04   :  { %v2016_v41 = vpop.f32.mrb[28].mxu1 }
0x1d05   :  { %v2022_v43 = vadd.f32 %v2016_v41, %v1960_v40  ;;  %v3132_v44 = vpop.f32.mrb[29].mxu1  ;;  %v2216_v40 = vunpack.c.l.bf16 %v2215_v39 }
0x1d06   :  { %v2019_v45 = vpop.f32.mrb[30].mxu1 }
0x1d07   :  { %3322 = vtanh.f32 %v2022_v43  ;;  %v3133_v46 = vpop.f32.mrb[31].mxu1  ;;  %v2919_v49 = vmul.f32 -1.442695, %v2022_v43  ;;  %v2224_v41 = vadd.f32 %v3818_v42, %v2216_v40  ;;  %v2479_v40 = vld [vmem:[#allocation3 + $0x6] sm:$0x1] }
0x1d09   :  { %3324 = vpow2.f32 %v2919_v49 }
0x1d11   :  { %v3323_v48 = vpop.eup %3322 }
0x1d12   :  { %2044 = vrot.lane.b32.xlu0 %v3323_v48, %s3398_s24 }
0x1d13   :  { %v3325_v50 = vpop.eup %3324 }
0x1d14   :  { %v2026_v51 = vadd.f32 1.0, %v3325_v50 }
0x1d16   :  { %3326 = vrcp.f32 %v2026_v51 }
0x1d20   :  { %v3327_v52 = vpop.eup %3326 }
0x1d21   :  { %v2042_v56 = vmul.f32 %v3327_v52, %v2040_v55 }
0x1d84   :  { %v2045_v53 = vpop.permute.xlu0 %2044 }
0x1d85   :  { %v2047_v54 = vmul.f32 %v3327_v52, %v2045_v53 }
0x1d87   :  { %2049 = vrot.lane.b32.xlu0 %v2047_v54, %s3399_s25 }
0x1df9   :  { %v2050_v57 = vpop.permute.xlu0 %2049 }
0x1dfa   :  { %v2052_v58 = vadd.f32 %v2050_v57, %v2042_v56 }
0x1dfc   :  { %3328 = vtanh.f32 %v2052_v58  ;;  %v2066_v60 = vrot.slane %v2052_v58, %v3540_v47 }
0x1e06   :  { %v3329_v59 = vpop.eup %3328 }
0x1e07   :  { %2055 = vrot.lane.b32.xlu1 %v3329_v59, %s3398_s24 }
0x1e0b   :  { %2067 = vrot.lane.b32.xlu1 %v2066_v60, %s3400_s3 }
0x1e79   :  { %v2056_v0 = vpop.permute.xlu1 %2055 }
0x1e7a   :  { %v2058_v2 = vmul.f32 %v3327_v52, %v2056_v0  ;;  %v3237_v0 = vld [vmem:[%s4013_s5 + $0x8] sm:$0xff]  }
0x1e7c   :  { %v2078_v4 = vrot.slane %v2058_v2, %v3540_v47 }
0x1e7d   :  { %v2068_v5 = vpop.permute.xlu1 %2067 }
0x1e7e   :  { %2070 = vst.msk [vmem:[#allocation5] sm:$0x3] %vm265_vm1, %v2068_v5  ;;  %2079 = vrot.lane.b32.xlu0 %v2078_v4, %s3399_s25 }
0x1e85   :  { %v2926_v6 = vld.sshfl [vmem:[#allocation5] sm:$0x3 pattern:$0x76325410] }
0x1e86   :  { %2171 = vrot.lane.b32.xlu1 %v2926_v6, %s3399_s25 }
0x1ef0   :  { %v2080_v8 = vpop.permute.xlu0 %2079 }
0x1ef1   :  { %2082 = vst.msk [vmem:[#allocation4] sm:$0x3] %vm265_vm1, %v2080_v8 }
0x1ef8   :  { %v2093_v7 = vld [vmem:[#allocation4] sm:$0x3]  ;;  %v2172_v23 = vpop.permute.xlu1 %2171 }
0x1ef9   :  { %v2094_v9 = vpack.c.bf16 %v2093_v7, %v2093_v7 }
0x1efb   :  { %3139 = vmatmul.mubr.msk.bf16.vlgmr.msra.gmra.mrb[20].mxu0 %vm296_vm2, %v2094_v9 }
0x1efc   :  { %3154 = vmatprep.mubr.msk.bf16.mxu0 %vm3395_vm0, %v3394_v1  ;;  %3151 = vmatpush3.bf16.msra.mxu0 %v3236_v63 }
0x1efd   :  { %3152 = vmatprep.subr.bf16.mxu0 %v3394_v1 }
0x1f00   :  { %3153 = vmatpush3.bf16.msra.mxu0 %v3237_v0  ;;  %v3240_v0 = vld [vmem:[%s4013_s5] sm:$0xff]  }
0x1f01   :  { %3166 = vmatprep.subr.bf16.mxu0 %v3394_v1 }
0x1fce   :  { %v2148_v30 = vpop.f32.mrb[20].mxu0 }
0x1fcf   :  { %v2154_v14 = vadd.f32 %v2148_v30, %v2092_v13  ;;  %v3140_v15 = vpop.f32.mrb[21].mxu0  ;;  %v2348_v13 = vunpack.c.l.bf16 %v2347_v12 }
0x1fd0   :  { %v2151_v33 = vpop.f32.mrb[22].mxu0 }
0x1fd1   :  { %3330 = vtanh.f32 %v2154_v14  ;;  %v3141_v16 = vpop.f32.mrb[23].mxu0  ;;  %v2925_v38 = vmul.f32 -1.442695, %v2154_v14  ;;  %v2356_v30 = vadd.f32 %v3818_v42, %v2348_v13 }
0x1fd3   :  { %3332 = vpow2.f32 %v2925_v38 }
0x1fdb   :  { %v3331_v17 = vpop.eup %3330 }
0x1fdc   :  { %2176 = vrot.lane.b32.xlu0 %v3331_v17, %s3398_s24 }
0x1fdd   :  { %v3333_v18 = vpop.eup %3332 }
0x1fde   :  { %v2158_v19 = vadd.f32 1.0, %v3333_v18 }
0x1fe0   :  { %3334 = vrcp.f32 %v2158_v19 }
0x1fea   :  { %v3335_v20 = vpop.eup %3334 }
0x1feb   :  { %v2174_v24 = vmul.f32 %v3335_v20, %v2172_v23 }
0x204e   :  { %v2177_v21 = vpop.permute.xlu0 %2176 }
0x204f   :  { %v2179_v22 = vmul.f32 %v3335_v20, %v2177_v21 }
0x2051   :  { %2181 = vrot.lane.b32.xlu0 %v2179_v22, %s3399_s25 }
0x20c3   :  { %v2182_v25 = vpop.permute.xlu0 %2181 }
0x20c4   :  { %v2184_v26 = vadd.f32 %v2182_v25, %v2174_v24 }
0x20c6   :  { %3336 = vtanh.f32 %v2184_v26  ;;  %v2198_v28 = vrot.slane %v2184_v26, %v3540_v47 }
0x20d0   :  { %v3337_v27 = vpop.eup %3336 }
0x20d1   :  { %2187 = vrot.lane.b32.xlu1 %v3337_v27, %s3398_s24 }
0x20d5   :  { %2199 = vrot.lane.b32.xlu1 %v2198_v28, %s3400_s3 }
0x2143   :  { %v2188_v62 = vpop.permute.xlu1 %2187 }
0x2144   :  { %v2190_v32 = vmul.f32 %v3335_v20, %v2188_v62  ;;  %v3239_v62 = vld [vmem:[%s4013_s5 + $0x8] sm:$0xff]  }
0x2146   :  { %v2210_v3 = vrot.slane %v2190_v32, %v3540_v47 }
0x2147   :  { %v2200_v34 = vpop.permute.xlu1 %2199 }
0x2148   :  { %2202 = vst.msk [vmem:[#allocation5] sm:$0x3] %vm265_vm1, %v2200_v34  ;;  %2211 = vrot.lane.b32.xlu0 %v2210_v3, %s3399_s25 }
0x214f   :  { %v2932_v35 = vld.sshfl [vmem:[#allocation5] sm:$0x3 pattern:$0x76325410] }
0x2150   :  { %2303 = vrot.lane.b32.xlu1 %v2932_v35, %s3399_s25 }
0x21ba   :  { %v2212_v36 = vpop.permute.xlu0 %2211 }
0x21bb   :  { %2214 = vst.msk [vmem:[#allocation4] sm:$0x3] %vm265_vm1, %v2212_v36 }
0x21c2   :  { %v2225_v37 = vld [vmem:[#allocation4] sm:$0x3]  ;;  %v2304_v56 = vpop.permute.xlu1 %2303 }
0x21c3   :  { %v2226_v10 = vpack.c.bf16 %v2225_v37, %v2225_v37 }
0x21c5   :  { %3147 = vmatmul.mubr.msk.bf16.vlgmr.msra.gmra.mrb[32].mxu1 %vm296_vm2, %v2226_v10 }
0x21c6   :  { %3162 = vmatprep.mubr.msk.bf16.mxu1 %vm3395_vm0, %v3394_v1  ;;  %3159 = vmatpush3.bf16.msra.mxu1 %v3238_v31  ;;  %v2744_v31 = vld [vmem:[%s4015_s7] sm:$0xff] }
0x21c7   :  { %3160 = vmatprep.subr.bf16.mxu1 %v3394_v1 }
0x21ca   :  { %3161 = vmatpush3.bf16.msra.mxu1 %v3239_v62  ;;  %v2745_v62 = vld [vmem:[%s4015_s7 + $0x8] sm:$0xff] }
0x2298   :  { %v2280_v43 = vpop.f32.mrb[32].mxu1 }
0x2299   :  { %v2286_v44 = vadd.f32 %v2280_v43, %v2224_v41  ;;  %v3148_v45 = vpop.f32.mrb[33].mxu1  ;;  %v2480_v41 = vunpack.c.l.bf16 %v2479_v40 }
0x229a   :  { %v2283_v46 = vpop.f32.mrb[34].mxu1 }
0x229b   :  { %3338 = vtanh.f32 %v2286_v44  ;;  %v3149_v48 = vpop.f32.mrb[35].mxu1  ;;  %v2931_v50 = vmul.f32 -1.442695, %v2286_v44  ;;  %v2488_v43 = vadd.f32 %v3818_v42, %v2480_v41 }
0x229d   :  { %3340 = vpow2.f32 %v2931_v50 }
0x22a5   :  { %v3339_v49 = vpop.eup %3338 }
0x22a6   :  { %2308 = vrot.lane.b32.xlu0 %v3339_v49, %s3398_s24 }
0x22a7   :  { %v3341_v51 = vpop.eup %3340 }
0x22a8   :  { %v2290_v52 = vadd.f32 1.0, %v3341_v51 }
0x22aa   :  { %3342 = vrcp.f32 %v2290_v52 }
0x22b4   :  { %v3343_v53 = vpop.eup %3342 }
0x22b5   :  { %v2306_v57 = vmul.f32 %v3343_v53, %v2304_v56 }
0x2318   :  { %v2309_v54 = vpop.permute.xlu0 %2308 }
0x2319   :  { %v2311_v55 = vmul.f32 %v3343_v53, %v2309_v54 }
0x231b   :  { %2313 = vrot.lane.b32.xlu0 %v2311_v55, %s3399_s25 }
0x238d   :  { %v2314_v58 = vpop.permute.xlu0 %2313 }
0x238e   :  { %v2316_v59 = vadd.f32 %v2314_v58, %v2306_v57 }
0x2390   :  { %3344 = vtanh.f32 %v2316_v59  ;;  %v2330_v61 = vrot.slane %v2316_v59, %v3540_v47 }
0x239a   :  { %v3345_v60 = vpop.eup %3344 }
0x239b   :  { %2319 = vrot.lane.b32.xlu1 %v3345_v60, %s3398_s24 }
0x239f   :  { %2331 = vrot.lane.b32.xlu1 %v2330_v61, %s3400_s3 }
0x240d   :  { %v2320_v2 = vpop.permute.xlu1 %2319 }
0x240e   :  { %v2322_v4 = vmul.f32 %v3343_v53, %v2320_v2  ;;  %v3241_v2 = vld [vmem:[%s4013_s5 + $0x8] sm:$0xff]  }
0x2410   :  { %v2342_v5 = vrot.slane %v2322_v4, %v3540_v47 }
0x2411   :  { %v2332_v6 = vpop.permute.xlu1 %2331 }
0x2412   :  { %2334 = vst.msk [vmem:[#allocation5] sm:$0x3] %vm265_vm1, %v2332_v6  ;;  %2343 = vrot.lane.b32.xlu0 %v2342_v5, %s3399_s25 }
0x2419   :  { %v2938_v8 = vld.sshfl [vmem:[#allocation5] sm:$0x3 pattern:$0x76325410] }
0x241a   :  { %2435 = vrot.lane.b32.xlu1 %v2938_v8, %s3399_s25 }
0x2484   :  { %v2344_v7 = vpop.permute.xlu0 %2343 }
0x2485   :  { %2346 = vst.msk [vmem:[#allocation4] sm:$0x3] %vm265_vm1, %v2344_v7 }
0x248c   :  { %v2357_v9 = vld [vmem:[#allocation4] sm:$0x3]  ;;  %v2436_v24 = vpop.permute.xlu1 %2435 }
0x248d   :  { %v2358_v11 = vpack.c.bf16 %v2357_v9, %v2357_v9 }
0x248f   :  { %3155 = vmatmul.mubr.msk.bf16.vlgmr.msra.gmra.mrb[24].mxu0 %vm296_vm2, %v2358_v11 }
0x2490   :  { %3170 = vmatprep.mubr.msk.bf16.mxu0 %vm3395_vm0, %v3394_v1  ;;  %3167 = vmatpush3.bf16.msra.mxu0 %v3240_v0 }
0x2491   :  { %3168 = vmatprep.subr.bf16.mxu0 %v3394_v1 }
0x2494   :  { %3169 = vmatpush3.bf16.msra.mxu0 %v3241_v2 }
0x2562   :  { %v2412_v14 = vpop.f32.mrb[24].mxu0 }
0x2563   :  { %v2418_v15 = vadd.f32 %v2412_v14, %v2356_v30  ;;  %v3156_v33 = vpop.f32.mrb[25].mxu0 }
0x2564   :  { %v2415_v16 = vpop.f32.mrb[26].mxu0 }
0x2565   :  { %3346 = vtanh.f32 %v2418_v15  ;;  %v3157_v17 = vpop.f32.mrb[27].mxu0  ;;  %v2937_v18 = vmul.f32 -1.442695, %v2418_v15 }
0x2567   :  { %3348 = vpow2.f32 %v2937_v18 }
0x256f   :  { %v3347_v38 = vpop.eup %3346 }
0x2570   :  { %2440 = vrot.lane.b32.xlu0 %v3347_v38, %s3398_s24 }
0x2571   :  { %v3349_v19 = vpop.eup %3348 }
0x2572   :  { %v2422_v20 = vadd.f32 1.0, %v3349_v19 }
0x2574   :  { %3350 = vrcp.f32 %v2422_v20 }
0x257e   :  { %v3351_v21 = vpop.eup %3350 }
0x257f   :  { %v2438_v25 = vmul.f32 %v3351_v21, %v2436_v24 }
0x25e2   :  { %v2441_v22 = vpop.permute.xlu0 %2440 }
0x25e3   :  { %v2443_v23 = vmul.f32 %v3351_v21, %v2441_v22 }
0x25e5   :  { %2445 = vrot.lane.b32.xlu0 %v2443_v23, %s3399_s25 }
0x2657   :  { %v2446_v26 = vpop.permute.xlu0 %2445 }
0x2658   :  { %v2448_v27 = vadd.f32 %v2446_v26, %v2438_v25 }
0x265a   :  { %3352 = vtanh.f32 %v2448_v27  ;;  %v2462_v29 = vrot.slane %v2448_v27, %v3540_v47  ;;  %v3401_v27 = vmov 0.0|0.0  }
0x265b   :  { %3185 = vmatprep.subr.bf16.mxu1 %v3401_v27 }
0x2664   :  { %v3353_v28 = vpop.eup %3352 }
0x2665   :  { %2451 = vrot.lane.b32.xlu1 %v3353_v28, %s3398_s24 }
0x2669   :  { %2463 = vrot.lane.b32.xlu1 %v2462_v29, %s3400_s3 }
0x26d7   :  { %v2452_v32 = vpop.permute.xlu1 %2451 }
0x26d8   :  { %v2454_v3 = vmul.f32 %v3351_v21, %v2452_v32  ;;  %v3186_v32 = vpack.c.bf16 %v2745_v62, %v2744_v31 }
0x26da   :  { %v2474_v34 = vrot.slane %v2454_v3, %v3540_v47  ;;  %v2746_v3 = vld [vmem:[%s4015_s7 + $0x10] sm:$0xff] }
0x26db   :  { %v2464_v35 = vpop.permute.xlu1 %2463 }
0x26dc   :  { %2466 = vst.msk [vmem:[#allocation5] sm:$0x3] %vm265_vm1, %v2464_v35  ;;  %2475 = vrot.lane.b32.xlu0 %v2474_v34, %s3399_s25  ;;  %v2747_v34 = vld [vmem:[%s4015_s7 + $0x18] sm:$0xff] }
0x26dd   :  { %v3189_v35 = vpack.c.bf16 %v2747_v34, %v2746_v3 }
0x26e3   :  { %v2944_v36 = vld.sshfl [vmem:[#allocation5] sm:$0x3 pattern:$0x76325410] }
0x26e4   :  { %2567 = vrot.lane.b32.xlu1 %v2944_v36, %s3399_s25 }
0x274e   :  { %v2476_v37 = vpop.permute.xlu0 %2475 }
0x274f   :  { %2478 = vst.msk [vmem:[#allocation4] sm:$0x3] %vm265_vm1, %v2476_v37 }
0x2756   :  { %v2489_v10 = vld [vmem:[#allocation4] sm:$0x3]  ;;  %v2568_v57 = vpop.permute.xlu1 %2567 }
0x2757   :  { %v2490_v39 = vpack.c.bf16 %v2489_v10, %v2489_v10 }
0x2759   :  { %3163 = vmatmul.mubr.msk.bf16.vlgmr.msra.gmra.mrb[36].mxu1 %vm296_vm2, %v2490_v39 }
0x275a   :  { %3182 = vmatprep.mubr.msk.f32.mxu1 %vm3395_vm0, %v3394_v1  ;;  %v2611_v1 = vld [vmem:[#allocation3 + $0x7] sm:$0x1]  ;;  %3187 = vmatpush3.bf16.msra.mxu1 %v3186_v32 }
0x275b   :  { %v2612_v13 = vunpack.c.l.bf16 %v2611_v1  ;;  %3188 = vmatprep.subr.bf16.mxu1 %v3401_v27 }
0x275d   :  { %v2620_v30 = vadd.f32 %v3818_v42, %v2612_v13 }
0x275e   :  { %3190 = vmatpush3.bf16.msra.mxu1 %v3189_v35 }
0x282c   :  { %v2544_v44 = vpop.f32.mrb[36].mxu1 }
0x282d   :  { %v2550_v45 = vadd.f32 %v2544_v44, %v2488_v43  ;;  %v3164_v46 = vpop.f32.mrb[37].mxu1  ;;  %v2951_v43 = vld [vmem:[%s4016_s8] ss:$0 sm:$0xff] }
0x282e   :  { %v2547_v48 = vpop.f32.mrb[38].mxu1 }
0x282f   :  { %3354 = vtanh.f32 %v2550_v45  ;;  %v3165_v49 = vpop.f32.mrb[39].mxu1  ;;  %v2943_v51 = vmul.f32 -1.442695, %v2550_v45 }
0x2831   :  { %3356 = vpow2.f32 %v2943_v51 }
0x2839   :  { %v3355_v50 = vpop.eup %3354 }
0x283a   :  { %2572 = vrot.lane.b32.xlu0 %v3355_v50, %s3398_s24 }
0x283b   :  { %v3357_v52 = vpop.eup %3356 }
0x283c   :  { %v2554_v53 = vadd.f32 1.0, %v3357_v52 }
0x283e   :  { %3358 = vrcp.f32 %v2554_v53 }
0x2848   :  { %v3359_v54 = vpop.eup %3358 }
0x2849   :  { %v2570_v58 = vmul.f32 %v3359_v54, %v2568_v57 }
0x28ac   :  { %v2573_v55 = vpop.permute.xlu0 %2572 }
0x28ad   :  { %v2575_v56 = vmul.f32 %v3359_v54, %v2573_v55 }
0x28af   :  { %2577 = vrot.lane.b32.xlu0 %v2575_v56, %s3399_s25 }
0x2921   :  { %v2578_v59 = vpop.permute.xlu0 %2577 }
0x2922   :  { %v2580_v60 = vadd.f32 %v2578_v59, %v2570_v58 }
0x2924   :  { %3360 = vtanh.f32 %v2580_v60  ;;  %v2594_v63 = vrot.slane %v2580_v60, %v3540_v47 }
0x292e   :  { %v3361_v61 = vpop.eup %3360 }
0x292f   :  { %2583 = vrot.lane.b32.xlu1 %v3361_v61, %s3398_s24 }
0x2933   :  { %2595 = vrot.lane.b32.xlu1 %v2594_v63, %s3400_s3 }
0x29a1   :  { %v2584_v4 = vpop.permute.xlu1 %2583 }
0x29a2   :  { %v2586_v5 = vmul.f32 %v3359_v54, %v2584_v4 }
0x29a4   :  { %v2606_v6 = vrot.slane %v2586_v5, %v3540_v47 }
0x29a5   :  { %v2596_v8 = vpop.permute.xlu1 %2595 }
0x29a6   :  { %2598 = vst.msk [vmem:[#allocation5] sm:$0x3] %vm265_vm1, %v2596_v8  ;;  %2607 = vrot.lane.b32.xlu0 %v2606_v6, %s3399_s25 }
0x29ad   :  { %v2950_v7 = vld.sshfl [vmem:[#allocation5] sm:$0x3 pattern:$0x76325410] }
0x29ae   :  { %2699 = vrot.lane.b32.xlu1 %v2950_v7, %s3399_s25 }
0x2a18   :  { %v2608_v9 = vpop.permute.xlu0 %2607 }
0x2a19   :  { %2610 = vst.msk [vmem:[#allocation4] sm:$0x3] %vm265_vm1, %v2608_v9 }
0x2a20   :  { %v2621_v11 = vld [vmem:[#allocation4] sm:$0x3]  ;;  %v2700_v42 = vpop.permute.xlu1 %2699 }
0x2a21   :  { %v2622_v12 = vpack.c.bf16 %v2621_v11, %v2621_v11 }
0x2a23   :  { %3171 = vmatmul.mubr.msk.bf16.vlgmr.msra.gmra.mrb[28].mxu0 %vm296_vm2, %v2622_v12 }
0x2af6   :  { %v2676_v14 = vpop.f32.mrb[28].mxu0 }
0x2af7   :  { %v2682_v15 = vadd.f32 %v2676_v14, %v2620_v30  ;;  %v3172_v33 = vpop.f32.mrb[29].mxu0 }
0x2af8   :  { %v2679_v16 = vpop.f32.mrb[30].mxu0 }
0x2af9   :  { %3362 = vtanh.f32 %v2682_v15  ;;  %v3173_v17 = vpop.f32.mrb[31].mxu0  ;;  %v2949_v18 = vmul.f32 -1.442695, %v2682_v15 }
0x2afb   :  { %3364 = vpow2.f32 %v2949_v18 }
0x2b03   :  { %v3363_v38 = vpop.eup %3362 }
0x2b04   :  { %2704 = vrot.lane.b32.xlu0 %v3363_v38, %s3398_s24 }
0x2b05   :  { %v3365_v19 = vpop.eup %3364 }
0x2b06   :  { %v2686_v20 = vadd.f32 1.0, %v3365_v19 }
0x2b08   :  { %3366 = vrcp.f32 %v2686_v20 }
0x2b12   :  { %v3367_v21 = vpop.eup %3366 }
0x2b13   :  { %v2702_v24 = vmul.f32 %v3367_v21, %v2700_v42 }
0x2b76   :  { %v2705_v22 = vpop.permute.xlu0 %2704 }
0x2b77   :  { %v2707_v23 = vmul.f32 %v3367_v21, %v2705_v22 }
0x2b79   :  { %2709 = vrot.lane.b32.xlu0 %v2707_v23, %s3399_s25 }
0x2beb   :  { %v2710_v25 = vpop.permute.xlu0 %2709 }
0x2bec   :  { %v2712_v26 = vadd.f32 %v2710_v25, %v2702_v24 }
0x2bee   :  { %3368 = vtanh.f32 %v2712_v26  ;;  %v2726_v29 = vrot.slane %v2712_v26, %v3540_v47 }
0x2bf8   :  { %v3369_v28 = vpop.eup %3368 }
0x2bf9   :  { %2715 = vrot.lane.b32.xlu1 %v3369_v28, %s3398_s24 }
0x2bfd   :  { %2727 = vrot.lane.b32.xlu1 %v2726_v29, %s3400_s3  ;;  %s3402_s3 = smov [#allocation6]  }
0x2bfe   :  { %s2836_s30 = sshll.u32 %s3402_s3, 4  ;;  %s2837_s30 = int_to_ptr.vmem [resolvable:$true] %s2836_s30 }
0x2bff   :  { %s3370_s10 = scalar_lea.vmem %s2837_s30, 32  ;;  %p3375_p1 = scmp.lt.s32.totalorder %s2837_s30, %s2837_s30 }
0x2c00   :  { %p3371_p0 = scmp.ne.s32.totalorder %s2837_s30, %s3370_s10  ;;  %p3376_p2 = scmp.lt.s32.totalorder %s3370_s10, %s3370_s10 }
0x2c02   :  { %p3377_p3 = por %p3376_p2, %p3375_p1 }
0x2c04   :  { %p3378_p4 = pnand %p3377_p3, %p3371_p0 }
0x2c6b   :  { %v2716_v36 = vpop.permute.xlu1 %2715 }
0x2c6c   :  { %v2718_v37 = vmul.f32 %v3367_v21, %v2716_v36 }
0x2c6e   :  { %v2738_v10 = vrot.slane %v2718_v37, %v3540_v47 }
0x2c6f   :  { %v2728_v39 = vpop.permute.xlu1 %2727 }
0x2c70   :  { %2730 = vst.msk [vmem:[#allocation5] sm:$0x3] %vm265_vm1, %v2728_v39  ;;  %2739 = vrot.lane.b32.xlu0 %v2738_v10, %s3399_s25 }
0x2ce2   :  { %v2740_v40 = vpop.permute.xlu0 %2739 }
0x2ce3   :  { %2742 = vst.msk [vmem:[#allocation4] sm:$0x3] %vm265_vm1, %v2740_v40 }
0x2cea   :  { %v2743_v41 = vld [vmem:[#allocation4] sm:$0x3] }
0x2ceb   :  { %3183 = vmatmul.mubr.msk.f32.vlgmr.msra.gmra.mrb[40].mxu1 %vm296_vm2, %v2743_v41 }
0x2dbe   :  { %v2824_v44 = vpop.f32.mrb[40].mxu1 }
0x2dbf   :  { %v2825_v47 = vadd.f32 %v2951_v43, %v2824_v44  ;;  %v3184_v45 = vpop.f32.mrb[41].mxu1 }
0x2dc1   :  { %2829 = vst.msk [vmem:[#allocation6] sm:$0x3] %vm2828_vm4, %v2825_v47 }
0x2dc2   :  { %3381 = shalt.err (!%p3378_p4)
}
0x2dc3   :  { %s3382_s2 = scalar_lea.hbm %s4017_s9, 32 }
0x2dc4   :  { %p3383_p5 = scmp.ne.s32.totalorder %s4017_s9, %s3382_s2  ;;  %p3386_p6 = scmp.lt.u32.totalorder %s3382_s2, %s4017_s9 }
0x2dc6   :  { %p3388_p7 = pnand %p3386_p6, %p3383_p5 }
0x2dc8   :  { %3391 = shalt.err (!%p3388_p7)
}
0x2dc9   :  { %2839 = dma.vmem_to_hbm [thread:$0]  %s2837_s30, 32, %s4017_s9, [#allocation7]  }
0x2dca   :  { %3392 = dma.done.wait [#allocation7], 32  }
0x2dcb   :  { %3393 = vsyncadd [#allocation7], 4294967264 }
0x2dcc   :  { %2843 = vsyncpa [#allocation7], 1 }

</bundles_post_ra>
